<compile_context>
chip_gen: v5e
topology: v5e:2x2
jax: 0.10.0
libtpu: 0.0.40
codegen_flags: <defaults>
</compile_context>

<pallas_src>
from functools import partial

import jax
import jax.numpy as jnp
from jax import lax
from jax.experimental import pallas as pl
from jax.experimental.pallas import tpu as pltpu

LEAKY_SLOPE = 0.2
NEG = -1e30          # bias for padded softmax lanes -> probability exactly 0


# ---------------------------------------------------------------------------
# Fused kernel: MLP -> per-channel gumbel-softmax (straight-through hard one-hot)
# ---------------------------------------------------------------------------
def generator_kernel(invt_ref, x_ref, u_ref,
                     w1_ref, b1_ref, w2_ref, b2_ref,
                     w3_ref, b3_ref, w4_ref, b4_ref, o_ref):
    # o_ref: (n_ch, TB, LP), LP a multiple of 128 (lane-dense stores).
    inv_t = invt_ref[0]

    def leaky(v):                                     # LeakyReLU(0.2) == max(v, 0.2 v)
        return jnp.maximum(v, LEAKY_SLOPE * v)

    # ---- MLP: bf16 operands on the MXU, f32 accumulation / elementwise ----
    h = x_ref[...].astype(jnp.bfloat16)
    h = leaky(jnp.dot(h, w1_ref[...], preferred_element_type=jnp.float32) + b1_ref[...])
    h = leaky(jnp.dot(h.astype(jnp.bfloat16), w2_ref[...],
                      preferred_element_type=jnp.float32) + b2_ref[...])
    h = leaky(jnp.dot(h.astype(jnp.bfloat16), w3_ref[...],
                      preferred_element_type=jnp.float32) + b3_ref[...])
    logits = jnp.dot(h.astype(jnp.bfloat16), w4_ref[...],
                     preferred_element_type=jnp.float32) + b4_ref[...]
    # logits: (TB, n_ch * LP) f32; padded columns carry NEG bias.

    n_ch, _, LP = o_ref.shape
    for c in range(n_ch):                             # static unroll over the 5 channels
        lg = logits[:, c * LP:(c + 1) * LP]           # lane-aligned static slice, (TB, LP)
        u = u_ref[:, c * LP:(c + 1) * LP]             # U[0,1) noise for this channel

        # ---- gumbel transform fused in-kernel (same formula as the PyTorch ref) ----
        g = -jnp.log(-jnp.log(u + 1e-20) + 1e-20)

        # softmax((log_softmax(x)+g)/t) == softmax((x+g)/t): lse is a per-row constant.
        yl = (lg + g) * inv_t
        m = jnp.max(yl, axis=-1, keepdims=True)
        e = jnp.exp(yl - m)
        y = e / jnp.sum(e, axis=-1, keepdims=True)

        # hard one-hot at the first maximal index (torch.max tie-break)
        iota = lax.broadcasted_iota(jnp.int32, y.shape, 1)
        ymax = jnp.max(y, axis=-1, keepdims=True)
        idx = jnp.min(jnp.where(y == ymax, iota, LP), axis=-1, keepdims=True)
        # TODO(synk): forward-only straight-through value; a custom VJP routing
        # gradients through soft y would be needed for training parity with PyTorch.
        o_ref[c] = (iota == idx).astype(jnp.float32)


# ---------------------------------------------------------------------------
# Params
# ---------------------------------------------------------------------------
def init_params(key, latent_size, nZones):
    """PyTorch-Linear-style init: U(-1/sqrt(fan_in), +); weights stored (in, out)."""
    in_dim = latent_size + nZones * nZones
    out_dim = 5 * nZones * nZones + 5
    dims = [(in_dim, 512), (512, 512), (512, 512), (512, out_dim)]
    params = []
    for di, do in dims:
        key, kw, kb = jax.random.split(key, 3)
        bound = 1.0 / float(di) ** 0.5
        w = jax.random.uniform(kw, (di, do), minval=-bound, maxval=bound, dtype=jnp.float32)
        b = jax.random.uniform(kb, (1, do), minval=-bound, maxval=bound, dtype=jnp.float32)
        params += [w, b]
    return params


def pack_params(params, nZones):
    """bf16 weights; pad layer-4 columns so each of the 5 channel groups is 128-lane dense."""
    w1, b1, w2, b2, w3, b3, w4, b4 = params
    L = nZones * nZones + 1
    LP = ((L + 127) // 128) * 128
    hid = w4.shape[0]
    w4p = jnp.zeros((hid, 5, LP), jnp.float32).at[:, :, :L].set(w4.reshape(hid, 5, L))
    b4p = jnp.full((1, 5, LP), NEG, jnp.float32).at[:, :, :L].set(b4.reshape(1, 5, L))
    packed = (w1.astype(jnp.bfloat16), b1,
              w2.astype(jnp.bfloat16), b2,
              w3.astype(jnp.bfloat16), b3,
              w4p.reshape(hid, 5 * LP).astype(jnp.bfloat16),
              b4p.reshape(1, 5 * LP))
    return packed, LP


# ---------------------------------------------------------------------------
# Wrapper
# ---------------------------------------------------------------------------
@partial(jax.jit, static_argnums=(3,))
def generator_forward(z, req, packed, LP, *, temperature=1.0, noise_key=None):
    b, s, _ = req.shape
    n = 5
    L = s * s + 1
    x = jnp.concatenate([z, req.reshape(b, -1)], axis=1).astype(jnp.float32)
    in_dim = x.shape[1]

    w1, b1, w2, b2, w3, b3, w4p, b4p = packed

    # Batch tile: >= 8 sublanes, capped at 128 MXU rows; pad the batch to a multiple.
    TB = min(128, ((b + 7) // 8) * 8)
    b_pad = ((b + TB - 1) // TB) * TB
    x = jnp.pad(x, ((0, b_pad - b), (0, 0)))
    nb = b_pad // TB

    # U[0,1) noise (torch.rand equivalent), one value per (padded) logit; the
    # gumbel transform itself is fused in the kernel.
    u = jax.random.uniform(noise_key, (b_pad, n * LP), dtype=jnp.float32)
    inv_t = (1.0 / jnp.asarray(temperature, jnp.float32)).reshape(1)

    smem = pl.BlockSpec(memory_space=pltpu.MemorySpace.SMEM)

    def const2d(shape):                       # whole weight, VMEM-resident across the grid
        return pl.BlockSpec(shape, lambda i: (0, 0))

    raw = pl.pallas_call(
        generator_kernel,
        out_shape=jax.ShapeDtypeStruct((n, b_pad, LP), jnp.float32),
        grid=(nb,),
        in_specs=[smem,
                  pl.BlockSpec((TB, in_dim), lambda i: (i, 0)),
                  pl.BlockSpec((TB, n * LP), lambda i: (i, 0)),
                  const2d(w1.shape), const2d(b1.shape),
                  const2d(w2.shape), const2d(b2.shape),
                  const2d(w3.shape), const2d(b3.shape),
                  const2d(w4p.shape), const2d(b4p.shape)],
        out_specs=pl.BlockSpec((n, TB, LP), lambda i: (0, i, 0)),
        compiler_params=pltpu.CompilerParams(
            dimension_semantics=("parallel",),
            vmem_limit_bytes=32 * 1024 * 1024),
    )(inv_t, x, u, w1, b1, w2, b2, w3, b3, w4p, b4p)

    # (n, b_pad, LP) -> (b, n, L): drop batch/lane padding outside the kernel.
    return jnp.swapaxes(raw, 0, 1)[:b, :, :L]


if __name__ == "__main__":
    latent_size = 32
    nZones = 8          # s = 8 -> input dim = 32 + 64 = 96, L = 65 (padded to 128)
    batch = 2

    key = jax.random.PRNGKey(0)
    kp, kz, kr, kg = jax.random.split(key, 4)

    params = init_params(kp, latent_size, nZones)
    packed, LP = pack_params(params, nZones)

    z = jax.random.normal(kz, (batch, latent_size), dtype=jnp.float32)
    req = jax.random.normal(kr, (batch, nZones, nZones), dtype=jnp.float32)

    out = generator_forward(z, req, packed, LP, temperature=1.0, noise_key=kg)
    out = jax.block_until_ready(out)

    assert out.shape == (batch, 5, nZones * nZones + 1), out.shape
    # forward value is a hard one-hot per (batch, channel) row
    row_sums = jnp.sum(out, axis=-1)
    assert bool(jnp.allclose(row_sums, 1.0, atol=1e-5)), row_sums
    assert bool(jnp.all(jnp.max(out, axis=-1) == 1.0))

    print("KERNEL_OK")
</pallas_src>

<mosaic_0001>
module attributes {stable_mosaic.version = 11 : i64} {
  func.func @generator_kernel(%arg0: i32, %arg1: memref<1xf32, #tpu.memory_space<smem>>, %arg2: memref<8x96xf32, #tpu.memory_space<vmem>>, %arg3: memref<8x640xf32, #tpu.memory_space<vmem>>, %arg4: memref<96x512xbf16, #tpu.memory_space<vmem>>, %arg5: memref<1x512xf32, #tpu.memory_space<vmem>>, %arg6: memref<512x512xbf16, #tpu.memory_space<vmem>>, %arg7: memref<1x512xf32, #tpu.memory_space<vmem>>, %arg8: memref<512x512xbf16, #tpu.memory_space<vmem>>, %arg9: memref<1x512xf32, #tpu.memory_space<vmem>>, %arg10: memref<512x640xbf16, #tpu.memory_space<vmem>>, %arg11: memref<1x640xf32, #tpu.memory_space<vmem>>, %arg12: memref<5x8x128xf32, #tpu.memory_space<vmem>>) attributes {dimension_semantics = [#tpu.dimension_semantics<parallel>], iteration_bounds = array<i64: 1>, scalar_prefetch = 0 : i64, scratch_operands = 0 : i64, tpu.core_type = #tpu.core_type<tc>, window_params = [{transform_indices = @transform_0, window_bounds = array<i64: 1>}, {transform_indices = @transform_1, window_bounds = array<i64: 8, 96>}, {transform_indices = @transform_2, window_bounds = array<i64: 8, 640>}, {pipeline_mode = #tpu.pipeline_mode<synchronous>, transform_indices = @transform_3, window_bounds = array<i64: 96, 512>}, {pipeline_mode = #tpu.pipeline_mode<synchronous>, transform_indices = @transform_4, window_bounds = array<i64: 1, 512>}, {pipeline_mode = #tpu.pipeline_mode<synchronous>, transform_indices = @transform_5, window_bounds = array<i64: 512, 512>}, {pipeline_mode = #tpu.pipeline_mode<synchronous>, transform_indices = @transform_6, window_bounds = array<i64: 1, 512>}, {pipeline_mode = #tpu.pipeline_mode<synchronous>, transform_indices = @transform_7, window_bounds = array<i64: 512, 512>}, {pipeline_mode = #tpu.pipeline_mode<synchronous>, transform_indices = @transform_8, window_bounds = array<i64: 1, 512>}, {pipeline_mode = #tpu.pipeline_mode<synchronous>, transform_indices = @transform_9, window_bounds = array<i64: 512, 640>}, {pipeline_mode = #tpu.pipeline_mode<synchronous>, transform_indices = @transform_10, window_bounds = array<i64: 1, 640>}, {transform_indices = @transform_11, window_bounds = array<i64: 5, 8, 128>}]} {
    %c0 = arith.constant 0 : index
    %0 = memref.load %arg1[%c0] : memref<1xf32, #tpu.memory_space<smem>>
    %c0_0 = arith.constant 0 : index
    %c0_1 = arith.constant 0 : index
    %1 = vector.load %arg2[%c0_0, %c0_1] : memref<8x96xf32, #tpu.memory_space<vmem>>, vector<8x96xf32>
    %2 = arith.truncf %1 : vector<8x96xf32> to vector<8x96xbf16>
    %c0_2 = arith.constant 0 : index
    %c0_3 = arith.constant 0 : index
    %3 = vector.load %arg4[%c0_2, %c0_3] : memref<96x512xbf16, #tpu.memory_space<vmem>>, vector<96x512xbf16>
    %cst = arith.constant dense<0.000000e+00> : vector<8x512xf32>
    %4 = tpu.matmul %2, %3, %cst {dimension_numbers = #tpu.dot_dimension_numbers<[1], [0], [0], [1], [0, 0, 1, 1], [], []>} : vector<8x96xbf16>, vector<96x512xbf16>, vector<8x512xf32> -> vector<8x512xf32>
    %c0_4 = arith.constant 0 : index
    %c0_5 = arith.constant 0 : index
    %5 = vector.load %arg5[%c0_4, %c0_5] : memref<1x512xf32, #tpu.memory_space<vmem>>, vector<1x512xf32>
    %6 = vector.broadcast %5 : vector<1x512xf32> to vector<8x512xf32>
    %7 = arith.addf %4, %6 : vector<8x512xf32>
    %cst_6 = arith.constant 2.000000e-01 : f32
    %8 = vector.broadcast %cst_6 : f32 to vector<8x512xf32>
    %9 = arith.mulf %8, %7 : vector<8x512xf32>
    %10 = arith.maximumf %7, %9 : vector<8x512xf32>
    %11 = arith.truncf %10 : vector<8x512xf32> to vector<8x512xbf16>
    %c0_7 = arith.constant 0 : index
    %c0_8 = arith.constant 0 : index
    %12 = vector.load %arg6[%c0_7, %c0_8] : memref<512x512xbf16, #tpu.memory_space<vmem>>, vector<512x512xbf16>
    %cst_9 = arith.constant dense<0.000000e+00> : vector<8x512xf32>
    %13 = tpu.matmul %11, %12, %cst_9 {dimension_numbers = #tpu.dot_dimension_numbers<[1], [0], [0], [1], [0, 0, 1, 1], [], []>} : vector<8x512xbf16>, vector<512x512xbf16>, vector<8x512xf32> -> vector<8x512xf32>
    %c0_10 = arith.constant 0 : index
    %c0_11 = arith.constant 0 : index
    %14 = vector.load %arg7[%c0_10, %c0_11] : memref<1x512xf32, #tpu.memory_space<vmem>>, vector<1x512xf32>
    %15 = vector.broadcast %14 : vector<1x512xf32> to vector<8x512xf32>
    %16 = arith.addf %13, %15 : vector<8x512xf32>
    %cst_12 = arith.constant 2.000000e-01 : f32
    %17 = vector.broadcast %cst_12 : f32 to vector<8x512xf32>
    %18 = arith.mulf %17, %16 : vector<8x512xf32>
    %19 = arith.maximumf %16, %18 : vector<8x512xf32>
    %20 = arith.truncf %19 : vector<8x512xf32> to vector<8x512xbf16>
    %c0_13 = arith.constant 0 : index
    %c0_14 = arith.constant 0 : index
    %21 = vector.load %arg8[%c0_13, %c0_14] : memref<512x512xbf16, #tpu.memory_space<vmem>>, vector<512x512xbf16>
    %cst_15 = arith.constant dense<0.000000e+00> : vector<8x512xf32>
    %22 = tpu.matmul %20, %21, %cst_15 {dimension_numbers = #tpu.dot_dimension_numbers<[1], [0], [0], [1], [0, 0, 1, 1], [], []>} : vector<8x512xbf16>, vector<512x512xbf16>, vector<8x512xf32> -> vector<8x512xf32>
    %c0_16 = arith.constant 0 : index
    %c0_17 = arith.constant 0 : index
    %23 = vector.load %arg9[%c0_16, %c0_17] : memref<1x512xf32, #tpu.memory_space<vmem>>, vector<1x512xf32>
    %24 = vector.broadcast %23 : vector<1x512xf32> to vector<8x512xf32>
    %25 = arith.addf %22, %24 : vector<8x512xf32>
    %cst_18 = arith.constant 2.000000e-01 : f32
    %26 = vector.broadcast %cst_18 : f32 to vector<8x512xf32>
    %27 = arith.mulf %26, %25 : vector<8x512xf32>
    %28 = arith.maximumf %25, %27 : vector<8x512xf32>
    %29 = arith.truncf %28 : vector<8x512xf32> to vector<8x512xbf16>
    %c0_19 = arith.constant 0 : index
    %c0_20 = arith.constant 0 : index
    %30 = vector.load %arg10[%c0_19, %c0_20] : memref<512x640xbf16, #tpu.memory_space<vmem>>, vector<512x640xbf16>
    %cst_21 = arith.constant dense<0.000000e+00> : vector<8x640xf32>
    %31 = tpu.matmul %29, %30, %cst_21 {dimension_numbers = #tpu.dot_dimension_numbers<[1], [0], [0], [1], [0, 0, 1, 1], [], []>} : vector<8x512xbf16>, vector<512x640xbf16>, vector<8x640xf32> -> vector<8x640xf32>
    %c0_22 = arith.constant 0 : index
    %c0_23 = arith.constant 0 : index
    %32 = vector.load %arg11[%c0_22, %c0_23] : memref<1x640xf32, #tpu.memory_space<vmem>>, vector<1x640xf32>
    %33 = vector.broadcast %32 : vector<1x640xf32> to vector<8x640xf32>
    %34 = arith.addf %31, %33 : vector<8x640xf32>
    %35 = vector.extract_strided_slice %34 {offsets = [0, 0], sizes = [8, 128], strides = [1, 1]} : vector<8x640xf32> to vector<8x128xf32>
    %c0_24 = arith.constant 0 : index
    %c0_25 = arith.constant 0 : index
    %36 = vector.load %arg3[%c0_24, %c0_25] : memref<8x640xf32, #tpu.memory_space<vmem>>, vector<8x128xf32>
    %cst_26 = arith.constant 9.99999968E-21 : f32
    %37 = vector.broadcast %cst_26 : f32 to vector<8x128xf32>
    %38 = arith.addf %36, %37 : vector<8x128xf32>
    %39 = math.log %38 : vector<8x128xf32>
    %cst_27 = arith.constant 0.000000e+00 : f32
    %40 = vector.broadcast %cst_27 : f32 to vector<8x128xf32>
    %41 = arith.subf %40, %39 : vector<8x128xf32>
    %cst_28 = arith.constant 9.99999968E-21 : f32
    %42 = vector.broadcast %cst_28 : f32 to vector<8x128xf32>
    %43 = arith.addf %41, %42 : vector<8x128xf32>
    %44 = math.log %43 : vector<8x128xf32>
    %cst_29 = arith.constant 0.000000e+00 : f32
    %45 = vector.broadcast %cst_29 : f32 to vector<8x128xf32>
    %46 = arith.subf %45, %44 : vector<8x128xf32>
    %47 = arith.addf %35, %46 : vector<8x128xf32>
    %48 = vector.broadcast %0 : f32 to vector<8x128xf32>
    %49 = arith.mulf %47, %48 : vector<8x128xf32>
    %cst_30 = arith.constant dense<0xFF800000> : vector<8xf32>
    %50 = vector.multi_reduction <maximumf>, %49, %cst_30 [1] : vector<8x128xf32> to vector<8xf32>
    %51 = vector.shape_cast %50 : vector<8xf32> to vector<8x1xf32>
    %52 = vector.broadcast %51 : vector<8x1xf32> to vector<8x128xf32>
    %53 = arith.subf %49, %52 : vector<8x128xf32>
    %54 = math.exp %53 : vector<8x128xf32>
    %cst_31 = arith.constant dense<0.000000e+00> : vector<8xf32>
    %55 = vector.multi_reduction <add>, %54, %cst_31 [1] : vector<8x128xf32> to vector<8xf32>
    %56 = vector.shape_cast %55 : vector<8xf32> to vector<8x1xf32>
    %57 = vector.broadcast %56 : vector<8x1xf32> to vector<8x128xf32>
    %58 = arith.divf %54, %57 : vector<8x128xf32>
    %59 = tpu.iota {dimensions = array<i32: 1>} : vector<8x128xi32>
    %cst_32 = arith.constant dense<0xFF800000> : vector<8xf32>
    %60 = vector.multi_reduction <maximumf>, %58, %cst_32 [1] : vector<8x128xf32> to vector<8xf32>
    %61 = vector.shape_cast %60 : vector<8xf32> to vector<8x1xf32>
    %62 = vector.broadcast %61 : vector<8x1xf32> to vector<8x128xf32>
    %63 = arith.cmpf oeq, %58, %62 : vector<8x128xf32>
    %c128_i32 = arith.constant 128 : i32
    %64 = vector.broadcast %c128_i32 : i32 to vector<8x128xi32>
    %65 = arith.select %63, %59, %64 : vector<8x128xi1>, vector<8x128xi32>
    %cst_33 = arith.constant dense<2147483647> : vector<8xi32>
    %66 = vector.multi_reduction <minsi>, %65, %cst_33 [1] : vector<8x128xi32> to vector<8xi32>
    %67 = vector.shape_cast %66 : vector<8xi32> to vector<8x1xi32>
    %68 = vector.broadcast %67 : vector<8x1xi32> to vector<8x128xi32>
    %69 = arith.cmpi eq, %59, %68 : vector<8x128xi32>
    %70 = arith.extui %69 : vector<8x128xi1> to vector<8x128xi32>
    %71 = arith.sitofp %70 : vector<8x128xi32> to vector<8x128xf32>
    %c0_34 = arith.constant 0 : index
    %c0_35 = arith.constant 0 : index
    %c0_36 = arith.constant 0 : index
    %72 = vector.load %arg12[%c0_34, %c0_35, %c0_36] : memref<5x8x128xf32, #tpu.memory_space<vmem>>, vector<1x8x128xf32>
    %73 = vector.shape_cast %72 : vector<1x8x128xf32> to vector<8x128xf32>
    %74 = vector.shape_cast %71 : vector<8x128xf32> to vector<1x8x128xf32>
    tpu.vector_store %arg12[%c0_34, %c0_35, %c0_36], %74 {strides = array<i32>} : memref<5x8x128xf32, #tpu.memory_space<vmem>>, vector<1x8x128xf32>,
    %75 = vector.extract_strided_slice %34 {offsets = [0, 128], sizes = [8, 128], strides = [1, 1]} : vector<8x640xf32> to vector<8x128xf32>
    %c0_37 = arith.constant 0 : index
    %c128 = arith.constant 128 : index
    %76 = vector.load %arg3[%c0_37, %c128] : memref<8x640xf32, #tpu.memory_space<vmem>>, vector<8x128xf32>
    %cst_38 = arith.constant 9.99999968E-21 : f32
    %77 = vector.broadcast %cst_38 : f32 to vector<8x128xf32>
    %78 = arith.addf %76, %77 : vector<8x128xf32>
    %79 = math.log %78 : vector<8x128xf32>
    %cst_39 = arith.constant 0.000000e+00 : f32
    %80 = vector.broadcast %cst_39 : f32 to vector<8x128xf32>
    %81 = arith.subf %80, %79 : vector<8x128xf32>
    %cst_40 = arith.constant 9.99999968E-21 : f32
    %82 = vector.broadcast %cst_40 : f32 to vector<8x128xf32>
    %83 = arith.addf %81, %82 : vector<8x128xf32>
    %84 = math.log %83 : vector<8x128xf32>
    %cst_41 = arith.constant 0.000000e+00 : f32
    %85 = vector.broadcast %cst_41 : f32 to vector<8x128xf32>
    %86 = arith.subf %85, %84 : vector<8x128xf32>
    %87 = arith.addf %75, %86 : vector<8x128xf32>
    %88 = vector.broadcast %0 : f32 to vector<8x128xf32>
    %89 = arith.mulf %87, %88 : vector<8x128xf32>
    %cst_42 = arith.constant dense<0xFF800000> : vector<8xf32>
    %90 = vector.multi_reduction <maximumf>, %89, %cst_42 [1] : vector<8x128xf32> to vector<8xf32>
    %91 = vector.shape_cast %90 : vector<8xf32> to vector<8x1xf32>
    %92 = vector.broadcast %91 : vector<8x1xf32> to vector<8x128xf32>
    %93 = arith.subf %89, %92 : vector<8x128xf32>
    %94 = math.exp %93 : vector<8x128xf32>
    %cst_43 = arith.constant dense<0.000000e+00> : vector<8xf32>
    %95 = vector.multi_reduction <add>, %94, %cst_43 [1] : vector<8x128xf32> to vector<8xf32>
    %96 = vector.shape_cast %95 : vector<8xf32> to vector<8x1xf32>
    %97 = vector.broadcast %96 : vector<8x1xf32> to vector<8x128xf32>
    %98 = arith.divf %94, %97 : vector<8x128xf32>
    %99 = tpu.iota {dimensions = array<i32: 1>} : vector<8x128xi32>
    %cst_44 = arith.constant dense<0xFF800000> : vector<8xf32>
    %100 = vector.multi_reduction <maximumf>, %98, %cst_44 [1] : vector<8x128xf32> to vector<8xf32>
    %101 = vector.shape_cast %100 : vector<8xf32> to vector<8x1xf32>
    %102 = vector.broadcast %101 : vector<8x1xf32> to vector<8x128xf32>
    %103 = arith.cmpf oeq, %98, %102 : vector<8x128xf32>
    %c128_i32_45 = arith.constant 128 : i32
    %104 = vector.broadcast %c128_i32_45 : i32 to vector<8x128xi32>
    %105 = arith.select %103, %99, %104 : vector<8x128xi1>, vector<8x128xi32>
    %cst_46 = arith.constant dense<2147483647> : vector<8xi32>
    %106 = vector.multi_reduction <minsi>, %105, %cst_46 [1] : vector<8x128xi32> to vector<8xi32>
    %107 = vector.shape_cast %106 : vector<8xi32> to vector<8x1xi32>
    %108 = vector.broadcast %107 : vector<8x1xi32> to vector<8x128xi32>
    %109 = arith.cmpi eq, %99, %108 : vector<8x128xi32>
    %110 = arith.extui %109 : vector<8x128xi1> to vector<8x128xi32>
    %111 = arith.sitofp %110 : vector<8x128xi32> to vector<8x128xf32>
    %c1 = arith.constant 1 : index
    %c0_47 = arith.constant 0 : index
    %c0_48 = arith.constant 0 : index
    %112 = vector.load %arg12[%c1, %c0_47, %c0_48] : memref<5x8x128xf32, #tpu.memory_space<vmem>>, vector<1x8x128xf32>
    %113 = vector.shape_cast %112 : vector<1x8x128xf32> to vector<8x128xf32>
    %114 = vector.shape_cast %111 : vector<8x128xf32> to vector<1x8x128xf32>
    tpu.vector_store %arg12[%c1, %c0_47, %c0_48], %114 {strides = array<i32>} : memref<5x8x128xf32, #tpu.memory_space<vmem>>, vector<1x8x128xf32>,
    %115 = vector.extract_strided_slice %34 {offsets = [0, 256], sizes = [8, 128], strides = [1, 1]} : vector<8x640xf32> to vector<8x128xf32>
    %c0_49 = arith.constant 0 : index
    %c256 = arith.constant 256 : index
    %116 = vector.load %arg3[%c0_49, %c256] : memref<8x640xf32, #tpu.memory_space<vmem>>, vector<8x128xf32>
    %cst_50 = arith.constant 9.99999968E-21 : f32
    %117 = vector.broadcast %cst_50 : f32 to vector<8x128xf32>
    %118 = arith.addf %116, %117 : vector<8x128xf32>
    %119 = math.log %118 : vector<8x128xf32>
    %cst_51 = arith.constant 0.000000e+00 : f32
    %120 = vector.broadcast %cst_51 : f32 to vector<8x128xf32>
    %121 = arith.subf %120, %119 : vector<8x128xf32>
    %cst_52 = arith.constant 9.99999968E-21 : f32
    %122 = vector.broadcast %cst_52 : f32 to vector<8x128xf32>
    %123 = arith.addf %121, %122 : vector<8x128xf32>
    %124 = math.log %123 : vector<8x128xf32>
    %cst_53 = arith.constant 0.000000e+00 : f32
    %125 = vector.broadcast %cst_53 : f32 to vector<8x128xf32>
    %126 = arith.subf %125, %124 : vector<8x128xf32>
    %127 = arith.addf %115, %126 : vector<8x128xf32>
    %128 = vector.broadcast %0 : f32 to vector<8x128xf32>
    %129 = arith.mulf %127, %128 : vector<8x128xf32>
    %cst_54 = arith.constant dense<0xFF800000> : vector<8xf32>
    %130 = vector.multi_reduction <maximumf>, %129, %cst_54 [1] : vector<8x128xf32> to vector<8xf32>
    %131 = vector.shape_cast %130 : vector<8xf32> to vector<8x1xf32>
    %132 = vector.broadcast %131 : vector<8x1xf32> to vector<8x128xf32>
    %133 = arith.subf %129, %132 : vector<8x128xf32>
    %134 = math.exp %133 : vector<8x128xf32>
    %cst_55 = arith.constant dense<0.000000e+00> : vector<8xf32>
    %135 = vector.multi_reduction <add>, %134, %cst_55 [1] : vector<8x128xf32> to vector<8xf32>
    %136 = vector.shape_cast %135 : vector<8xf32> to vector<8x1xf32>
    %137 = vector.broadcast %136 : vector<8x1xf32> to vector<8x128xf32>
    %138 = arith.divf %134, %137 : vector<8x128xf32>
    %139 = tpu.iota {dimensions = array<i32: 1>} : vector<8x128xi32>
    %cst_56 = arith.constant dense<0xFF800000> : vector<8xf32>
    %140 = vector.multi_reduction <maximumf>, %138, %cst_56 [1] : vector<8x128xf32> to vector<8xf32>
    %141 = vector.shape_cast %140 : vector<8xf32> to vector<8x1xf32>
    %142 = vector.broadcast %141 : vector<8x1xf32> to vector<8x128xf32>
    %143 = arith.cmpf oeq, %138, %142 : vector<8x128xf32>
    %c128_i32_57 = arith.constant 128 : i32
    %144 = vector.broadcast %c128_i32_57 : i32 to vector<8x128xi32>
    %145 = arith.select %143, %139, %144 : vector<8x128xi1>, vector<8x128xi32>
    %cst_58 = arith.constant dense<2147483647> : vector<8xi32>
    %146 = vector.multi_reduction <minsi>, %145, %cst_58 [1] : vector<8x128xi32> to vector<8xi32>
    %147 = vector.shape_cast %146 : vector<8xi32> to vector<8x1xi32>
    %148 = vector.broadcast %147 : vector<8x1xi32> to vector<8x128xi32>
    %149 = arith.cmpi eq, %139, %148 : vector<8x128xi32>
    %150 = arith.extui %149 : vector<8x128xi1> to vector<8x128xi32>
    %151 = arith.sitofp %150 : vector<8x128xi32> to vector<8x128xf32>
    %c2 = arith.constant 2 : index
    %c0_59 = arith.constant 0 : index
    %c0_60 = arith.constant 0 : index
    %152 = vector.load %arg12[%c2, %c0_59, %c0_60] : memref<5x8x128xf32, #tpu.memory_space<vmem>>, vector<1x8x128xf32>
    %153 = vector.shape_cast %152 : vector<1x8x128xf32> to vector<8x128xf32>
    %154 = vector.shape_cast %151 : vector<8x128xf32> to vector<1x8x128xf32>
    tpu.vector_store %arg12[%c2, %c0_59, %c0_60], %154 {strides = array<i32>} : memref<5x8x128xf32, #tpu.memory_space<vmem>>, vector<1x8x128xf32>,
    %155 = vector.extract_strided_slice %34 {offsets = [0, 384], sizes = [8, 128], strides = [1, 1]} : vector<8x640xf32> to vector<8x128xf32>
    %c0_61 = arith.constant 0 : index
    %c384 = arith.constant 384 : index
    %156 = vector.load %arg3[%c0_61, %c384] : memref<8x640xf32, #tpu.memory_space<vmem>>, vector<8x128xf32>
    %cst_62 = arith.constant 9.99999968E-21 : f32
    %157 = vector.broadcast %cst_62 : f32 to vector<8x128xf32>
    %158 = arith.addf %156, %157 : vector<8x128xf32>
    %159 = math.log %158 : vector<8x128xf32>
    %cst_63 = arith.constant 0.000000e+00 : f32
    %160 = vector.broadcast %cst_63 : f32 to vector<8x128xf32>
    %161 = arith.subf %160, %159 : vector<8x128xf32>
    %cst_64 = arith.constant 9.99999968E-21 : f32
    %162 = vector.broadcast %cst_64 : f32 to vector<8x128xf32>
    %163 = arith.addf %161, %162 : vector<8x128xf32>
    %164 = math.log %163 : vector<8x128xf32>
    %cst_65 = arith.constant 0.000000e+00 : f32
    %165 = vector.broadcast %cst_65 : f32 to vector<8x128xf32>
    %166 = arith.subf %165, %164 : vector<8x128xf32>
    %167 = arith.addf %155, %166 : vector<8x128xf32>
    %168 = vector.broadcast %0 : f32 to vector<8x128xf32>
    %169 = arith.mulf %167, %168 : vector<8x128xf32>
    %cst_66 = arith.constant dense<0xFF800000> : vector<8xf32>
    %170 = vector.multi_reduction <maximumf>, %169, %cst_66 [1] : vector<8x128xf32> to vector<8xf32>
    %171 = vector.shape_cast %170 : vector<8xf32> to vector<8x1xf32>
    %172 = vector.broadcast %171 : vector<8x1xf32> to vector<8x128xf32>
    %173 = arith.subf %169, %172 : vector<8x128xf32>
    %174 = math.exp %173 : vector<8x128xf32>
    %cst_67 = arith.constant dense<0.000000e+00> : vector<8xf32>
    %175 = vector.multi_reduction <add>, %174, %cst_67 [1] : vector<8x128xf32> to vector<8xf32>
    %176 = vector.shape_cast %175 : vector<8xf32> to vector<8x1xf32>
    %177 = vector.broadcast %176 : vector<8x1xf32> to vector<8x128xf32>
    %178 = arith.divf %174, %177 : vector<8x128xf32>
    %179 = tpu.iota {dimensions = array<i32: 1>} : vector<8x128xi32>
    %cst_68 = arith.constant dense<0xFF800000> : vector<8xf32>
    %180 = vector.multi_reduction <maximumf>, %178, %cst_68 [1] : vector<8x128xf32> to vector<8xf32>
    %181 = vector.shape_cast %180 : vector<8xf32> to vector<8x1xf32>
    %182 = vector.broadcast %181 : vector<8x1xf32> to vector<8x128xf32>
    %183 = arith.cmpf oeq, %178, %182 : vector<8x128xf32>
    %c128_i32_69 = arith.constant 128 : i32
    %184 = vector.broadcast %c128_i32_69 : i32 to vector<8x128xi32>
    %185 = arith.select %183, %179, %184 : vector<8x128xi1>, vector<8x128xi32>
    %cst_70 = arith.constant dense<2147483647> : vector<8xi32>
    %186 = vector.multi_reduction <minsi>, %185, %cst_70 [1] : vector<8x128xi32> to vector<8xi32>
    %187 = vector.shape_cast %186 : vector<8xi32> to vector<8x1xi32>
    %188 = vector.broadcast %187 : vector<8x1xi32> to vector<8x128xi32>
    %189 = arith.cmpi eq, %179, %188 : vector<8x128xi32>
    %190 = arith.extui %189 : vector<8x128xi1> to vector<8x128xi32>
    %191 = arith.sitofp %190 : vector<8x128xi32> to vector<8x128xf32>
    %c3 = arith.constant 3 : index
    %c0_71 = arith.constant 0 : index
    %c0_72 = arith.constant 0 : index
    %192 = vector.load %arg12[%c3, %c0_71, %c0_72] : memref<5x8x128xf32, #tpu.memory_space<vmem>>, vector<1x8x128xf32>
    %193 = vector.shape_cast %192 : vector<1x8x128xf32> to vector<8x128xf32>
    %194 = vector.shape_cast %191 : vector<8x128xf32> to vector<1x8x128xf32>
    tpu.vector_store %arg12[%c3, %c0_71, %c0_72], %194 {strides = array<i32>} : memref<5x8x128xf32, #tpu.memory_space<vmem>>, vector<1x8x128xf32>,
    %195 = vector.extract_strided_slice %34 {offsets = [0, 512], sizes = [8, 128], strides = [1, 1]} : vector<8x640xf32> to vector<8x128xf32>
    %c0_73 = arith.constant 0 : index
    %c512 = arith.constant 512 : index
    %196 = vector.load %arg3[%c0_73, %c512] : memref<8x640xf32, #tpu.memory_space<vmem>>, vector<8x128xf32>
    %cst_74 = arith.constant 9.99999968E-21 : f32
    %197 = vector.broadcast %cst_74 : f32 to vector<8x128xf32>
    %198 = arith.addf %196, %197 : vector<8x128xf32>
    %199 = math.log %198 : vector<8x128xf32>
    %cst_75 = arith.constant 0.000000e+00 : f32
    %200 = vector.broadcast %cst_75 : f32 to vector<8x128xf32>
    %201 = arith.subf %200, %199 : vector<8x128xf32>
    %cst_76 = arith.constant 9.99999968E-21 : f32
    %202 = vector.broadcast %cst_76 : f32 to vector<8x128xf32>
    %203 = arith.addf %201, %202 : vector<8x128xf32>
    %204 = math.log %203 : vector<8x128xf32>
    %cst_77 = arith.constant 0.000000e+00 : f32
    %205 = vector.broadcast %cst_77 : f32 to vector<8x128xf32>
    %206 = arith.subf %205, %204 : vector<8x128xf32>
    %207 = arith.addf %195, %206 : vector<8x128xf32>
    %208 = vector.broadcast %0 : f32 to vector<8x128xf32>
    %209 = arith.mulf %207, %208 : vector<8x128xf32>
    %cst_78 = arith.constant dense<0xFF800000> : vector<8xf32>
    %210 = vector.multi_reduction <maximumf>, %209, %cst_78 [1] : vector<8x128xf32> to vector<8xf32>
    %211 = vector.shape_cast %210 : vector<8xf32> to vector<8x1xf32>
    %212 = vector.broadcast %211 : vector<8x1xf32> to vector<8x128xf32>
    %213 = arith.subf %209, %212 : vector<8x128xf32>
    %214 = math.exp %213 : vector<8x128xf32>
    %cst_79 = arith.constant dense<0.000000e+00> : vector<8xf32>
    %215 = vector.multi_reduction <add>, %214, %cst_79 [1] : vector<8x128xf32> to vector<8xf32>
    %216 = vector.shape_cast %215 : vector<8xf32> to vector<8x1xf32>
    %217 = vector.broadcast %216 : vector<8x1xf32> to vector<8x128xf32>
    %218 = arith.divf %214, %217 : vector<8x128xf32>
    %219 = tpu.iota {dimensions = array<i32: 1>} : vector<8x128xi32>
    %cst_80 = arith.constant dense<0xFF800000> : vector<8xf32>
    %220 = vector.multi_reduction <maximumf>, %218, %cst_80 [1] : vector<8x128xf32> to vector<8xf32>
    %221 = vector.shape_cast %220 : vector<8xf32> to vector<8x1xf32>
    %222 = vector.broadcast %221 : vector<8x1xf32> to vector<8x128xf32>
    %223 = arith.cmpf oeq, %218, %222 : vector<8x128xf32>
    %c128_i32_81 = arith.constant 128 : i32
    %224 = vector.broadcast %c128_i32_81 : i32 to vector<8x128xi32>
    %225 = arith.select %223, %219, %224 : vector<8x128xi1>, vector<8x128xi32>
    %cst_82 = arith.constant dense<2147483647> : vector<8xi32>
    %226 = vector.multi_reduction <minsi>, %225, %cst_82 [1] : vector<8x128xi32> to vector<8xi32>
    %227 = vector.shape_cast %226 : vector<8xi32> to vector<8x1xi32>
    %228 = vector.broadcast %227 : vector<8x1xi32> to vector<8x128xi32>
    %229 = arith.cmpi eq, %219, %228 : vector<8x128xi32>
    %230 = arith.extui %229 : vector<8x128xi1> to vector<8x128xi32>
    %231 = arith.sitofp %230 : vector<8x128xi32> to vector<8x128xf32>
    %c4 = arith.constant 4 : index
    %c0_83 = arith.constant 0 : index
    %c0_84 = arith.constant 0 : index
    %232 = vector.load %arg12[%c4, %c0_83, %c0_84] : memref<5x8x128xf32, #tpu.memory_space<vmem>>, vector<1x8x128xf32>
    %233 = vector.shape_cast %232 : vector<1x8x128xf32> to vector<8x128xf32>
    %234 = vector.shape_cast %231 : vector<8x128xf32> to vector<1x8x128xf32>
    tpu.vector_store %arg12[%c4, %c0_83, %c0_84], %234 {strides = array<i32>} : memref<5x8x128xf32, #tpu.memory_space<vmem>>, vector<1x8x128xf32>,
    return
  }
  func.func @transform_0(%arg0: i32) -> i32 {
    %c0_i32 = arith.constant 0 : i32
    %c0_i32_0 = arith.constant 0 : i32
    return %c0_i32 : i32
  }
  func.func @transform_1(%arg0: i32) -> (i32, i32) {
    %c0_i32 = arith.constant 0 : i32
    %c0_i32_0 = arith.constant 0 : i32
    return %arg0, %c0_i32 : i32, i32
  }
  func.func @transform_2(%arg0: i32) -> (i32, i32) {
    %c0_i32 = arith.constant 0 : i32
    %c0_i32_0 = arith.constant 0 : i32
    return %arg0, %c0_i32 : i32, i32
  }
  func.func @transform_3(%arg0: i32) -> (i32, i32) {
    %c0_i32 = arith.constant 0 : i32
    %c0_i32_0 = arith.constant 0 : i32
    %c0_i32_1 = arith.constant 0 : i32
    return %c0_i32, %c0_i32_0 : i32, i32
  }
  func.func @transform_4(%arg0: i32) -> (i32, i32) {
    %c0_i32 = arith.constant 0 : i32
    %c0_i32_0 = arith.constant 0 : i32
    %c0_i32_1 = arith.constant 0 : i32
    return %c0_i32, %c0_i32_0 : i32, i32
  }
  func.func @transform_5(%arg0: i32) -> (i32, i32) {
    %c0_i32 = arith.constant 0 : i32
    %c0_i32_0 = arith.constant 0 : i32
    %c0_i32_1 = arith.constant 0 : i32
    return %c0_i32, %c0_i32_0 : i32, i32
  }
  func.func @transform_6(%arg0: i32) -> (i32, i32) {
    %c0_i32 = arith.constant 0 : i32
    %c0_i32_0 = arith.constant 0 : i32
    %c0_i32_1 = arith.constant 0 : i32
    return %c0_i32, %c0_i32_0 : i32, i32
  }
  func.func @transform_7(%arg0: i32) -> (i32, i32) {
    %c0_i32 = arith.constant 0 : i32
    %c0_i32_0 = arith.constant 0 : i32
    %c0_i32_1 = arith.constant 0 : i32
    return %c0_i32, %c0_i32_0 : i32, i32
  }
  func.func @transform_8(%arg0: i32) -> (i32, i32) {
    %c0_i32 = arith.constant 0 : i32
    %c0_i32_0 = arith.constant 0 : i32
    %c0_i32_1 = arith.constant 0 : i32
    return %c0_i32, %c0_i32_0 : i32, i32
  }
  func.func @transform_9(%arg0: i32) -> (i32, i32) {
    %c0_i32 = arith.constant 0 : i32
    %c0_i32_0 = arith.constant 0 : i32
    %c0_i32_1 = arith.constant 0 : i32
    return %c0_i32, %c0_i32_0 : i32, i32
  }
  func.func @transform_10(%arg0: i32) -> (i32, i32) {
    %c0_i32 = arith.constant 0 : i32
    %c0_i32_0 = arith.constant 0 : i32
    %c0_i32_1 = arith.constant 0 : i32
    return %c0_i32, %c0_i32_0 : i32, i32
  }
  func.func @transform_11(%arg0: i32) -> (i32, i32, i32) {
    %c0_i32 = arith.constant 0 : i32
    %c0_i32_0 = arith.constant 0 : i32
    %c0_i32_1 = arith.constant 0 : i32
    return %c0_i32, %arg0, %c0_i32_0 : i32, i32, i32
  }
}

</mosaic_0001>

<bundles_post_ra>
// kernel: generator_forward.1
= control target key start
LH: loop header
LB: loop body
LE: loop exit
PB: predicated region body
PF: predicated region fallthrough
CT: control target
= control target key end

     0   :  { %17 = vsyncpa [#allocation4], 0  ;;  %s6590_s0 = inlined_call_operand.<no memory space> [shape: f32[1], index: 0, kind: input, shape index: {}]   ;;  %s6591_s1 = inlined_call_operand.vmem [shape: f32[8,96], index: 1, kind: input, shape index: {}]   ;;  %s6592_s2 = inlined_call_operand.vmem [shape: f32[8,640], index: 2, kind: input, shape index: {}]   ;;  %s6593_s3 = inlined_call_operand.hbm [shape: bf16[96,512], index: 3, kind: input, shape index: {}]   ;;  %s6594_s4 = inlined_call_operand.vmem [shape: f32[1,512], index: 4, kind: input, shape index: {}]   ;;  %s6595_s5 = inlined_call_operand.hbm [shape: bf16[512,512], index: 5, kind: input, shape index: {}]   ;;  %s6596_s6 = inlined_call_operand.vmem [shape: f32[1,512], index: 6, kind: input, shape index: {}]   ;;  %s6597_s7 = inlined_call_operand.hbm [shape: bf16[512,512], index: 7, kind: input, shape index: {}]   ;;  %s6598_s8 = inlined_call_operand.vmem [shape: f32[1,512], index: 8, kind: input, shape index: {}]   ;;  %s6599_s9 = inlined_call_operand.hbm [shape: bf16[512,640], index: 9, kind: input, shape index: {}]   ;;  %s6600_s10 = inlined_call_operand.vmem [shape: f32[1,640], index: 10, kind: input, shape index: {}]   ;;  %s6601_s11 = inlined_call_operand.vmem [shape: f32[5,8,128], index: 11, kind: output, shape index: {}]  }
   0x1   :  { %18 = vsyncpa [#allocation6], 0 }
   0x2   :  { %19 = vsyncpa [#allocation9], 0  ;;  %s45_s19 = sshll.u32 %s6595_s5, 4  ;;  %s6273_s20 = smov [#allocation5]   ;;  %s46_s19 = int_to_ptr.hbm [resolvable:$true] %s45_s19 }
   0x3   :  { %s47_s21 = sshll.u32 %s6273_s20, 4  ;;  %s30_s24 = sshll.u32 %s6593_s3, 4  ;;  %s48_s21 = int_to_ptr.vmem [resolvable:$true] %s47_s21  ;;  %s31_s24 = int_to_ptr.hbm [resolvable:$true] %s30_s24 }
   0x4   :  { %s6274_s25 = smov 256   ;;  %s6275_s26 = smov 16  }
   0x5   :  { %53 = dma.hbm_to_vmem [thread:$0]  %s46_s19, 16384, %s48_s21, [#allocation6], %s6274_s25, %s6274_s25, %s6275_s26  }
   0x6   :  { %s6276_s27 = smov [#allocation3]   ;;  %s60_s12 = sshll.u32 %s6597_s7, 4  ;;  %s61_s12 = int_to_ptr.hbm [resolvable:$true] %s60_s12 }
   0x7   :  { %s32_s28 = sshll.u32 %s6276_s27, 4  ;;  %s75_s14 = sshll.u32 %s6599_s9, 4  ;;  %s33_s28 = int_to_ptr.vmem [resolvable:$true] %s32_s28  ;;  %s76_s14 = int_to_ptr.hbm [resolvable:$true] %s75_s14 }
   0x8   :  { %38 = dma.hbm_to_vmem [thread:$0]  %s31_s24, 3072, %s33_s28, [#allocation4], %s6274_s25, %s6274_s25, %s6275_s26  }
   0x9   :  { %s6277_s15 = smov [#allocation7]   ;;  %s6278_s3 = smov [#allocation8]  }
   0xa   :  { %s62_s16 = sshll.u32 %s6277_s15, 4  ;;  %s77_s17 = sshll.u32 %s6278_s3, 4  ;;  %s63_s16 = int_to_ptr.vmem [resolvable:$true] %s62_s16  ;;  %s78_s17 = int_to_ptr.vmem [resolvable:$true] %s77_s17 }
   0xb   :  { %68 = dma.hbm_to_vmem [thread:$0]  %s61_s12, 16384, %s63_s16, [#allocation6], %s6274_s25, %s6274_s25, %s6275_s26  }
   0xc   :  { %s6279_s18 = smov 320   ;;  %s6280_s19 = smov 20  }
   0xd   :  { %83 = dma.hbm_to_vmem [thread:$0]  %s76_s14, 20480, %s78_s17, [#allocation9], %s6279_s18, %s6279_s18, %s6280_s19  }
   0xe   :  { %6267 = dma.done.wait [#allocation4], 3072  }
   0xf   :  { %6268 = vsyncadd [#allocation4], 4294964224 }
  0x10   :  { %6269 = dma.done.wait [#allocation6], 32768  }
  0x11   :  { %6270 = vsyncadd [#allocation6], 4294934528 }
  0x12   :  { %6271 = dma.done.wait [#allocation9], 20480  }
  0x13   :  { %6272 = vsyncadd [#allocation9], 4294946816  ;;  %v3991_v0 = vld [vmem:[#allocation3 + $0xa0] sm:$0xf]  ;;  %v5704_v1 = vld [vmem:[#allocation3 + $0xac] sm:$0xf0] }
  0x14   :  { %v5702_v2 = vld [vmem:[#allocation3 + $0xa4] sm:$0xf]  ;;  %v3992_v3 = vor.u32 %v5704_v1, %v3991_v0  ;;  %v3993_v4 = vld [vmem:[#allocation3 + $0xb0] sm:$0xf0]  ;;  %v3999_v5 = vld [vmem:[#allocation3 + $0xa8] sm:$0xf] }
  0x15   :  { %v5705_v6 = vld [vmem:[#allocation3 + $0xb4] sm:$0xf0]  ;;  %v3996_v7 = vor.u32 %v5702_v2, %v3993_v4  ;;  %v5703_v9 = vld [vmem:[#allocation3 + $0xac] sm:$0xf]  ;;  %v4001_v10 = vld [vmem:[#allocation3 + $0xb8] sm:$0xf0] }
  0x16   :  { %v4000_v8 = vor.u32 %v5705_v6, %v3999_v5  ;;  %v3975_v11 = vld [vmem:[#allocation3 + $0x80] sm:$0xf]  ;;  %266 = vmatpush.bf16.msra.mxu0 %v3992_v3  ;;  %v4004_v12 = vor.u32 %v5703_v9, %v4001_v10  ;;  %v5700_v13 = vld [vmem:[#allocation3 + $0x8c] sm:$0xf0]  ;;  %v5698_v14 = vld [vmem:[#allocation3 + $0x84] sm:$0xf] }
  0x17   :  { %v3977_v15 = vld [vmem:[#allocation3 + $0x90] sm:$0xf0]  ;;  %279 = vmatpush.bf16.msra.mxu1 %v3996_v7  ;;  %v3976_v16 = vor.u32 %v5700_v13, %v3975_v11  ;;  %v3983_v18 = vld [vmem:[#allocation3 + $0x88] sm:$0xf]  ;;  %v5701_v19 = vld [vmem:[#allocation3 + $0x94] sm:$0xf0] }
  0x18   :  { %292 = vmatpush.bf16.msra.mxu2 %v4000_v8  ;;  %v3980_v17 = vor.u32 %v5698_v14, %v3977_v15  ;;  %v5699_v20 = vld [vmem:[#allocation3 + $0x8c] sm:$0xf]  ;;  %305 = vmatpush.bf16.msra.mxu3 %v4004_v12  ;;  %v3984_v21 = vor.u32 %v5701_v19, %v3983_v18  ;;  %v3985_v22 = vld [vmem:[#allocation3 + $0x98] sm:$0xf0]  ;;  %v3959_v23 = vld [vmem:[#allocation3 + $0x60] sm:$0xf] }
  0x19   :  { %v5696_v24 = vld [vmem:[#allocation3 + $0x6c] sm:$0xf0]  ;;  %v3988_v25 = vor.u32 %v5699_v20, %v3985_v22  ;;  %v5694_v26 = vld [vmem:[#allocation3 + $0x64] sm:$0xf]  ;;  %v3961_v27 = vld [vmem:[#allocation3 + $0x70] sm:$0xf0] }
  0x1a   :  { %v3967_v28 = vld [vmem:[#allocation3 + $0x68] sm:$0xf]  ;;  %267 = vmatpush.bf16.msra.mxu0 %v3976_v16  ;;  %v3960_v29 = vor.u32 %v5696_v24, %v3959_v23  ;;  %v5697_v30 = vld [vmem:[#allocation3 + $0x74] sm:$0xf0]  ;;  %v5695_v31 = vld [vmem:[#allocation3 + $0x6c] sm:$0xf]  ;;  %v3964_v33 = vor.u32 %v5694_v26, %v3961_v27 }
  0x1b   :  { %v3969_v32 = vld [vmem:[#allocation3 + $0x78] sm:$0xf0]  ;;  %280 = vmatpush.bf16.msra.mxu1 %v3980_v17  ;;  %v3968_v34 = vor.u32 %v5697_v30, %v3967_v28  ;;  %v3943_v35 = vld [vmem:[#allocation3 + $0x40] sm:$0xf]  ;;  %v5692_v36 = vld [vmem:[#allocation3 + $0x4c] sm:$0xf0] }
  0x1c   :  { %293 = vmatpush.bf16.msra.mxu2 %v3984_v21  ;;  %v5690_v37 = vld [vmem:[#allocation3 + $0x44] sm:$0xf]  ;;  %306 = vmatpush.bf16.msra.mxu3 %v3988_v25  ;;  %v3972_v38 = vor.u32 %v5695_v31, %v3969_v32  ;;  %v3945_v39 = vld [vmem:[#allocation3 + $0x50] sm:$0xf0]  ;;  %v3951_v40 = vld [vmem:[#allocation3 + $0x48] sm:$0xf]  ;;  %v3944_v44 = vor.u32 %v5692_v36, %v3943_v35 }
  0x1d   :  { %v5693_v41 = vld [vmem:[#allocation3 + $0x54] sm:$0xf0]  ;;  %v5691_v42 = vld [vmem:[#allocation3 + $0x4c] sm:$0xf]  ;;  %v3953_v43 = vld [vmem:[#allocation3 + $0x58] sm:$0xf0]  ;;  %v3948_v45 = vor.u32 %v5690_v37, %v3945_v39 }
  0x1e   :  { %268 = vmatpush.bf16.msra.mxu0 %v3960_v29  ;;  %v3952_v46 = vor.u32 %v5693_v41, %v3951_v40  ;;  %v3927_v47 = vld [vmem:[#allocation3 + $0x20] sm:$0xf]  ;;  %v5688_v48 = vld [vmem:[#allocation3 + $0x2c] sm:$0xf0]  ;;  %v5686_v49 = vld [vmem:[#allocation3 + $0x24] sm:$0xf]  ;;  %v3956_v50 = vor.u32 %v5691_v42, %v3953_v43 }
  0x1f   :  { %281 = vmatpush.bf16.msra.mxu1 %v3964_v33  ;;  %v3929_v51 = vld [vmem:[#allocation3 + $0x30] sm:$0xf0]  ;;  %v3935_v52 = vld [vmem:[#allocation3 + $0x28] sm:$0xf]  ;;  %v5689_v53 = vld [vmem:[#allocation3 + $0x34] sm:$0xf0]  ;;  %v3928_v56 = vor.u32 %v5688_v48, %v3927_v47 }
  0x20   :  { %294 = vmatpush.bf16.msra.mxu2 %v3968_v34  ;;  %307 = vmatpush.bf16.msra.mxu3 %v3972_v38  ;;  %v5687_v54 = vld [vmem:[#allocation3 + $0x2c] sm:$0xf]  ;;  %v3937_v55 = vld [vmem:[#allocation3 + $0x38] sm:$0xf0]  ;;  %v3911_v57 = vld [vmem:[#allocation3] sm:$0xf]  ;;  %v3932_v58 = vor.u32 %v5686_v49, %v3929_v51  ;;  %v3936_v59 = vor.u32 %v5689_v53, %v3935_v52 }
  0x21   :  { %v5684_v60 = vld [vmem:[#allocation3 + $0xc] sm:$0xf0]  ;;  %v5682_v61 = vld [vmem:[#allocation3 + $0x4] sm:$0xf]  ;;  %v3913_v62 = vld [vmem:[#allocation3 + $0x10] sm:$0xf0]  ;;  %v3940_v63 = vor.u32 %v5687_v54, %v3937_v55 }
  0x22   :  { %269 = vmatpush.bf16.msra.mxu0 %v3944_v44  ;;  %v3919_v0 = vld [vmem:[#allocation3 + $0x8] sm:$0xf]  ;;  %v5685_v1 = vld [vmem:[#allocation3 + $0x14] sm:$0xf0]  ;;  %v5683_v2 = vld [vmem:[#allocation3 + $0xc] sm:$0xf]  ;;  %v3912_v6 = vor.u32 %v5684_v60, %v3911_v57  ;;  %v3916_v10 = vor.u32 %v5682_v61, %v3913_v62 }
  0x23   :  { %282 = vmatpush.bf16.msra.mxu1 %v3948_v45  ;;  %v3921_v3 = vld [vmem:[#allocation3 + $0x18] sm:$0xf0]  ;;  %v4123_v4 = vld [vmem:[#allocation5 + $0xe0] sm:$0xf]  ;;  %v5736_v5 = vld [vmem:[#allocation5 + $0xec] sm:$0xf0]  ;;  %v3920_v11 = vor.u32 %v5685_v1, %v3919_v0 }
  0x24   :  { %295 = vmatpush.bf16.msra.mxu2 %v3952_v46  ;;  %308 = vmatpush.bf16.msra.mxu3 %v3956_v50  ;;  %v104_v7 = vld [vmem:[%s6591_s1] sm:$0xff]  ;;  %v5768_v9 = vld [vmem:[#allocation5 + $0x1ec] sm:$0xf0]  ;;  %v3924_v12 = vor.u32 %v5683_v2, %v3921_v3  ;;  %v4124_v13 = vor.u32 %v5736_v5, %v4123_v4  ;;  %vm260_vm0 = vcmask 785408  }
  0x25   :  { %v4251_v8 = vld [vmem:[#allocation5 + $0x1e0] sm:$0xf]  ;;  %v5800_v16 = vld [vmem:[#allocation5 + $0x2ec] sm:$0xf0]  ;;  %v105_v17 = vpack.c.bf16 %v104_v7, %v104_v7 }
  0x26   :  { %270 = vmatpush.bf16.msra.mxu0 %v3928_v56  ;;  %v4107_v14 = vld [vmem:[#allocation5 + $0xc0] sm:$0xf]  ;;  %v4252_v18 = vor.u32 %v5768_v9, %v4251_v8  ;;  %v5732_v19 = vld [vmem:[#allocation5 + $0xcc] sm:$0xf0] }
  0x27   :  { %283 = vmatpush.bf16.msra.mxu1 %v3932_v58  ;;  %v4379_v15 = vld [vmem:[#allocation5 + $0x2e0] sm:$0xf]  ;;  %v5832_v21 = vld [vmem:[#allocation5 + $0x3ec] sm:$0xf0]  ;;  %v4108_v25 = vor.u32 %v5732_v19, %v4107_v14 }
  0x28   :  { %296 = vmatpush.bf16.msra.mxu2 %v3936_v59  ;;  %309 = vmatpush.bf16.msra.mxu3 %v3940_v63  ;;  %v4507_v20 = vld [vmem:[#allocation5 + $0x3e0] sm:$0xf]  ;;  %v5764_v23 = vld [vmem:[#allocation5 + $0x1cc] sm:$0xf0]  ;;  %v4380_v24 = vor.u32 %v5800_v16, %v4379_v15 }
  0x29   :  { %v4235_v22 = vld [vmem:[#allocation5 + $0x1c0] sm:$0xf]  ;;  %v4508_v26 = vor.u32 %v5832_v21, %v4507_v20  ;;  %v5796_v29 = vld [vmem:[#allocation5 + $0x2cc] sm:$0xf0] }
  0x2a   :  { %271 = vmatpush.bf16.msra.mxu0 %v3912_v6  ;;  %v4091_v27 = vld [vmem:[#allocation5 + $0xa0] sm:$0xf]  ;;  %v4236_v30 = vor.u32 %v5764_v23, %v4235_v22  ;;  %v5728_v31 = vld [vmem:[#allocation5 + $0xac] sm:$0xf0] }
  0x2b   :  { %284 = vmatpush.bf16.msra.mxu1 %v3916_v10  ;;  %v4363_v28 = vld [vmem:[#allocation5 + $0x2c0] sm:$0xf]  ;;  %v5828_v33 = vld [vmem:[#allocation5 + $0x3cc] sm:$0xf0]  ;;  %v4092_v37 = vor.u32 %v5728_v31, %v4091_v27 }
  0x2c   :  { %297 = vmatpush.bf16.msra.mxu2 %v3920_v11  ;;  %310 = vmatpush.bf16.msra.mxu3 %v3924_v12  ;;  %v4491_v32 = vld [vmem:[#allocation5 + $0x3c0] sm:$0xf]  ;;  %v5760_v35 = vld [vmem:[#allocation5 + $0x1ac] sm:$0xf0]  ;;  %v4364_v36 = vor.u32 %v5796_v29, %v4363_v28 }
  0x2d   :  { %4005 = vmatmul.msk.bf16.vlgmr.msra.gmra.mxu0 %vm260_vm0, %v105_v17  ;;  %v4219_v34 = vld [vmem:[#allocation5 + $0x1a0] sm:$0xf]  ;;  %v4492_v38 = vor.u32 %v5828_v33, %v4491_v32  ;;  %v5792_v41 = vld [vmem:[#allocation5 + $0x2ac] sm:$0xf0]  ;;  %v5734_v32 = vld [vmem:[#allocation5 + $0xe4] sm:$0xf] }
  0x2e   :  { %1106 = vmatpush.bf16.msrb.mxu0 %v4124_v13  ;;  %4006 = vmatmul.msk.bf16.vlgmr.msra.gmra.mxu1 %vm260_vm0, %v105_v17  ;;  %v4075_v39 = vld [vmem:[#allocation5 + $0x80] sm:$0xf]  ;;  %v4220_v42 = vor.u32 %v5760_v35, %v4219_v34  ;;  %v5724_v43 = vld [vmem:[#allocation5 + $0x8c] sm:$0xf0]  ;;  %v4125_v33 = vld [vmem:[#allocation5 + $0xf0] sm:$0xf0] }
  0x2f   :  { %1119 = vmatpush.bf16.msrb.mxu1 %v4252_v18  ;;  %4007 = vmatmul.msk.bf16.vlgmr.msra.gmra.mxu2 %vm260_vm0, %v105_v17  ;;  %v4347_v40 = vld [vmem:[#allocation5 + $0x2a0] sm:$0xf]  ;;  %v5824_v45 = vld [vmem:[#allocation5 + $0x3ac] sm:$0xf0]  ;;  %v4076_v49 = vor.u32 %v5724_v43, %v4075_v39  ;;  %v5766_v34 = vld [vmem:[#allocation5 + $0x1e4] sm:$0xf] }
  0x30   :  { %4008 = vmatmul.msk.bf16.vlgmr.msra.gmra.mxu3 %vm260_vm0, %v105_v17  ;;  %1132 = vmatpush.bf16.msrb.mxu2 %v4380_v24  ;;  %v4475_v44 = vld [vmem:[#allocation5 + $0x3a0] sm:$0xf]  ;;  %v5756_v47 = vld [vmem:[#allocation5 + $0x18c] sm:$0xf0]  ;;  %v4348_v48 = vor.u32 %v5792_v41, %v4347_v40  ;;  %v4253_v35 = vld [vmem:[#allocation5 + $0x1f0] sm:$0xf0] }
  0x31   :  { %1145 = vmatpush.bf16.msrb.mxu3 %v4508_v26  ;;  %v4203_v46 = vld [vmem:[#allocation5 + $0x180] sm:$0xf]  ;;  %v4476_v50 = vor.u32 %v5824_v45, %v4475_v44  ;;  %v5788_v53 = vld [vmem:[#allocation5 + $0x28c] sm:$0xf0]  ;;  %v5730_v39 = vld [vmem:[#allocation5 + $0xc4] sm:$0xf]  ;;  %v4128_v44 = vor.u32 %v5734_v32, %v4125_v33 }
  0x32   :  { %1107 = vmatpush.bf16.msrb.mxu0 %v4108_v25  ;;  %v4059_v51 = vld [vmem:[#allocation5 + $0x60] sm:$0xf]  ;;  %v4204_v54 = vor.u32 %v5756_v47, %v4203_v46  ;;  %v5720_v55 = vld [vmem:[#allocation5 + $0x6c] sm:$0xf0]  ;;  %v5798_v46 = vld [vmem:[#allocation5 + $0x2e4] sm:$0xf] }
  0x33   :  { %1120 = vmatpush.bf16.msrb.mxu1 %v4236_v30  ;;  %v4331_v52 = vld [vmem:[#allocation5 + $0x280] sm:$0xf]  ;;  %v5820_v57 = vld [vmem:[#allocation5 + $0x38c] sm:$0xf0]  ;;  %v4060_v61 = vor.u32 %v5720_v55, %v4059_v51  ;;  %v4381_v47 = vld [vmem:[#allocation5 + $0x2f0] sm:$0xf0] }
  0x34   :  { %1133 = vmatpush.bf16.msrb.mxu2 %v4364_v36  ;;  %v4459_v56 = vld [vmem:[#allocation5 + $0x380] sm:$0xf]  ;;  %v5752_v59 = vld [vmem:[#allocation5 + $0x16c] sm:$0xf0]  ;;  %v4332_v60 = vor.u32 %v5788_v53, %v4331_v52  ;;  %v4509_v51 = vld [vmem:[#allocation5 + $0x3f0] sm:$0xf0] }
  0x35   :  { %1146 = vmatpush.bf16.msrb.mxu3 %v4492_v38  ;;  %v4187_v58 = vld [vmem:[#allocation5 + $0x160] sm:$0xf]  ;;  %v4460_v62 = vor.u32 %v5820_v57, %v4459_v56  ;;  %v5784_v1 = vld [vmem:[#allocation5 + $0x26c] sm:$0xf0]  ;;  %v5762_v52 = vld [vmem:[#allocation5 + $0x1c4] sm:$0xf]  ;;  %v4384_v56 = vor.u32 %v5798_v46, %v4381_v47 }
  0x36   :  { %1108 = vmatpush.bf16.msrb.mxu0 %v4092_v37  ;;  %v4043_v63 = vld [vmem:[#allocation5 + $0x40] sm:$0xf]  ;;  %v4188_v2 = vor.u32 %v5752_v59, %v4187_v58  ;;  %v5716_v3 = vld [vmem:[#allocation5 + $0x4c] sm:$0xf0]  ;;  %v4237_v53 = vld [vmem:[#allocation5 + $0x1d0] sm:$0xf0] }
  0x37   :  { %1121 = vmatpush.bf16.msrb.mxu1 %v4220_v42  ;;  %v4315_v0 = vld [vmem:[#allocation5 + $0x260] sm:$0xf]  ;;  %v5816_v5 = vld [vmem:[#allocation5 + $0x36c] sm:$0xf0]  ;;  %v4044_v9 = vor.u32 %v5716_v3, %v4043_v63  ;;  %v5726_v59 = vld [vmem:[#allocation5 + $0xa4] sm:$0xf] }
  0x38   :  { %1134 = vmatpush.bf16.msrb.mxu2 %v4348_v48  ;;  %v4443_v4 = vld [vmem:[#allocation5 + $0x360] sm:$0xf]  ;;  %v5748_v7 = vld [vmem:[#allocation5 + $0x14c] sm:$0xf0]  ;;  %v4316_v8 = vor.u32 %v5784_v1, %v4315_v0  ;;  %v4256_v48 = vor.u32 %v5766_v34, %v4253_v35  ;;  %v4093_v63 = vld [vmem:[#allocation5 + $0xb0] sm:$0xf0] }
  0x39   :  { %1147 = vmatpush.bf16.msrb.mxu3 %v4476_v50  ;;  %v4171_v6 = vld [vmem:[#allocation5 + $0x140] sm:$0xf]  ;;  %v4444_v10 = vor.u32 %v5816_v5, %v4443_v4  ;;  %v5780_v13 = vld [vmem:[#allocation5 + $0x24c] sm:$0xf0]  ;;  %v5830_v50 = vld [vmem:[#allocation5 + $0x3e4] sm:$0xf]  ;;  %v4096_v5 = vor.u32 %v5726_v59, %v4093_v63 }
  0x3a   :  { %1109 = vmatpush.bf16.msrb.mxu0 %v4076_v49  ;;  %v4027_v11 = vld [vmem:[#allocation5 + $0x20] sm:$0xf]  ;;  %v4172_v14 = vor.u32 %v5748_v7, %v4171_v6  ;;  %v5712_v15 = vld [vmem:[#allocation5 + $0x2c] sm:$0xf0]  ;;  %v4109_v49 = vld [vmem:[#allocation5 + $0xd0] sm:$0xf0]  ;;  %v4512_v58 = vor.u32 %v5830_v50, %v4509_v51 }
  0x3b   :  { %1122 = vmatpush.bf16.msrb.mxu1 %v4204_v54  ;;  %v4299_v12 = vld [vmem:[#allocation5 + $0x240] sm:$0xf]  ;;  %v5812_v17 = vld [vmem:[#allocation5 + $0x34c] sm:$0xf0]  ;;  %v4028_v22 = vor.u32 %v5712_v15, %v4027_v11  ;;  %v4112_v57 = vor.u32 %v5730_v39, %v4109_v49  ;;  %v5826_v0 = vld [vmem:[#allocation5 + $0x3c4] sm:$0xf] }
  0x3c   :  { %1135 = vmatpush.bf16.msrb.mxu2 %v4332_v60  ;;  %v4427_v16 = vld [vmem:[#allocation5 + $0x340] sm:$0xf]  ;;  %v5744_v19 = vld [vmem:[#allocation5 + $0x12c] sm:$0xf0]  ;;  %v4300_v20 = vor.u32 %v5780_v13, %v4299_v12  ;;  %v5794_v60 = vld [vmem:[#allocation5 + $0x2c4] sm:$0xf] }
  0x3d   :  { %1148 = vmatpush.bf16.msrb.mxu3 %v4460_v62  ;;  %v4155_v18 = vld [vmem:[#allocation5 + $0x120] sm:$0xf]  ;;  %v4428_v23 = vor.u32 %v5812_v17, %v4427_v16  ;;  %v5708_v24 = vld [vmem:[#allocation5 + $0xc] sm:$0xf0]  ;;  %v4240_v62 = vor.u32 %v5762_v52, %v4237_v53  ;;  %v4493_v1 = vld [vmem:[#allocation5 + $0x3d0] sm:$0xf0] }
  0x3e   :  { %1110 = vmatpush.bf16.msrb.mxu0 %v4060_v61  ;;  %v4011_v21 = vld [vmem:[#allocation5] sm:$0xf]  ;;  %v5776_v26 = vld [vmem:[#allocation5 + $0x22c] sm:$0xf0]  ;;  %v4156_v27 = vor.u32 %v5744_v19, %v4155_v18  ;;  %v4365_v61 = vld [vmem:[#allocation5 + $0x2d0] sm:$0xf0]  ;;  %v4496_v6 = vor.u32 %v5826_v0, %v4493_v1 }
  0x3f   :  { %1123 = vmatpush.bf16.msrb.mxu1 %v4188_v2  ;;  %v4283_v25 = vld [vmem:[#allocation5 + $0x220] sm:$0xf]  ;;  %v5808_v30 = vld [vmem:[#allocation5 + $0x32c] sm:$0xf0]  ;;  %v4012_v37 = vor.u32 %v5708_v24, %v4011_v21  ;;  %v5758_v2 = vld [vmem:[#allocation5 + $0x1a4] sm:$0xf]  ;;  %v4368_v4 = vor.u32 %v5794_v60, %v4365_v61 }
  0x40   :  { %1136 = vmatpush.bf16.msrb.mxu2 %v4316_v8  ;;  %v4139_v28 = vld [vmem:[#allocation5 + $0x100] sm:$0xf]  ;;  %v5740_v31 = vld [vmem:[#allocation5 + $0x10c] sm:$0xf0]  ;;  %v4284_v36 = vor.u32 %v5776_v26, %v4283_v25  ;;  %v4221_v3 = vld [vmem:[#allocation5 + $0x1b0] sm:$0xf0] }
  0x41   :  { %1149 = vmatpush.bf16.msrb.mxu3 %v4444_v10  ;;  %v4411_v29 = vld [vmem:[#allocation5 + $0x320] sm:$0xf]  ;;  %v5772_v41 = vld [vmem:[#allocation5 + $0x20c] sm:$0xf0]  ;;  %v4140_v43 = vor.u32 %v5740_v31, %v4139_v28  ;;  %v5722_v7 = vld [vmem:[#allocation5 + $0x84] sm:$0xf]  ;;  %v4224_v10 = vor.u32 %v5758_v2, %v4221_v3 }
  0x42   :  { %1111 = vmatpush.bf16.msrb.mxu0 %v4044_v9  ;;  %v4412_v38 = vor.u32 %v5808_v30, %v4411_v29  ;;  %v4267_v40 = vld [vmem:[#allocation5 + $0x200] sm:$0xf]  ;;  %v5804_v45 = vld [vmem:[#allocation5 + $0x30c] sm:$0xf0]  ;;  %v5790_v8 = vld [vmem:[#allocation5 + $0x2a4] sm:$0xf] }
  0x43   :  { %1124 = vmatpush.bf16.msrb.mxu1 %v4172_v14  ;;  %v4395_v42 = vld [vmem:[#allocation5 + $0x300] sm:$0xf]  ;;  %v4268_v54 = vor.u32 %v5772_v41, %v4267_v40  ;;  %v4349_v9 = vld [vmem:[#allocation5 + $0x2b0] sm:$0xf0]  ;;  %v5822_v12 = vld [vmem:[#allocation5 + $0x3a4] sm:$0xf] }
  0x44   :  { %1137 = vmatpush.bf16.msrb.mxu2 %v4300_v20  ;;  %v4396_v55 = vor.u32 %v5804_v45, %v4395_v42  ;;  %v4077_v11 = vld [vmem:[#allocation5 + $0x90] sm:$0xf0]  ;;  %v5754_v14 = vld [vmem:[#allocation5 + $0x184] sm:$0xf]  ;;  %v4352_v16 = vor.u32 %v5790_v8, %v4349_v9 }
  0x45   :  { %1150 = vmatpush.bf16.msrb.mxu3 %v4428_v23  ;;  %v4477_v13 = vld [vmem:[#allocation5 + $0x3b0] sm:$0xf0]  ;;  %v4080_v17 = vor.u32 %v5722_v7, %v4077_v11  ;;  %v5718_v19 = vld [vmem:[#allocation5 + $0x64] sm:$0xf] }
  0x46   :  { %1112 = vmatpush.bf16.msrb.mxu0 %v4028_v22  ;;  %v4205_v15 = vld [vmem:[#allocation5 + $0x190] sm:$0xf0]  ;;  %v4480_v18 = vor.u32 %v5822_v12, %v4477_v13  ;;  %v5786_v20 = vld [vmem:[#allocation5 + $0x284] sm:$0xf] }
  0x47   :  { %1125 = vmatpush.bf16.msrb.mxu1 %v4156_v27  ;;  %v4333_v21 = vld [vmem:[#allocation5 + $0x290] sm:$0xf0]  ;;  %v4208_v22 = vor.u32 %v5754_v14, %v4205_v15  ;;  %v5818_v24 = vld [vmem:[#allocation5 + $0x384] sm:$0xf] }
  0x48   :  { %1138 = vmatpush.bf16.msrb.mxu2 %v4284_v36  ;;  %v4061_v23 = vld [vmem:[#allocation5 + $0x70] sm:$0xf0]  ;;  %v5750_v26 = vld [vmem:[#allocation5 + $0x164] sm:$0xf]  ;;  %v4336_v28 = vor.u32 %v5786_v20, %v4333_v21  ;;  %v5737_v20 = vld [vmem:[#allocation5 + $0xf4] sm:$0xf0] }
  0x49   :  { %1151 = vmatpush.bf16.msrb.mxu3 %v4412_v38  ;;  %v4461_v25 = vld [vmem:[#allocation5 + $0x390] sm:$0xf0]  ;;  %v4064_v29 = vor.u32 %v5718_v19, %v4061_v23  ;;  %v5714_v32 = vld [vmem:[#allocation5 + $0x44] sm:$0xf]  ;;  %v4131_v19 = vld [vmem:[#allocation5 + $0xe8] sm:$0xf] }
  0x4a   :  { %1113 = vmatpush.bf16.msrb.mxu0 %v4012_v37  ;;  %v4189_v27 = vld [vmem:[#allocation5 + $0x170] sm:$0xf0]  ;;  %v4464_v30 = vor.u32 %v5818_v24, %v4461_v25  ;;  %v5746_v34 = vld [vmem:[#allocation5 + $0x144] sm:$0xf]  ;;  %v5769_v23 = vld [vmem:[#allocation5 + $0x1f4] sm:$0xf0] }
  0x4b   :  { %1126 = vmatpush.bf16.msrb.mxu1 %v4140_v43  ;;  %v4192_v31 = vor.u32 %v5750_v26, %v4189_v27  ;;  %v4045_v33 = vld [vmem:[#allocation5 + $0x50] sm:$0xf0]  ;;  %v5782_v38 = vld [vmem:[#allocation5 + $0x264] sm:$0xf]  ;;  %v4132_v27 = vor.u32 %v5737_v20, %v4131_v19 }
  0x4c   :  { %1139 = vmatpush.bf16.msrb.mxu2 %v4268_v54  ;;  %v4048_v35 = vor.u32 %v5714_v32, %v4045_v33  ;;  %v4173_v36 = vld [vmem:[#allocation5 + $0x150] sm:$0xf0]  ;;  %v5814_v41 = vld [vmem:[#allocation5 + $0x364] sm:$0xf]  ;;  %v5733_v32 = vld [vmem:[#allocation5 + $0xd4] sm:$0xf0] }
  0x4d   :  { %1152 = vmatpush.bf16.msrb.mxu3 %v4396_v55  ;;  %v4176_v37 = vor.u32 %v5746_v34, %v4173_v36  ;;  %v4317_v39 = vld [vmem:[#allocation5 + $0x270] sm:$0xf0]  ;;  %v5742_v46 = vld [vmem:[#allocation5 + $0x124] sm:$0xf] }
  0x4e   :  { %1158 = vmatpush.bf16.msra.mxu0 %v4128_v44  ;;  %v4320_v40 = vor.u32 %v5782_v38, %v4317_v39  ;;  %v4445_v42 = vld [vmem:[#allocation5 + $0x370] sm:$0xf0]  ;;  %v5710_v44 = vld [vmem:[#allocation5 + $0x24] sm:$0xf]  ;;  %v5765_v38 = vld [vmem:[#allocation5 + $0x1d4] sm:$0xf0] }
  0x4f   :  { %1171 = vmatpush.bf16.msra.mxu1 %v4256_v48  ;;  %v4448_v43 = vor.u32 %v5814_v41, %v4445_v42  ;;  %v4029_v45 = vld [vmem:[#allocation5 + $0x30] sm:$0xf0]  ;;  %v5778_v50 = vld [vmem:[#allocation5 + $0x244] sm:$0xf]  ;;  %v4387_v41 = vld [vmem:[#allocation5 + $0x2e8] sm:$0xf] }
  0x50   :  { %1184 = vmatpush.bf16.msra.mxu2 %v4384_v56  ;;  %v4032_v47 = vor.u32 %v5710_v44, %v4029_v45  ;;  %v4157_v48 = vld [vmem:[#allocation5 + $0x130] sm:$0xf0]  ;;  %v5810_v52 = vld [vmem:[#allocation5 + $0x344] sm:$0xf]  ;;  %v5801_v42 = vld [vmem:[#allocation5 + $0x2f4] sm:$0xf0] }
  0x51   :  { %1197 = vmatpush.bf16.msra.mxu3 %v4512_v58  ;;  %v4160_v49 = vor.u32 %v5742_v46, %v4157_v48  ;;  %v4301_v51 = vld [vmem:[#allocation5 + $0x250] sm:$0xf0]  ;;  %v5706_v56 = vld [vmem:[#allocation5 + $0x4] sm:$0xf]  ;;  %v4515_v45 = vld [vmem:[#allocation5 + $0x3e8] sm:$0xf] }
  0x52   :  { %1159 = vmatpush.bf16.msra.mxu0 %v4112_v57  ;;  %v4304_v53 = vor.u32 %v5778_v50, %v4301_v51  ;;  %v4429_v54 = vld [vmem:[#allocation5 + $0x350] sm:$0xf0]  ;;  %v5738_v59 = vld [vmem:[#allocation5 + $0x104] sm:$0xf]  ;;  %v5833_v46 = vld [vmem:[#allocation5 + $0x3f4] sm:$0xf0] }
  0x53   :  { %1172 = vmatpush.bf16.msra.mxu1 %v4240_v62  ;;  %v4432_v55 = vor.u32 %v5810_v52, %v4429_v54  ;;  %v4013_v57 = vld [vmem:[#allocation5 + $0x10] sm:$0xf0]  ;;  %v5774_v62 = vld [vmem:[#allocation5 + $0x224] sm:$0xf]  ;;  %v5729_v50 = vld [vmem:[#allocation5 + $0xb4] sm:$0xf0] }
  0x54   :  { %1185 = vmatpush.bf16.msra.mxu2 %v4368_v4  ;;  %v4016_v58 = vor.u32 %v5706_v56, %v4013_v57  ;;  %v4141_v60 = vld [vmem:[#allocation5 + $0x110] sm:$0xf0]  ;;  %v5806_v0 = vld [vmem:[#allocation5 + $0x324] sm:$0xf]  ;;  %v4227_v52 = vld [vmem:[#allocation5 + $0x1a8] sm:$0xf]  ;;  %v4516_v57 = vor.u32 %v5833_v46, %v4515_v45 }
  0x55   :  { %1198 = vmatpush.bf16.msra.mxu3 %v4496_v6  ;;  %v4144_v61 = vor.u32 %v5738_v59, %v4141_v60  ;;  %v4285_v63 = vld [vmem:[#allocation5 + $0x230] sm:$0xf0]  ;;  %v5770_v4 = vld [vmem:[#allocation5 + $0x204] sm:$0xf]  ;;  %v4371_v59 = vld [vmem:[#allocation5 + $0x2c8] sm:$0xf] }
  0x56   :  { %1160 = vmatpush.bf16.msra.mxu0 %v4096_v5  ;;  %v4288_v1 = vor.u32 %v5774_v62, %v4285_v63  ;;  %v4413_v2 = vld [vmem:[#allocation5 + $0x330] sm:$0xf0]  ;;  %v5802_v7 = vld [vmem:[#allocation5 + $0x304] sm:$0xf]  ;;  %v5797_v60 = vld [vmem:[#allocation5 + $0x2d4] sm:$0xf0] }
  0x57   :  { %1173 = vmatpush.bf16.msra.mxu1 %v4224_v10  ;;  %v4416_v3 = vor.u32 %v5806_v0, %v4413_v2  ;;  %v4269_v5 = vld [vmem:[#allocation5 + $0x210] sm:$0xf0]  ;;  %v130_v10 = vld [vmem:[%s6594_s4] sm:$0xf]  ;;  %v4083_v2 = vld [vmem:[#allocation5 + $0x88] sm:$0xf] }
  0x58   :  { %1186 = vmatpush.bf16.msra.mxu2 %v4352_v16  ;;  %v4272_v6 = vor.u32 %v5770_v4, %v4269_v5  ;;  %v4397_v8 = vld [vmem:[#allocation5 + $0x310] sm:$0xf0]  ;;  %v132_v11 = vperm.slane %v130_v10, 0  ;;  %v133_v12 = vperm.slane %v130_v10, 1  ;;  %v135_v25 = vperm.slane %v130_v10, 3 }
  0x59   :  { %1199 = vmatpush.bf16.msra.mxu3 %v4480_v18  ;;  %v4400_v9 = vor.u32 %v5802_v7, %v4397_v8  ;;  %v4211_v5 = vld [vmem:[#allocation5 + $0x188] sm:$0xf]  ;;  %v4372_v7 = vor.u32 %v5797_v60, %v4371_v59  ;;  %v4133_v60 = vld [vmem:[#allocation5 + $0xf8] sm:$0xf0] }
  0x5a   :  { %1161 = vmatpush.bf16.msra.mxu0 %v4080_v17  ;;  %v134_v17 = vperm.slane %v130_v10, 2  ;;  %v4355_v10 = vld [vmem:[#allocation5 + $0x2a8] sm:$0xf] }
  0x5b   :  { %1174 = vmatpush.bf16.msra.mxu1 %v4208_v22  ;;  %v4259_v22 = vld [vmem:[#allocation5 + $0x1e8] sm:$0xf] }
  0x5c   :  { %1187 = vmatpush.bf16.msra.mxu2 %v4336_v28 }
  0x5d   :  { %1200 = vmatpush.bf16.msra.mxu3 %v4464_v30  ;;  %v4260_v30 = vor.u32 %v5769_v23, %v4259_v22  ;;  %v5789_v22 = vld [vmem:[#allocation5 + $0x294] sm:$0xf0] }
  0x5e   :  { %1162 = vmatpush.bf16.msra.mxu0 %v4064_v29 }
  0x5f   :  { %1175 = vmatpush.bf16.msra.mxu1 %v4192_v31  ;;  %v4115_v31 = vld [vmem:[#allocation5 + $0xc8] sm:$0xf] }
  0x60   :  { %1188 = vmatpush.bf16.msra.mxu2 %v4320_v40  ;;  %v4116_v44 = vor.u32 %v5733_v32, %v4115_v31  ;;  %v5749_v31 = vld [vmem:[#allocation5 + $0x154] sm:$0xf0] }
  0x61   :  { %1201 = vmatpush.bf16.msra.mxu3 %v4448_v43 }
  0x62   :  { %1163 = vmatpush.bf16.msra.mxu0 %v4048_v35 }
  0x63   :  { %1176 = vmatpush.bf16.msra.mxu1 %v4176_v37  ;;  %v4243_v37 = vld [vmem:[#allocation5 + $0x1c8] sm:$0xf] }
  0x64   :  { %1189 = vmatpush.bf16.msra.mxu2 %v4304_v53  ;;  %v4244_v48 = vor.u32 %v5765_v38, %v4243_v37  ;;  %v5761_v53 = vld [vmem:[#allocation5 + $0x1b4] sm:$0xf0] }
  0x65   :  { %1202 = vmatpush.bf16.msra.mxu3 %v4432_v55  ;;  %v4388_v55 = vor.u32 %v5801_v42, %v4387_v41  ;;  %v4228_v0 = vor.u32 %v5761_v53, %v4227_v52  ;;  %v4035_v41 = vld [vmem:[#allocation5 + $0x28] sm:$0xf]  ;;  %v5713_v42 = vld [vmem:[#allocation5 + $0x34] sm:$0xf0] }
  0x66   :  { %1164 = vmatpush.bf16.msra.mxu0 %v4032_v47  ;;  %v5813_v52 = vld [vmem:[#allocation5 + $0x354] sm:$0xf0]  ;;  %v4019_v53 = vld [vmem:[#allocation5 + $0x8] sm:$0xf] }
  0x67   :  { %1177 = vmatpush.bf16.msra.mxu1 %v4160_v49  ;;  %v4099_v49 = vld [vmem:[#allocation5 + $0xa8] sm:$0xf] }
  0x68   :  { %1190 = vmatpush.bf16.msra.mxu2 %v4288_v1  ;;  %v5829_v1 = vld [vmem:[#allocation5 + $0x3d4] sm:$0xf0] }
  0x69   :  { %1203 = vmatpush.bf16.msra.mxu3 %v4416_v3  ;;  %v5725_v3 = vld [vmem:[#allocation5 + $0x94] sm:$0xf0] }
  0x6a   :  { %1165 = vmatpush.bf16.msra.mxu0 %v4016_v58  ;;  %v4100_v58 = vor.u32 %v5729_v50, %v4099_v49  ;;  %v4435_v49 = vld [vmem:[#allocation5 + $0x348] sm:$0xf]  ;;  %v4036_v50 = vor.u32 %v5713_v42, %v4035_v41  ;;  %v5723_v41 = vld [vmem:[#allocation5 + $0x8c] sm:$0xf]  ;;  %v4085_v42 = vld [vmem:[#allocation5 + $0x98] sm:$0xf0] }
  0x6b   :  { %1178 = vmatpush.bf16.msra.mxu1 %v4144_v61  ;;  %v4499_v61 = vld [vmem:[#allocation5 + $0x3c8] sm:$0xf] }
  0x6c   :  { %1191 = vmatpush.bf16.msra.mxu2 %v4272_v6  ;;  %v5757_v6 = vld [vmem:[#allocation5 + $0x194] sm:$0xf0]  ;;  %v4500_v8 = vor.u32 %v5829_v1, %v4499_v61  ;;  %v5767_v61 = vld [vmem:[#allocation5 + $0x1ec] sm:$0xf]  ;;  %v4291_v1 = vld [vmem:[#allocation5 + $0x228] sm:$0xf] }
  0x6d   :  { %1204 = vmatpush.bf16.msra.mxu3 %v4400_v9  ;;  %v4084_v9 = vor.u32 %v5725_v3, %v4083_v2  ;;  %v5777_v2 = vld [vmem:[#allocation5 + $0x234] sm:$0xf0] }
  0xaa   :  { %v273_v13 = vpop.f32.mrf.mxu0 }
  0xab   :  { %v274_v14 = vadd.f32 %v273_v13, %v132_v11  ;;  %v286_v15 = vpop.f32.mrf.mxu1  ;;  %v5793_v11 = vld [vmem:[#allocation5 + $0x2b4] sm:$0xf0]  ;;  %v4483_v13 = vld [vmem:[#allocation5 + $0x3a8] sm:$0xf] }
  0xac   :  { %v287_v16 = vadd.f32 %v286_v15, %v133_v12  ;;  %v4212_v12 = vor.u32 %v5757_v6, %v4211_v5  ;;  %v4067_v15 = vld [vmem:[#allocation5 + $0x68] sm:$0xf]  ;;  %v4356_v19 = vor.u32 %v5793_v11, %v4355_v10  ;;  %v5809_v6 = vld [vmem:[#allocation5 + $0x334] sm:$0xf0]  ;;  %v4292_v10 = vor.u32 %v5777_v2, %v4291_v1  ;;  %v4117_v11 = vld [vmem:[#allocation5 + $0xd8] sm:$0xf0] }
  0xad   :  { %v316_v18 = vmul.f32 0.2, %v274_v14  ;;  %v4419_v5 = vld [vmem:[#allocation5 + $0x328] sm:$0xf]  ;;  %v5819_v1 = vld [vmem:[#allocation5 + $0x38c] sm:$0xf] }
  0xae   :  { %v317_v21 = vmul.f32 0.2, %v287_v16  ;;  %v4469_v2 = vld [vmem:[#allocation5 + $0x398] sm:$0xf0] }
  0xaf   :  { %v320_v24 = vmax.f32 %v274_v14, %v316_v18  ;;  %v5825_v14 = vld [vmem:[#allocation5 + $0x3b4] sm:$0xf0] }
  0xb0   :  { %v321_v26 = vmax.f32 %v287_v16, %v317_v21  ;;  %v5721_v16 = vld [vmem:[#allocation5 + $0x74] sm:$0xf0]  ;;  %v4484_v20 = vor.u32 %v5825_v14, %v4483_v13  ;;  %v4339_v21 = vld [vmem:[#allocation5 + $0x288] sm:$0xf]  ;;  %v4245_v13 = vld [vmem:[#allocation5 + $0x1d8] sm:$0xf0]  ;;  %v4420_v14 = vor.u32 %v5809_v6, %v4419_v5 }
  0xb1   :  { %v6364_v28 = vpack.c.bf16 %v320_v24, %v320_v24  ;;  %v5753_v18 = vld [vmem:[#allocation5 + $0x174] sm:$0xf0]  ;;  %v4068_v23 = vor.u32 %v5721_v16, %v4067_v15  ;;  %v4340_v32 = vor.u32 %v5789_v22, %v4339_v21  ;;  %v4275_v15 = vld [vmem:[#allocation5 + $0x208] sm:$0xf]  ;;  %v5747_v5 = vld [vmem:[#allocation5 + $0x14c] sm:$0xf] }
  0xb2   :  { %v299_v29 = vpop.f32.mrf.mxu2  ;;  %v6366_v33 = vpack.c.bf16 %v321_v26, %v321_v26  ;;  %v275_v36 = vpop.f32.mrf.mxu0  ;;  %v5821_v26 = vld [vmem:[#allocation5 + $0x394] sm:$0xf0]  ;;  %v4181_v6 = vld [vmem:[#allocation5 + $0x158] sm:$0xf0] }
  0xb3   :  { %v300_v34 = vadd.f32 %v299_v29, %v134_v17  ;;  %v312_v35 = vpop.f32.mrf.mxu3  ;;  %1114 = vmatmul.bf16.vlgmr.msrb.gmra.mxu0 %v6364_v28  ;;  %v288_v40 = vpop.f32.mrf.mxu1  ;;  %v4195_v17 = vld [vmem:[#allocation5 + $0x168] sm:$0xf]  ;;  %v5717_v29 = vld [vmem:[#allocation5 + $0x54] sm:$0xf0] }
  0xb4   :  { %v313_v39 = vadd.f32 %v312_v35, %v135_v25  ;;  %1127 = vmatmul.bf16.vlgmr.msrb.gmra.mxu1 %v6366_v33  ;;  %1210 = vmatpush.bf16.msrb.mxu0 %v4132_v27  ;;  %v4196_v24 = vor.u32 %v5753_v18, %v4195_v17  ;;  %v4467_v25 = vld [vmem:[#allocation5 + $0x388] sm:$0xf]  ;;  %v5785_v36 = vld [vmem:[#allocation5 + $0x274] sm:$0xf0] }
  0xb5   :  { %v318_v43 = vmul.f32 0.2, %v300_v34  ;;  %1223 = vmatpush.bf16.msrb.mxu1 %v4260_v30  ;;  %v4051_v27 = vld [vmem:[#allocation5 + $0x48] sm:$0xf]  ;;  %v5817_v40 = vld [vmem:[#allocation5 + $0x374] sm:$0xf0] }
  0xb6   :  { %v319_v47 = vmul.f32 0.2, %v313_v39  ;;  %v4179_v30 = vld [vmem:[#allocation5 + $0x148] sm:$0xf]  ;;  %v4052_v37 = vor.u32 %v5717_v29, %v4051_v27  ;;  %v5773_v16 = vld [vmem:[#allocation5 + $0x214] sm:$0xf0] }
  0xb7   :  { %v322_v51 = vmax.f32 %v300_v34, %v318_v43  ;;  %v4468_v34 = vor.u32 %v5821_v26, %v4467_v25  ;;  %v4323_v35 = vld [vmem:[#allocation5 + $0x268] sm:$0xf]  ;;  %v4180_v38 = vor.u32 %v5749_v31, %v4179_v30  ;;  %v5805_v18 = vld [vmem:[#allocation5 + $0x314] sm:$0xf0]  ;;  %v5727_v25 = vld [vmem:[#allocation5 + $0xac] sm:$0xf]  ;;  %v4276_v26 = vor.u32 %v5773_v16, %v4275_v15 }
  0xb8   :  { %v323_v54 = vmax.f32 %v313_v39, %v319_v47  ;;  %1211 = vmatpush.bf16.msrb.mxu0 %v4116_v44  ;;  %v4451_v39 = vld [vmem:[#allocation5 + $0x368] sm:$0xf]  ;;  %v5745_v44 = vld [vmem:[#allocation5 + $0x134] sm:$0xf0]  ;;  %v4324_v45 = vor.u32 %v5785_v36, %v4323_v35  ;;  %v4101_v27 = vld [vmem:[#allocation5 + $0xb8] sm:$0xf0] }
  0xb9   :  { %v6370_v56 = vpack.c.bf16 %v322_v51, %v322_v51  ;;  %1224 = vmatpush.bf16.msrb.mxu1 %v4244_v48  ;;  %v4163_v43 = vld [vmem:[#allocation5 + $0x128] sm:$0xf]  ;;  %v4452_v46 = vor.u32 %v5817_v40, %v4451_v39  ;;  %v5781_v48 = vld [vmem:[#allocation5 + $0x254] sm:$0xf0]  ;;  %v5759_v29 = vld [vmem:[#allocation5 + $0x1ac] sm:$0xf] }
  0xba   :  { %v6372_v62 = vpack.c.bf16 %v323_v54, %v323_v54  ;;  %v301_v63 = vpop.f32.mrf.mxu2  ;;  %v4307_v47 = vld [vmem:[#allocation5 + $0x248] sm:$0xf]  ;;  %v4164_v51 = vor.u32 %v5745_v44, %v4163_v43  ;;  %v5709_v54 = vld [vmem:[#allocation5 + $0x14] sm:$0xf0]  ;;  %v4229_v30 = vld [vmem:[#allocation5 + $0x1b8] sm:$0xf0] }
  0xbb   :  { %v314_v4 = vpop.f32.mrf.mxu3  ;;  %1140 = vmatmul.bf16.vlgmr.msrb.gmra.mxu2 %v6370_v56  ;;  %v4308_v59 = vor.u32 %v5781_v48, %v4307_v47  ;;  %v4261_v63 = vld [vmem:[#allocation5 + $0x1f8] sm:$0xf0]  ;;  %v4020_v3 = vor.u32 %v5709_v54, %v4019_v53  ;;  %v4403_v17 = vld [vmem:[#allocation5 + $0x308] sm:$0xf]  ;;  %v5795_v35 = vld [vmem:[#allocation5 + $0x2cc] sm:$0xf] }
  0xbc   :  { %1153 = vmatmul.bf16.vlgmr.msrb.gmra.mxu3 %v6372_v62  ;;  %1236 = vmatpush.bf16.msrb.mxu2 %v4388_v55  ;;  %v4147_v55 = vld [vmem:[#allocation5 + $0x108] sm:$0xf]  ;;  %v4404_v31 = vor.u32 %v5805_v18, %v4403_v17  ;;  %v4373_v36 = vld [vmem:[#allocation5 + $0x2d8] sm:$0xf0]  ;;  %v5827_v39 = vld [vmem:[#allocation5 + $0x3cc] sm:$0xf] }
  0xbd   :  { %1249 = vmatpush.bf16.msrb.mxu3 %v4516_v57  ;;  %1212 = vmatpush.bf16.msrb.mxu0 %v4100_v58  ;;  %v5741_v57 = vld [vmem:[#allocation5 + $0x114] sm:$0xf0]  ;;  %v5735_v58 = vld [vmem:[#allocation5 + $0xec] sm:$0xf]  ;;  %v4501_v40 = vld [vmem:[#allocation5 + $0x3d8] sm:$0xf0] }
  0xbe   :  { %1225 = vmatpush.bf16.msrb.mxu1 %v4228_v0  ;;  %v4436_v0 = vor.u32 %v5813_v52, %v4435_v49  ;;  %v4148_v4 = vor.u32 %v5741_v57, %v4147_v55  ;;  %v5755_v43 = vld [vmem:[#allocation5 + $0x18c] sm:$0xf]  ;;  %v4213_v44 = vld [vmem:[#allocation5 + $0x198] sm:$0xf0]  ;;  %v4088_v49 = vor.u32 %v5723_v41, %v4085_v42 }
  0xbf   :  { %v5791_v47 = vld [vmem:[#allocation5 + $0x2ac] sm:$0xf]  ;;  %v4357_v48 = vld [vmem:[#allocation5 + $0x2b8] sm:$0xf0] }
  0xc0   :  { %1237 = vmatpush.bf16.msrb.mxu2 %v4372_v7  ;;  %v4136_v7 = vor.u32 %v5735_v58, %v4133_v60  ;;  %v4485_v52 = vld [vmem:[#allocation5 + $0x3b8] sm:$0xf0]  ;;  %v5719_v53 = vld [vmem:[#allocation5 + $0x6c] sm:$0xf]  ;;  %v4360_v58 = vor.u32 %v5791_v47, %v4357_v48 }
  0xc1   :  { %1250 = vmatpush.bf16.msrb.mxu3 %v4500_v8  ;;  %1213 = vmatpush.bf16.msrb.mxu0 %v4084_v9  ;;  %v4264_v8 = vor.u32 %v5767_v61, %v4261_v63  ;;  %v5731_v9 = vld [vmem:[#allocation5 + $0xcc] sm:$0xf]  ;;  %v4069_v54 = vld [vmem:[#allocation5 + $0x78] sm:$0xf0] }
  0xc2   :  { %1226 = vmatpush.bf16.msrb.mxu1 %v4212_v12  ;;  %v5763_v12 = vld [vmem:[#allocation5 + $0x1cc] sm:$0xf]  ;;  %v4120_v21 = vor.u32 %v5731_v9, %v4117_v11  ;;  %v4197_v57 = vld [vmem:[#allocation5 + $0x178] sm:$0xf0]  ;;  %v4072_v63 = vor.u32 %v5719_v53, %v4069_v54 }
  0xc3   :  { %1166 = vmatmul.bf16.vlgmr.msra.gmra.mxu0 %v6364_v28  ;;  %v4248_v22 = vor.u32 %v5763_v12, %v4245_v13  ;;  %v5751_v55 = vld [vmem:[#allocation5 + $0x16c] sm:$0xf]  ;;  %v4341_v61 = vld [vmem:[#allocation5 + $0x298] sm:$0xf0]  ;;  %v4184_v12 = vor.u32 %v5747_v5, %v4181_v6 }
  0xc4   :  { %1238 = vmatpush.bf16.msrb.mxu2 %v4356_v19  ;;  %1179 = vmatmul.bf16.vlgmr.msra.gmra.mxu1 %v6366_v33  ;;  %v5799_v19 = vld [vmem:[#allocation5 + $0x2ec] sm:$0xf]  ;;  %v4037_v16 = vld [vmem:[#allocation5 + $0x38] sm:$0xf0] }
  0xc5   :  { %1251 = vmatpush.bf16.msrb.mxu3 %v4484_v20  ;;  %1214 = vmatpush.bf16.msrb.mxu0 %v4068_v23  ;;  %v4389_v20 = vld [vmem:[#allocation5 + $0x2f8] sm:$0xf0]  ;;  %v5831_v23 = vld [vmem:[#allocation5 + $0x3ec] sm:$0xf] }
  0xc6   :  { %1227 = vmatpush.bf16.msrb.mxu1 %v4196_v24  ;;  %v4517_v24 = vld [vmem:[#allocation5 + $0x3f8] sm:$0xf0]  ;;  %v5787_v60 = vld [vmem:[#allocation5 + $0x28c] sm:$0xf] }
  0xc7   :  { %v5783_v9 = vld [vmem:[#allocation5 + $0x26c] sm:$0xf]  ;;  %v4165_v18 = vld [vmem:[#allocation5 + $0x138] sm:$0xf0] }
  0xc8   :  { %1239 = vmatpush.bf16.msrb.mxu2 %v4340_v32  ;;  %v4392_v32 = vor.u32 %v5799_v19, %v4389_v20  ;;  %v5815_v13 = vld [vmem:[#allocation5 + $0x36c] sm:$0xf]  ;;  %v4277_v54 = vld [vmem:[#allocation5 + $0x218] sm:$0xf0] }
  0xc9   :  { %1252 = vmatpush.bf16.msrb.mxu3 %v4468_v34  ;;  %1215 = vmatpush.bf16.msrb.mxu0 %v4052_v37  ;;  %v4520_v34 = vor.u32 %v5831_v23, %v4517_v24  ;;  %v4104_v37 = vor.u32 %v5727_v25, %v4101_v27  ;;  %v5711_v15 = vld [vmem:[#allocation5 + $0x2c] sm:$0xf] }
  0xca   :  { %1228 = vmatpush.bf16.msrb.mxu1 %v4180_v38  ;;  %v4232_v38 = vor.u32 %v5759_v29, %v4229_v30  ;;  %v5743_v17 = vld [vmem:[#allocation5 + $0x12c] sm:$0xf]  ;;  %v4040_v24 = vor.u32 %v5711_v15, %v4037_v16  ;;  %v4021_v29 = vld [vmem:[#allocation5 + $0x18] sm:$0xf0]  ;;  %v5880_v15 = vld [vmem:[#allocation7 + $0x16c] sm:$0xf0] }
  0xcb   :  { %1192 = vmatmul.bf16.vlgmr.msra.gmra.mxu2 %v6370_v56  ;;  %v5811_v23 = vld [vmem:[#allocation5 + $0x34c] sm:$0xf]  ;;  %v4168_v25 = vor.u32 %v5743_v17, %v4165_v18  ;;  %v4555_v17 = vld [vmem:[#allocation7 + $0x40] sm:$0xf]  ;;  %v5844_v18 = vld [vmem:[#allocation7 + $0x4c] sm:$0xf0] }
  0xcc   :  { %1205 = vmatmul.bf16.vlgmr.msra.gmra.mxu3 %v6372_v62  ;;  %1240 = vmatpush.bf16.msrb.mxu2 %v4324_v45  ;;  %v4376_v45 = vor.u32 %v5795_v35, %v4373_v36  ;;  %v5707_v27 = vld [vmem:[#allocation5 + $0xc] sm:$0xf]  ;;  %v5864_v35 = vld [vmem:[#allocation7 + $0xec] sm:$0xf0]  ;;  %v4763_v36 = vld [vmem:[#allocation7 + $0x1e0] sm:$0xf] }
  0xcd   :  { %1253 = vmatpush.bf16.msrb.mxu3 %v4452_v46  ;;  %1216 = vmatpush.bf16.msrb.mxu0 %v4036_v50  ;;  %v4504_v46 = vor.u32 %v5827_v39, %v4501_v40  ;;  %v4216_v50 = vor.u32 %v5755_v43, %v4213_v44  ;;  %v5739_v30 = vld [vmem:[#allocation5 + $0x10c] sm:$0xf]  ;;  %v4293_v40 = vld [vmem:[#allocation5 + $0x238] sm:$0xf0]  ;;  %v4024_v41 = vor.u32 %v5707_v27, %v4021_v29  ;;  %v5858_v29 = vld [vmem:[#allocation7 + $0xc4] sm:$0xf] }
  0xce   :  { %1229 = vmatpush.bf16.msrb.mxu1 %v4164_v51  ;;  %v5823_v51 = vld [vmem:[#allocation5 + $0x3ac] sm:$0xf]  ;;  %v4421_v44 = vld [vmem:[#allocation5 + $0x338] sm:$0xf0] }
  0xcf   :  { %v5775_v39 = vld [vmem:[#allocation5 + $0x22c] sm:$0xf] }
  0xd0   :  { %1241 = vmatpush.bf16.msrb.mxu2 %v4308_v59  ;;  %v4488_v59 = vor.u32 %v5823_v51, %v4485_v52  ;;  %v5807_v43 = vld [vmem:[#allocation5 + $0x32c] sm:$0xf]  ;;  %v4296_v48 = vor.u32 %v5775_v39, %v4293_v40  ;;  %v5892_v51 = vld [vmem:[#allocation7 + $0x1cc] sm:$0xf0]  ;;  %v4605_v39 = vld [vmem:[#allocation7 + $0xb0] sm:$0xf0] }
  0xd1   :  { %1254 = vmatpush.bf16.msrb.mxu3 %v4436_v0  ;;  %1217 = vmatpush.bf16.msrb.mxu0 %v4020_v3  ;;  %v4200_v0 = vor.u32 %v5751_v55, %v4197_v57  ;;  %v5715_v3 = vld [vmem:[#allocation5 + $0x4c] sm:$0xf]  ;;  %v4424_v52 = vor.u32 %v5807_v43, %v4421_v44  ;;  %v4405_v57 = vld [vmem:[#allocation5 + $0x318] sm:$0xf0]  ;;  %v5872_v43 = vld [vmem:[#allocation7 + $0x12c] sm:$0xf0] }
  0xd2   :  { %1230 = vmatpush.bf16.msrb.mxu1 %v4148_v4  ;;  %v4053_v4 = vld [vmem:[#allocation5 + $0x58] sm:$0xf0]  ;;  %v5771_v53 = vld [vmem:[#allocation5 + $0x20c] sm:$0xf]  ;;  %v4859_v44 = vld [vmem:[#allocation7 + $0x2a0] sm:$0xf] }
  0xd3   :  { %v4056_v11 = vor.u32 %v5715_v3, %v4053_v4  ;;  %v5803_v55 = vld [vmem:[#allocation5 + $0x30c] sm:$0xf]  ;;  %v4731_v3 = vld [vmem:[#allocation7 + $0x1a0] sm:$0xf]  ;;  %v5888_v4 = vld [vmem:[#allocation7 + $0x1ac] sm:$0xf0] }
  0xd4   :  { %1242 = vmatpush.bf16.msrb.mxu2 %v4292_v10  ;;  %1218 = vmatmul.bf16.vlgmr.msrb.gmra.mxu0 %v6364_v28  ;;  %v4325_v10 = vld [vmem:[#allocation5 + $0x278] sm:$0xf0] }
  0xd5   :  { %1262 = vmatpush.bf16.msra.mxu0 %v4136_v7  ;;  %1255 = vmatpush.bf16.msrb.mxu3 %v4420_v14  ;;  %v4344_v7 = vor.u32 %v5787_v60, %v4341_v61  ;;  %v4453_v14 = vld [vmem:[#allocation5 + $0x378] sm:$0xf0]  ;;  %v4328_v19 = vor.u32 %v5783_v9, %v4325_v10  ;;  %v4732_v9 = vor.u32 %v5888_v4, %v4731_v3  ;;  %v4715_v10 = vld [vmem:[#allocation7 + $0x180] sm:$0xf]  ;;  %v5842_v4 = vld [vmem:[#allocation7 + $0x44] sm:$0xf] }
  0xd6   :  { %1275 = vmatpush.bf16.msra.mxu1 %v4264_v8  ;;  %v4472_v8 = vor.u32 %v5819_v1, %v4469_v2  ;;  %v4456_v20 = vor.u32 %v5815_v13, %v4453_v14  ;;  %v5856_v1 = vld [vmem:[#allocation7 + $0xac] sm:$0xf0]  ;;  %v4408_v2 = vor.u32 %v5803_v55, %v4405_v57  ;;  %v4699_v14 = vld [vmem:[#allocation7 + $0x160] sm:$0xf]  ;;  %v5846_v57 = vld [vmem:[#allocation7 + $0x64] sm:$0xf] }
  0xd7   :  { %1231 = vmatmul.bf16.vlgmr.msrb.gmra.mxu1 %v6366_v33  ;;  %v5848_v13 = vld [vmem:[#allocation7 + $0x6c] sm:$0xf0] }
  0xd8   :  { %1243 = vmatpush.bf16.msrb.mxu2 %v4276_v26  ;;  %v4437_v26 = vld [vmem:[#allocation5 + $0x358] sm:$0xf0]  ;;  %v5916_v55 = vld [vmem:[#allocation7 + $0x28c] sm:$0xf0] }
  0xd9   :  { %1263 = vmatpush.bf16.msra.mxu0 %v4120_v21  ;;  %1256 = vmatpush.bf16.msrb.mxu3 %v4404_v31  ;;  %v5779_v21 = vld [vmem:[#allocation5 + $0x24c] sm:$0xf]  ;;  %v4149_v31 = vld [vmem:[#allocation5 + $0x118] sm:$0xf0] }
  0xda   :  { %1276 = vmatpush.bf16.msra.mxu1 %v4248_v22  ;;  %v4309_v22 = vld [vmem:[#allocation5 + $0x258] sm:$0xf0]  ;;  %v4152_v42 = vor.u32 %v5739_v30, %v4149_v31  ;;  %v4621_v30 = vld [vmem:[#allocation7 + $0xd0] sm:$0xf0] }
  0xdb   :  { %1244 = vmatmul.bf16.vlgmr.msrb.gmra.mxu2 %v6370_v56  ;;  %v4624_v31 = vor.u32 %v5858_v29, %v4621_v30  ;;  %v5960_v29 = vld [vmem:[#allocation7 + $0x3ec] sm:$0xf0]  ;;  %v5878_v30 = vld [vmem:[#allocation7 + $0x164] sm:$0xf] }
  0xdc   :  { %1288 = vmatpush.bf16.msra.mxu2 %v4392_v32  ;;  %1257 = vmatmul.bf16.vlgmr.msrb.gmra.mxu3 %v6372_v62  ;;  %v4635_v32 = vld [vmem:[#allocation7 + $0xe0] sm:$0xf] }
  0xdd   :  { %1301 = vmatpush.bf16.msra.mxu3 %v4520_v34  ;;  %1264 = vmatpush.bf16.msra.mxu0 %v4104_v37  ;;  %v4312_v34 = vor.u32 %v5779_v21, %v4309_v22  ;;  %v5896_v37 = vld [vmem:[#allocation7 + $0x1ec] sm:$0xf0]  ;;  %v4539_v21 = vld [vmem:[#allocation7 + $0x20] sm:$0xf] }
  0xde   :  { %1277 = vmatpush.bf16.msra.mxu1 %v4232_v38  ;;  %v4440_v38 = vor.u32 %v5811_v23, %v4437_v26  ;;  %v4764_v47 = vor.u32 %v5896_v37, %v4763_v36  ;;  %v5836_v23 = vld [vmem:[#allocation7 + $0xc] sm:$0xf0] }
  0xdf   :  { %v5924_v37 = vld [vmem:[#allocation7 + $0x2cc] sm:$0xf0] }
  0xe0   :  { %1289 = vmatpush.bf16.msra.mxu2 %v4376_v45  ;;  %v4636_v45 = vor.u32 %v5864_v35, %v4635_v32  ;;  %v4683_v32 = vld [vmem:[#allocation7 + $0x140] sm:$0xf] }
  0xe1   :  { %1302 = vmatpush.bf16.msra.mxu3 %v4504_v46  ;;  %1265 = vmatpush.bf16.msra.mxu0 %v4088_v49  ;;  %v4619_v46 = vld [vmem:[#allocation7 + $0xc0] sm:$0xf]  ;;  %v5860_v49 = vld [vmem:[#allocation7 + $0xcc] sm:$0xf0] }
  0xe2   :  { %1278 = vmatpush.bf16.msra.mxu1 %v4216_v50  ;;  %v4747_v50 = vld [vmem:[#allocation7 + $0x1c0] sm:$0xf]  ;;  %v4620_v60 = vor.u32 %v5860_v49, %v4619_v46  ;;  %v5920_v46 = vld [vmem:[#allocation7 + $0x2ac] sm:$0xf0] }
  0xe3   :  { %v4748_v61 = vor.u32 %v5892_v51, %v4747_v50  ;;  %v4875_v35 = vld [vmem:[#allocation7 + $0x2c0] sm:$0xf]  ;;  %v4860_v49 = vor.u32 %v5920_v46, %v4859_v44 }
  0xe4   :  { %1290 = vmatpush.bf16.msra.mxu2 %v4360_v58  ;;  %v4891_v58 = vld [vmem:[#allocation7 + $0x2e0] sm:$0xf]  ;;  %v4876_v40 = vor.u32 %v5924_v37, %v4875_v35  ;;  %v5926_v35 = vld [vmem:[#allocation7 + $0x2e4] sm:$0xf] }
  0xe5   :  { %1303 = vmatpush.bf16.msra.mxu3 %v4488_v59  ;;  %1266 = vmatpush.bf16.msra.mxu0 %v4072_v63  ;;  %v5928_v59 = vld [vmem:[#allocation7 + $0x2ec] sm:$0xf0]  ;;  %v4280_v63 = vor.u32 %v5771_v53, %v4277_v54  ;;  %v4651_v51 = vld [vmem:[#allocation7 + $0x100] sm:$0xf] }
  0xe6   :  { %1279 = vmatpush.bf16.msra.mxu1 %v4200_v0  ;;  %v4603_v0 = vld [vmem:[#allocation7 + $0xa0] sm:$0xf]  ;;  %v4892_v5 = vor.u32 %v5928_v59, %v4891_v58  ;;  %v4573_v58 = vld [vmem:[#allocation7 + $0x70] sm:$0xf0] }
  0xe7   :  { %v4604_v6 = vor.u32 %v5856_v1, %v4603_v0  ;;  %v4843_v53 = vld [vmem:[#allocation7 + $0x280] sm:$0xf] }
  0xe8   :  { %1291 = vmatpush.bf16.msra.mxu2 %v4344_v7  ;;  %v4587_v7 = vld [vmem:[#allocation7 + $0x80] sm:$0xf]  ;;  %v4844_v59 = vor.u32 %v5916_v55, %v4843_v53  ;;  %v5870_v53 = vld [vmem:[#allocation7 + $0x124] sm:$0xf] }
  0xe9   :  { %1304 = vmatpush.bf16.msra.mxu3 %v4472_v8  ;;  %1267 = vmatpush.bf16.msra.mxu0 %v4056_v11  ;;  %v5852_v8 = vld [vmem:[#allocation7 + $0x8c] sm:$0xf0]  ;;  %v4827_v1 = vld [vmem:[#allocation7 + $0x260] sm:$0xf] }
  0xea   :  { %1280 = vmatpush.bf16.msra.mxu1 %v4184_v12  ;;  %v5884_v11 = vld [vmem:[#allocation7 + $0x18c] sm:$0xf0]  ;;  %v4571_v12 = vld [vmem:[#allocation7 + $0x60] sm:$0xf] }
  0xeb   :  { %v4572_v16 = vor.u32 %v5848_v13, %v4571_v12  ;;  %v5838_v12 = vld [vmem:[#allocation7 + $0x24] sm:$0xf]  ;;  %v4541_v13 = vld [vmem:[#allocation7 + $0x30] sm:$0xf0] }
  0xec   :  { %1292 = vmatpush.bf16.msra.mxu2 %v4328_v19  ;;  %v4700_v19 = vor.u32 %v5880_v15, %v4699_v14  ;;  %v5886_v14 = vld [vmem:[#allocation7 + $0x1a4] sm:$0xf]  ;;  %v4733_v15 = vld [vmem:[#allocation7 + $0x1b0] sm:$0xf0] }
  0xed   :  { %1305 = vmatpush.bf16.msra.mxu3 %v4456_v20  ;;  %1268 = vmatpush.bf16.msra.mxu0 %v4040_v24  ;;  %v4556_v20 = vor.u32 %v5844_v18, %v4555_v17  ;;  %v5862_v24 = vld [vmem:[#allocation7 + $0xe4] sm:$0xf]  ;;  %v4795_v17 = vld [vmem:[#allocation7 + $0x220] sm:$0xf]  ;;  %v5904_v18 = vld [vmem:[#allocation7 + $0x22c] sm:$0xf0] }
  0xee   :  { %1281 = vmatpush.bf16.msra.mxu1 %v4168_v25  ;;  %v4637_v25 = vld [vmem:[#allocation7 + $0xf0] sm:$0xf0] }
  0xef   :  { %v4640_v27 = vor.u32 %v5862_v24, %v4637_v25  ;;  %v4779_v24 = vld [vmem:[#allocation7 + $0x200] sm:$0xf]  ;;  %v5900_v25 = vld [vmem:[#allocation7 + $0x20c] sm:$0xf0] }
  0xf0   :  { %1293 = vmatpush.bf16.msra.mxu2 %v4312_v34  ;;  %v5876_v34 = vld [vmem:[#allocation7 + $0x14c] sm:$0xf0] }
  0xf1   :  { %1306 = vmatpush.bf16.msra.mxu3 %v4440_v38  ;;  %1269 = vmatpush.bf16.msra.mxu0 %v4024_v41  ;;  %v4684_v36 = vor.u32 %v5876_v34, %v4683_v32  ;;  %v5854_v38 = vld [vmem:[#allocation7 + $0xa4] sm:$0xf] }
  0xf2   :  { %1282 = vmatpush.bf16.msra.mxu1 %v4152_v42  ;;  %v4608_v41 = vor.u32 %v5854_v38, %v4605_v39  ;;  %v4667_v42 = vld [vmem:[#allocation7 + $0x120] sm:$0xf]  ;;  %v5956_v39 = vld [vmem:[#allocation7 + $0x3cc] sm:$0xf0] }
  0xf3   :  { %v5003_v38 = vld [vmem:[#allocation7 + $0x3c0] sm:$0xf] }
  0xf4   :  { %1294 = vmatpush.bf16.msra.mxu2 %v4296_v48  ;;  %1270 = vmatmul.bf16.vlgmr.msra.gmra.mxu0 %v6364_v28  ;;  %v4588_v28 = vor.u32 %v5852_v8, %v4587_v7  ;;  %v4589_v48 = vld [vmem:[#allocation7 + $0x90] sm:$0xf0] }
  0xf5   :  { %2104 = vmatpush.bf16.msrb.mxu0 %v4636_v45  ;;  %1307 = vmatpush.bf16.msra.mxu3 %v4424_v52  ;;  %v4668_v45 = vor.u32 %v5872_v43, %v4667_v42  ;;  %v5868_v52 = vld [vmem:[#allocation7 + $0x10c] sm:$0xf0]  ;;  %v4749_v8 = vld [vmem:[#allocation7 + $0x1d0] sm:$0xf0]  ;;  %v5922_v43 = vld [vmem:[#allocation7 + $0x2c4] sm:$0xf] }
  0xf6   :  { %2117 = vmatpush.bf16.msrb.mxu1 %v4764_v47  ;;  %v5850_v47 = vld [vmem:[#allocation7 + $0x84] sm:$0xf]  ;;  %v4652_v54 = vor.u32 %v5868_v52, %v4651_v51  ;;  %v4685_v42 = vld [vmem:[#allocation7 + $0x150] sm:$0xf0]  ;;  %v5952_v51 = vld [vmem:[#allocation7 + $0x3ac] sm:$0xf0] }
  0xf7   :  { %1283 = vmatmul.bf16.vlgmr.msra.gmra.mxu1 %v6366_v33  ;;  %v4716_v33 = vor.u32 %v5884_v11, %v4715_v10  ;;  %v4592_v50 = vor.u32 %v5850_v47, %v4589_v48  ;;  %v4811_v10 = vld [vmem:[#allocation7 + $0x240] sm:$0xf]  ;;  %v5908_v11 = vld [vmem:[#allocation7 + $0x24c] sm:$0xf0] }
  0xf8   :  { %1295 = vmatpush.bf16.msra.mxu2 %v4280_v63  ;;  %v4765_v63 = vld [vmem:[#allocation7 + $0x1f0] sm:$0xf0]  ;;  %v6391_v48 = vld [vmem:[%s6596_s6] sm:$0xf] }
  0xf9   :  { %2105 = vmatpush.bf16.msrb.mxu0 %v4620_v60  ;;  %1308 = vmatpush.bf16.msra.mxu3 %v4408_v2  ;;  %v4576_v60 = vor.u32 %v5846_v57, %v4573_v58  ;;  %v5912_v2 = vld [vmem:[#allocation7 + $0x26c] sm:$0xf0]  ;;  %v5918_v57 = vld [vmem:[#allocation7 + $0x2a4] sm:$0xf]  ;;  %v4861_v58 = vld [vmem:[#allocation7 + $0x2b0] sm:$0xf0] }
  0xfa   :  { %2118 = vmatpush.bf16.msrb.mxu1 %v4748_v61  ;;  %v5894_v61 = vld [vmem:[#allocation7 + $0x1e4] sm:$0xf]  ;;  %v4828_v3 = vor.u32 %v5912_v2, %v4827_v1  ;;  %v4653_v2 = vld [vmem:[#allocation7 + $0x110] sm:$0xf0] }
  0xfb   :  { %1296 = vmatmul.bf16.vlgmr.msra.gmra.mxu2 %v6370_v56  ;;  %v5840_v56 = vld [vmem:[#allocation7 + $0x2c] sm:$0xf0]  ;;  %v4768_v0 = vor.u32 %v5894_v61, %v4765_v63  ;;  %v4971_v61 = vld [vmem:[#allocation7 + $0x380] sm:$0xf]  ;;  %v5866_v1 = vld [vmem:[#allocation7 + $0x104] sm:$0xf] }
  0xfc   :  { %2130 = vmatpush.bf16.msrb.mxu2 %v4892_v5  ;;  %1309 = vmatmul.bf16.vlgmr.msra.gmra.mxu3 %v6372_v62  ;;  %v4540_v22 = vor.u32 %v5840_v56, %v4539_v21  ;;  %v4523_v62 = vld [vmem:[#allocation7] sm:$0xf]  ;;  %v4557_v5 = vld [vmem:[#allocation7 + $0x50] sm:$0xf0]  ;;  %v5882_v56 = vld [vmem:[#allocation7 + $0x184] sm:$0xf] }
  0xfd   :  { %2106 = vmatpush.bf16.msrb.mxu0 %v4604_v6  ;;  %v4524_v26 = vor.u32 %v5836_v23, %v4523_v62  ;;  %v5890_v6 = vld [vmem:[#allocation7 + $0x1c4] sm:$0xf]  ;;  %v4560_v7 = vor.u32 %v5842_v4, %v4557_v5  ;;  %v4525_v21 = vld [vmem:[#allocation7 + $0x10] sm:$0xf0]  ;;  %v5948_v63 = vld [vmem:[#allocation7 + $0x38c] sm:$0xf0]  ;;  %v4656_v4 = vor.u32 %v5866_v1, %v4653_v2 }
  0xfe   :  { %2119 = vmatpush.bf16.msrb.mxu1 %v4732_v9  ;;  %v4752_v9 = vor.u32 %v5890_v6, %v4749_v8  ;;  %v4717_v62 = vld [vmem:[#allocation7 + $0x190] sm:$0xf0] }
  0xff   :  { %v4720_v23 = vor.u32 %v5882_v56, %v4717_v62  ;;  %v4845_v5 = vld [vmem:[#allocation7 + $0x290] sm:$0xf0] }
 0x100   :  { %2131 = vmatpush.bf16.msrb.mxu2 %v4876_v40  ;;  %v5004_v40 = vor.u32 %v5956_v39, %v5003_v38  ;;  %v4813_v56 = vld [vmem:[#allocation7 + $0x250] sm:$0xf0]  ;;  %v4627_v38 = vld [vmem:[#allocation7 + $0xc8] sm:$0xf] }
 0x101   :  { %2107 = vmatpush.bf16.msrb.mxu0 %v4588_v28  ;;  %v4812_v28 = vor.u32 %v5908_v11, %v4811_v10  ;;  %v4955_v10 = vld [vmem:[#allocation7 + $0x360] sm:$0xf]  ;;  %v5944_v11 = vld [vmem:[#allocation7 + $0x36c] sm:$0xf0] }
 0x102   :  { %2120 = vmatpush.bf16.msrb.mxu1 %v4716_v33  ;;  %v4544_v33 = vor.u32 %v5838_v12, %v4541_v13  ;;  %v5910_v12 = vld [vmem:[#allocation7 + $0x264] sm:$0xf]  ;;  %v4829_v13 = vld [vmem:[#allocation7 + $0x270] sm:$0xf0] }
 0x104   :  { %2132 = vmatpush.bf16.msrb.mxu2 %v4860_v49 }
 0x105   :  { %2108 = vmatpush.bf16.msrb.mxu0 %v4572_v16  ;;  %v4736_v16 = vor.u32 %v5886_v14, %v4733_v15 }
 0x106   :  { %2121 = vmatpush.bf16.msrb.mxu1 %v4700_v19  ;;  %v4796_v19 = vor.u32 %v5904_v18, %v4795_v17  ;;  %v5940_v17 = vld [vmem:[#allocation7 + $0x34c] sm:$0xf0] }
 0x108   :  { %2133 = vmatpush.bf16.msrb.mxu2 %v4844_v59  ;;  %v458_v59 = vperm.slane %v6391_v48, 0 }
 0x109   :  { %2109 = vmatpush.bf16.msrb.mxu0 %v4556_v20  ;;  %v5834_v20 = vld [vmem:[#allocation7 + $0x4] sm:$0xf] }
 0x10a   :  { %2122 = vmatpush.bf16.msrb.mxu1 %v4684_v36  ;;  %v4893_v36 = vld [vmem:[#allocation7 + $0x2f0] sm:$0xf0] }
 0x10b   :  { %v4896_v37 = vor.u32 %v5926_v35, %v4893_v36 }
 0x10c   :  { %2134 = vmatpush.bf16.msrb.mxu2 %v4828_v3  ;;  %v5914_v3 = vld [vmem:[#allocation7 + $0x284] sm:$0xf] }
 0x10d   :  { %2110 = vmatpush.bf16.msrb.mxu0 %v4540_v22  ;;  %v4528_v22 = vor.u32 %v5834_v20, %v4525_v21  ;;  %v4848_v8 = vor.u32 %v5914_v3, %v4845_v5  ;;  %v5906_v21 = vld [vmem:[#allocation7 + $0x244] sm:$0xf] }
 0x10e   :  { %2123 = vmatpush.bf16.msrb.mxu1 %v4668_v45  ;;  %v4877_v45 = vld [vmem:[#allocation7 + $0x2d0] sm:$0xf0] }
 0x10f   :  { %v4880_v47 = vor.u32 %v5922_v43, %v4877_v45  ;;  %v5932_v43 = vld [vmem:[#allocation7 + $0x30c] sm:$0xf0] }
 0x110   :  { %2135 = vmatpush.bf16.msrb.mxu2 %v4812_v28  ;;  %v4956_v28 = vor.u32 %v5944_v11, %v4955_v10 }
 0x111   :  { %2111 = vmatpush.bf16.msrb.mxu0 %v4524_v26  ;;  %v5019_v26 = vld [vmem:[#allocation7 + $0x3e0] sm:$0xf] }
 0x112   :  { %2124 = vmatpush.bf16.msrb.mxu1 %v4652_v54  ;;  %v5020_v32 = vor.u32 %v5960_v29, %v5019_v26  ;;  %v4669_v54 = vld [vmem:[#allocation7 + $0x130] sm:$0xf0]  ;;  %v5865_v26 = vld [vmem:[#allocation7 + $0xf4] sm:$0xf0]  ;;  %v5936_v29 = vld [vmem:[#allocation7 + $0x32c] sm:$0xf0] }
 0x113   :  { %v4672_v55 = vor.u32 %v5870_v53, %v4669_v54 }
 0x114   :  { %2136 = vmatpush.bf16.msrb.mxu2 %v4796_v19  ;;  %2143 = vmatpush.bf16.msrb.mxu3 %v5020_v32  ;;  %v5902_v32 = vld [vmem:[#allocation7 + $0x224] sm:$0xf] }
 0x115   :  { %2156 = vmatpush.bf16.msra.mxu0 %v4640_v27  ;;  %v4780_v27 = vor.u32 %v5900_v25, %v4779_v24  ;;  %v4643_v24 = vld [vmem:[#allocation7 + $0xe8] sm:$0xf] }
 0x116   :  { %2169 = vmatpush.bf16.msra.mxu1 %v4768_v0  ;;  %v4972_v0 = vor.u32 %v5948_v63, %v4971_v61  ;;  %v5954_v61 = vld [vmem:[#allocation7 + $0x3c4] sm:$0xf]  ;;  %v5005_v63 = vld [vmem:[#allocation7 + $0x3d0] sm:$0xf0] }
 0x118   :  { %2137 = vmatpush.bf16.msrb.mxu2 %v4780_v27  ;;  %2144 = vmatpush.bf16.msrb.mxu3 %v5004_v40  ;;  %v4923_v27 = vld [vmem:[#allocation7 + $0x320] sm:$0xf]  ;;  %v4644_v40 = vor.u32 %v5865_v26, %v4643_v24  ;;  %v4563_v24 = vld [vmem:[#allocation7 + $0x48] sm:$0xf] }
 0x119   :  { %2157 = vmatpush.bf16.msra.mxu0 %v4624_v31  ;;  %v4701_v31 = vld [vmem:[#allocation7 + $0x170] sm:$0xf0]  ;;  %v4755_v26 = vld [vmem:[#allocation7 + $0x1c8] sm:$0xf] }
 0x11a   :  { %2170 = vmatpush.bf16.msra.mxu1 %v4752_v9  ;;  %v4704_v34 = vor.u32 %v5878_v30, %v4701_v31  ;;  %v4924_v31 = vor.u32 %v5936_v29, %v4923_v27 }
 0x11c   :  { %2182 = vmatpush.bf16.msra.mxu2 %v4896_v37  ;;  %v459_v37 = vperm.slane %v6391_v48, 1 }
 0x11d   :  { %2158 = vmatpush.bf16.msra.mxu0 %v4608_v41  ;;  %v5874_v41 = vld [vmem:[#allocation7 + $0x144] sm:$0xf] }
 0x11e   :  { %2171 = vmatpush.bf16.msra.mxu1 %v4736_v16  ;;  %v4688_v44 = vor.u32 %v5874_v41, %v4685_v42  ;;  %v4939_v16 = vld [vmem:[#allocation7 + $0x340] sm:$0xf]  ;;  %v5861_v41 = vld [vmem:[#allocation7 + $0xd4] sm:$0xf0] }
 0x11f   :  { %v4940_v20 = vor.u32 %v5940_v17, %v4939_v16  ;;  %v4907_v42 = vld [vmem:[#allocation7 + $0x300] sm:$0xf] }
 0x120   :  { %2183 = vmatpush.bf16.msra.mxu2 %v4880_v47  ;;  %v5898_v47 = vld [vmem:[#allocation7 + $0x204] sm:$0xf] }
 0x121   :  { %2159 = vmatpush.bf16.msra.mxu0 %v4592_v50  ;;  %v4987_v50 = vld [vmem:[#allocation7 + $0x3a0] sm:$0xf] }
 0x122   :  { %2172 = vmatpush.bf16.msra.mxu1 %v4720_v23  ;;  %v4988_v52 = vor.u32 %v5952_v51, %v4987_v50  ;;  %v5958_v50 = vld [vmem:[#allocation7 + $0x3e4] sm:$0xf] }
 0x124   :  { %2145 = vmatpush.bf16.msrb.mxu3 %v4988_v52  ;;  %v5021_v52 = vld [vmem:[#allocation7 + $0x3f0] sm:$0xf0] }
 0x125   :  { %2160 = vmatpush.bf16.msra.mxu0 %v4576_v60  ;;  %v4864_v60 = vor.u32 %v5918_v57, %v4861_v58  ;;  %v4628_v58 = vor.u32 %v5861_v41, %v4627_v38  ;;  %v4739_v41 = vld [vmem:[#allocation7 + $0x1a8] sm:$0xf] }
 0x126   :  { %2173 = vmatpush.bf16.msra.mxu1 %v4704_v34  ;;  %v4797_v34 = vld [vmem:[#allocation7 + $0x230] sm:$0xf0] }
 0x127   :  { %2184 = vmatpush.bf16.msra.mxu2 %v4864_v60  ;;  %v4800_v35 = vor.u32 %v5902_v32, %v4797_v34  ;;  %v5857_v60 = vld [vmem:[#allocation7 + $0xb4] sm:$0xf0]  ;;  %v4957_v32 = vld [vmem:[#allocation7 + $0x370] sm:$0xf0] }
 0x128   :  { %2146 = vmatpush.bf16.msrb.mxu3 %v4972_v0  ;;  %v5008_v0 = vor.u32 %v5954_v61, %v5005_v63  ;;  %v5863_v63 = vld [vmem:[#allocation7 + $0xec] sm:$0xf] }
 0x129   :  { %2161 = vmatpush.bf16.msra.mxu0 %v4560_v7 }
 0x12a   :  { %2174 = vmatpush.bf16.msra.mxu1 %v4688_v44 }
 0x12b   :  { %2185 = vmatpush.bf16.msra.mxu2 %v4848_v8  ;;  %v5950_v8 = vld [vmem:[#allocation7 + $0x3a4] sm:$0xf] }
 0x12c   :  { %2147 = vmatpush.bf16.msrb.mxu3 %v4956_v28  ;;  %v4579_v28 = vld [vmem:[#allocation7 + $0x68] sm:$0xf] }
 0x12d   :  { %2162 = vmatpush.bf16.msra.mxu0 %v4544_v33  ;;  %v4832_v33 = vor.u32 %v5910_v12, %v4829_v13 }
 0x12e   :  { %2175 = vmatpush.bf16.msra.mxu1 %v4672_v55  ;;  %v5024_v55 = vor.u32 %v5958_v50, %v5021_v52  ;;  %v4531_v52 = vld [vmem:[#allocation7 + $0x8] sm:$0xf] }
 0x12f   :  { %2186 = vmatpush.bf16.msra.mxu2 %v4832_v33  ;;  %v5849_v33 = vld [vmem:[#allocation7 + $0x74] sm:$0xf0] }
 0x130   :  { %v1115_v46 = vpop.f32.mrf.mxu0  ;;  %2148 = vmatpush.bf16.msrb.mxu3 %v4940_v20 }
 0x131   :  { %2163 = vmatpush.bf16.msra.mxu0 %v4528_v22  ;;  %v1128_v49 = vpop.f32.mrf.mxu1  ;;  %v1116_v6 = vadd.f32 %v1115_v46, %v458_v59  ;;  %v4816_v22 = vor.u32 %v5906_v21, %v4813_v56  ;;  %v4908_v46 = vor.u32 %v5932_v43, %v4907_v42  ;;  %v4611_v59 = vld [vmem:[#allocation7 + $0xa8] sm:$0xf]  ;;  %v460_v56 = vperm.slane %v6391_v48, 2  ;;  %v5889_v43 = vld [vmem:[#allocation7 + $0x1b4] sm:$0xf0] }
 0x132   :  { %2176 = vmatpush.bf16.msra.mxu1 %v4656_v4  ;;  %v4612_v3 = vor.u32 %v5857_v60, %v4611_v59  ;;  %v4595_v4 = vld [vmem:[#allocation7 + $0x88] sm:$0xf]  ;;  %v5934_v59 = vld [vmem:[#allocation7 + $0x324] sm:$0xf]  ;;  %v4925_v60 = vld [vmem:[#allocation7 + $0x330] sm:$0xf0] }
 0x133   :  { %v1129_v14 = vadd.f32 %v1128_v49, %v1116_v6  ;;  %2187 = vmatpush.bf16.msra.mxu2 %v4816_v22  ;;  %v4781_v49 = vld [vmem:[#allocation7 + $0x210] sm:$0xf0] }
 0x134   :  { %2149 = vmatpush.bf16.msrb.mxu3 %v4924_v31  ;;  %v4784_v51 = vor.u32 %v5898_v47, %v4781_v49  ;;  %v5942_v31 = vld [vmem:[#allocation7 + $0x364] sm:$0xf] }
 0x135   :  { %v4960_v34 = vor.u32 %v5942_v31, %v4957_v32  ;;  %v5873_v31 = vld [vmem:[#allocation7 + $0x134] sm:$0xf0]  ;;  %v4867_v32 = vld [vmem:[#allocation7 + $0x2a8] sm:$0xf] }
 0x137   :  { %2188 = vmatpush.bf16.msra.mxu2 %v4800_v35 }
 0x138   :  { %v1117_v7 = vpop.f32.mrf.mxu0  ;;  %2150 = vmatpush.bf16.msrb.mxu3 %v4908_v46  ;;  %v4941_v46 = vld [vmem:[#allocation7 + $0x350] sm:$0xf0] }
 0x139   :  { %v1130_v9 = vpop.f32.mrf.mxu1  ;;  %v5853_v7 = vld [vmem:[#allocation7 + $0x94] sm:$0xf0] }
 0x13a   :  { %v4989_v9 = vld [vmem:[#allocation7 + $0x3b0] sm:$0xf0]  ;;  %v4596_v13 = vor.u32 %v5853_v7, %v4595_v4  ;;  %v4899_v7 = vld [vmem:[#allocation7 + $0x2e8] sm:$0xf] }
 0x13b   :  { %2189 = vmatpush.bf16.msra.mxu2 %v4784_v51  ;;  %v4992_v10 = vor.u32 %v5950_v8, %v4989_v9  ;;  %v4740_v51 = vor.u32 %v5889_v43, %v4739_v41  ;;  %v5929_v9 = vld [vmem:[#allocation7 + $0x2f4] sm:$0xf0]  ;;  %v4659_v41 = vld [vmem:[#allocation7 + $0x108] sm:$0xf] }
 0x13c   :  { %2195 = vmatpush.bf16.msra.mxu3 %v5024_v55  ;;  %v4851_v43 = vld [vmem:[#allocation7 + $0x288] sm:$0xf] }
 0x13e   :  { %v1141_v15 = vpop.f32.mrf.mxu2 }
 0x13f   :  { %v1142_v18 = vadd.f32 %v1141_v15, %v1129_v14  ;;  %v1154_v19 = vpop.f32.mrf.mxu3  ;;  %v4771_v14 = vld [vmem:[#allocation7 + $0x1e8] sm:$0xf]  ;;  %v5897_v15 = vld [vmem:[#allocation7 + $0x1f4] sm:$0xf0] }
 0x140   :  { %v1167_v23 = vpop.f32.mrf.mxu0  ;;  %2196 = vmatpush.bf16.msra.mxu3 %v5008_v0  ;;  %v4645_v0 = vld [vmem:[#allocation7 + $0xf8] sm:$0xf0] }
 0x141   :  { %v1155_v62 = vadd.f32 %v1154_v19, %v1142_v18  ;;  %v1180_v25 = vpop.f32.mrf.mxu1  ;;  %v1168_v53 = vadd.f32 %v1167_v23, %v459_v37  ;;  %v5946_v18 = vld [vmem:[#allocation7 + $0x384] sm:$0xf]  ;;  %v4973_v19 = vld [vmem:[#allocation7 + $0x390] sm:$0xf0]  ;;  %v4772_v23 = vor.u32 %v5897_v15, %v4771_v14  ;;  %v4648_v8 = vor.u32 %v5863_v63, %v4645_v0  ;;  %v5891_v63 = vld [vmem:[#allocation7 + $0x1cc] sm:$0xf] }
 0x142   :  { %v4976_v20 = vor.u32 %v5946_v18, %v4973_v19  ;;  %v4900_v18 = vor.u32 %v5929_v9, %v4899_v7  ;;  %v4757_v0 = vld [vmem:[#allocation7 + $0x1d8] sm:$0xf0]  ;;  %v5909_v7 = vld [vmem:[#allocation7 + $0x254] sm:$0xf0] }
 0x143   :  { %v1314_v30 = vmul.f32 0.2, %v1155_v62  ;;  %v1181_v1 = vadd.f32 %v1180_v25, %v1168_v53  ;;  %v5845_v25 = vld [vmem:[#allocation7 + $0x54] sm:$0xf0]  ;;  %v4549_v9 = vld [vmem:[#allocation7 + $0x38] sm:$0xf0] }
 0x144   :  { %2197 = vmatpush.bf16.msra.mxu3 %v4992_v10  ;;  %v4564_v37 = vor.u32 %v5845_v25, %v4563_v24  ;;  %v5837_v53 = vld [vmem:[#allocation7 + $0x14] sm:$0xf0]  ;;  %v5930_v10 = vld [vmem:[#allocation7 + $0x304] sm:$0xf]  ;;  %v4613_v24 = vld [vmem:[#allocation7 + $0xb8] sm:$0xf0] }
 0x145   :  { %v1318_v36 = vmax.f32 %v1155_v62, %v1314_v30  ;;  %v4580_v62 = vor.u32 %v5849_v33, %v4579_v28  ;;  %v5893_v30 = vld [vmem:[#allocation7 + $0x1d4] sm:$0xf0] }
 0x146   :  { %v1143_v39 = vpop.f32.mrf.mxu2  ;;  %v4756_v38 = vor.u32 %v5893_v30, %v4755_v26  ;;  %v4675_v30 = vld [vmem:[#allocation7 + $0x128] sm:$0xf] }
 0x147   :  { %v6395_v44 = vpack.c.bf16 %v1318_v36, %v1318_v36  ;;  %v1156_v45 = vpop.f32.mrf.mxu3  ;;  %v4547_v39 = vld [vmem:[#allocation7 + $0x28] sm:$0xf] }
 0x148   :  { %v1169_v54 = vpop.f32.mrf.mxu0  ;;  %2198 = vmatpush.bf16.msra.mxu3 %v4976_v20  ;;  %v5938_v45 = vld [vmem:[#allocation7 + $0x344] sm:$0xf]  ;;  %v4691_v20 = vld [vmem:[#allocation7 + $0x148] sm:$0xf] }
 0x149   :  { %2112 = vmatmul.bf16.vlgmr.msrb.gmra.mxu0 %v6395_v44  ;;  %v1182_v57 = vpop.f32.mrf.mxu1  ;;  %v4944_v47 = vor.u32 %v5938_v45, %v4941_v46  ;;  %v4723_v54 = vld [vmem:[#allocation7 + $0x188] sm:$0xf]  ;;  %v5917_v46 = vld [vmem:[#allocation7 + $0x294] sm:$0xf0] }
 0x14a   :  { %2208 = vmatpush.bf16.msrb.mxu0 %v4644_v40  ;;  %v5841_v40 = vld [vmem:[#allocation7 + $0x34] sm:$0xf0] }
 0x14b   :  { %v4548_v50 = vor.u32 %v5841_v40, %v4547_v39 }
 0x14c   :  { %2199 = vmatpush.bf16.msra.mxu3 %v4960_v34  ;;  %v5921_v34 = vld [vmem:[#allocation7 + $0x2b4] sm:$0xf0] }
 0x14d   :  { %v4868_v39 = vor.u32 %v5921_v34, %v4867_v32  ;;  %v5961_v32 = vld [vmem:[#allocation7 + $0x3f4] sm:$0xf0]  ;;  %v5879_v34 = vld [vmem:[#allocation7 + $0x16c] sm:$0xf] }
 0x14e   :  { %2209 = vmatpush.bf16.msrb.mxu0 %v4628_v58  ;;  %v1193_v2 = vpop.f32.mrf.mxu2  ;;  %v5885_v58 = vld [vmem:[#allocation7 + $0x194] sm:$0xf0] }
 0x14f   :  { %v1194_v5 = vadd.f32 %v1193_v2, %v1181_v1  ;;  %v1206_v6 = vpop.f32.mrf.mxu3  ;;  %v4928_v1 = vor.u32 %v5934_v59, %v4925_v60  ;;  %v4724_v4 = vor.u32 %v5885_v58, %v4723_v54  ;;  %v4852_v54 = vor.u32 %v5917_v46, %v4851_v43  ;;  %v5913_v59 = vld [vmem:[#allocation7 + $0x274] sm:$0xf0]  ;;  %v5843_v60 = vld [vmem:[#allocation7 + $0x4c] sm:$0xf] }
 0x150   :  { %2200 = vmatpush.bf16.msra.mxu3 %v4944_v47  ;;  %v5847_v47 = vld [vmem:[#allocation7 + $0x6c] sm:$0xf] }
 0x151   :  { %v1207_v11 = vadd.f32 %v1206_v6, %v1194_v5  ;;  %v1219_v12 = vpop.f32.mrf.mxu0  ;;  %v4707_v5 = vld [vmem:[#allocation7 + $0x168] sm:$0xf]  ;;  %v5881_v6 = vld [vmem:[#allocation7 + $0x174] sm:$0xf0] }
 0x152   :  { %2210 = vmatpush.bf16.msrb.mxu0 %v4612_v3  ;;  %v1220_v35 = vadd.f32 %v1219_v12, %v460_v56  ;;  %v4532_v3 = vor.u32 %v5837_v53, %v4531_v52  ;;  %v5859_v12 = vld [vmem:[#allocation7 + $0xcc] sm:$0xf]  ;;  %v4708_v15 = vor.u32 %v5881_v6, %v4707_v5  ;;  %v4883_v56 = vld [vmem:[#allocation7 + $0x2c8] sm:$0xf]  ;;  %v461_v52 = vperm.slane %v6391_v48, 3 }
 0x153   :  { %v1315_v16 = vmul.f32 0.2, %v1207_v11  ;;  %v4760_v6 = vor.u32 %v5891_v63, %v4757_v0  ;;  %v5919_v63 = vld [vmem:[#allocation7 + $0x2ac] sm:$0xf]  ;;  %v4869_v0 = vld [vmem:[#allocation7 + $0x2b8] sm:$0xf0] }
 0x154   :  { %v1232_v17 = vpop.f32.mrf.mxu1  ;;  %2201 = vmatpush.bf16.msra.mxu3 %v4928_v1 }
 0x155   :  { %v1319_v21 = vmax.f32 %v1207_v11, %v1315_v16  ;;  %v1233_v49 = vadd.f32 %v1232_v17, %v1220_v35  ;;  %v4909_v11 = vld [vmem:[#allocation7 + $0x310] sm:$0xf0]  ;;  %v5851_v35 = vld [vmem:[#allocation7 + $0x8c] sm:$0xf] }
 0x156   :  { %2211 = vmatpush.bf16.msrb.mxu0 %v4596_v13  ;;  %v1195_v22 = vpop.f32.mrf.mxu2  ;;  %v4629_v13 = vld [vmem:[#allocation7 + $0xd8] sm:$0xf0]  ;;  %v4912_v33 = vor.u32 %v5930_v10, %v4909_v11  ;;  %v5887_v10 = vld [vmem:[#allocation7 + $0x1ac] sm:$0xf] }
 0x157   :  { %v6399_v27 = vpack.c.bf16 %v1319_v21, %v1319_v21  ;;  %v1208_v29 = vpop.f32.mrf.mxu3  ;;  %v4632_v19 = vor.u32 %v5859_v12, %v4629_v13  ;;  %v5877_v21 = vld [vmem:[#allocation7 + $0x154] sm:$0xf0]  ;;  %v4741_v11 = vld [vmem:[#allocation7 + $0x1b8] sm:$0xf0] }
 0x158   :  { %2202 = vmatpush.bf16.msra.mxu3 %v4912_v33  ;;  %v4692_v25 = vor.u32 %v5877_v21, %v4691_v20  ;;  %v4533_v20 = vld [vmem:[#allocation7 + $0x18] sm:$0xf0]  ;;  %v5883_v21 = vld [vmem:[#allocation7 + $0x18c] sm:$0xf] }
 0x159   :  { %2125 = vmatmul.bf16.vlgmr.msrb.gmra.mxu1 %v6399_v27  ;;  %2164 = vmatmul.bf16.vlgmr.msra.gmra.mxu0 %v6395_v44  ;;  %v1221_v36 = vpop.f32.mrf.mxu0 }
 0x15a   :  { %2212 = vmatpush.bf16.msrb.mxu0 %v4580_v62  ;;  %2221 = vmatpush.bf16.msrb.mxu1 %v4772_v23  ;;  %v5925_v62 = vld [vmem:[#allocation7 + $0x2d4] sm:$0xf0]  ;;  %v5855_v23 = vld [vmem:[#allocation7 + $0xac] sm:$0xf]  ;;  %v4597_v36 = vld [vmem:[#allocation7 + $0x98] sm:$0xf0] }
 0x15b   :  { %v4884_v26 = vor.u32 %v5925_v62, %v4883_v56  ;;  %v4616_v29 = vor.u32 %v5855_v23, %v4613_v24  ;;  %v4600_v40 = vor.u32 %v5851_v35, %v4597_v36  ;;  %v4725_v56 = vld [vmem:[#allocation7 + $0x198] sm:$0xf0]  ;;  %v5927_v36 = vld [vmem:[#allocation7 + $0x2ec] sm:$0xf] }
 0x15c   :  { %v1234_v42 = vpop.f32.mrf.mxu1  ;;  %v4709_v35 = vld [vmem:[#allocation7 + $0x178] sm:$0xf0] }
 0x15d   :  { %v5869_v42 = vld [vmem:[#allocation7 + $0x114] sm:$0xf0] }
 0x15e   :  { %2213 = vmatpush.bf16.msrb.mxu0 %v4564_v37  ;;  %2222 = vmatpush.bf16.msrb.mxu1 %v4756_v38  ;;  %v1245_v55 = vpop.f32.mrf.mxu2  ;;  %v4676_v37 = vor.u32 %v5873_v31, %v4675_v30  ;;  %v4660_v53 = vor.u32 %v5869_v42, %v4659_v41  ;;  %v4728_v31 = vor.u32 %v5883_v21, %v4725_v56  ;;  %v4931_v21 = vld [vmem:[#allocation7 + $0x328] sm:$0xf]  ;;  %v5937_v56 = vld [vmem:[#allocation7 + $0x334] sm:$0xf0] }
 0x15f   :  { %v1258_v57 = vpop.f32.mrf.mxu3  ;;  %v1246_v61 = vadd.f32 %v1245_v55, %v1233_v49  ;;  %v4581_v49 = vld [vmem:[#allocation7 + $0x78] sm:$0xf0] }
 0x160   :  { %v4584_v55 = vor.u32 %v5847_v47, %v4581_v49  ;;  %v5011_v47 = vld [vmem:[#allocation7 + $0x3c8] sm:$0xf]  ;;  %v5957_v49 = vld [vmem:[#allocation7 + $0x3d4] sm:$0xf0] }
 0x161   :  { %v1259_v2 = vadd.f32 %v1258_v57, %v1246_v61  ;;  %v4835_v57 = vld [vmem:[#allocation7 + $0x268] sm:$0xf]  ;;  %v4565_v61 = vld [vmem:[#allocation7 + $0x58] sm:$0xf0] }
 0x162   :  { %2214 = vmatpush.bf16.msrb.mxu0 %v4548_v50  ;;  %2223 = vmatpush.bf16.msrb.mxu1 %v4740_v51  ;;  %v5895_v50 = vld [vmem:[#allocation7 + $0x1ec] sm:$0xf]  ;;  %v4773_v51 = vld [vmem:[#allocation7 + $0x1f8] sm:$0xf0]  ;;  %v4568_v48 = vor.u32 %v5843_v60, %v4565_v61 }
 0x163   :  { %v1316_v28 = vmul.f32 0.2, %v1259_v2  ;;  %v4776_v58 = vor.u32 %v5895_v50, %v4773_v51  ;;  %v5875_v50 = vld [vmem:[#allocation7 + $0x14c] sm:$0xf]  ;;  %v4693_v51 = vld [vmem:[#allocation7 + $0x158] sm:$0xf0] }
 0x164   :  { %v5871_v60 = vld [vmem:[#allocation7 + $0x12c] sm:$0xf]  ;;  %v4677_v61 = vld [vmem:[#allocation7 + $0x138] sm:$0xf0] }
 0x165   :  { %v1320_v14 = vmax.f32 %v1259_v2, %v1316_v28 }
 0x166   :  { %2215 = vmatpush.bf16.msrb.mxu0 %v4532_v3  ;;  %2224 = vmatpush.bf16.msrb.mxu1 %v4724_v4  ;;  %v1247_v16 = vpop.f32.mrf.mxu2  ;;  %v4836_v3 = vor.u32 %v5913_v59, %v4835_v57  ;;  %v4819_v4 = vld [vmem:[#allocation7 + $0x248] sm:$0xf]  ;;  %v5953_v59 = vld [vmem:[#allocation7 + $0x3b4] sm:$0xf0] }
 0x167   :  { %v1260_v17 = vpop.f32.mrf.mxu3  ;;  %v6403_v22 = vpack.c.bf16 %v1320_v14, %v1320_v14  ;;  %v4820_v13 = vor.u32 %v5909_v7, %v4819_v4  ;;  %v4803_v14 = vld [vmem:[#allocation7 + $0x228] sm:$0xf]  ;;  %v5867_v4 = vld [vmem:[#allocation7 + $0x10c] sm:$0xf]  ;;  %v4853_v7 = vld [vmem:[#allocation7 + $0x298] sm:$0xf0] }
 0x168   :  { %v4744_v17 = vor.u32 %v5887_v10, %v4741_v11  ;;  %v4963_v11 = vld [vmem:[#allocation7 + $0x368] sm:$0xf] }
 0x169   :  { %2177 = vmatmul.bf16.vlgmr.msra.gmra.mxu1 %v6399_v27  ;;  %2216 = vmatmul.bf16.vlgmr.msrb.gmra.mxu0 %v6395_v44 }
 0x16a   :  { %2260 = vmatpush.bf16.msra.mxu0 %v4648_v8  ;;  %2138 = vmatmul.bf16.vlgmr.msrb.gmra.mxu2 %v6403_v22  ;;  %v5839_v8 = vld [vmem:[#allocation7 + $0x2c] sm:$0xf] }
 0x16b   :  { %2225 = vmatpush.bf16.msrb.mxu1 %v4708_v15  ;;  %2234 = vmatpush.bf16.msrb.mxu2 %v4900_v18  ;;  %v4552_v33 = vor.u32 %v5839_v8, %v4549_v9  ;;  %v5905_v18 = vld [vmem:[#allocation7 + $0x234] sm:$0xf0] }
 0x16c   :  { %v4804_v23 = vor.u32 %v5905_v18, %v4803_v14  ;;  %v4821_v18 = vld [vmem:[#allocation7 + $0x258] sm:$0xf0] }
 0x16e   :  { %2261 = vmatpush.bf16.msra.mxu0 %v4632_v19  ;;  %v5835_v19 = vld [vmem:[#allocation7 + $0xc] sm:$0xf] }
 0x16f   :  { %2226 = vmatpush.bf16.msrb.mxu1 %v4692_v25  ;;  %2235 = vmatpush.bf16.msrb.mxu2 %v4884_v26  ;;  %v4536_v24 = vor.u32 %v5835_v19, %v4533_v20  ;;  %v4787_v25 = vld [vmem:[#allocation7 + $0x208] sm:$0xf]  ;;  %v5901_v26 = vld [vmem:[#allocation7 + $0x214] sm:$0xf0] }
 0x171   :  { %v1271_v38 = vpop.f32.mrf.mxu0 }
 0x172   :  { %2262 = vmatpush.bf16.msra.mxu0 %v4616_v29  ;;  %v1272_v1 = vadd.f32 %v1271_v38, %v461_v52  ;;  %v5027_v29 = vld [vmem:[#allocation7 + $0x3e8] sm:$0xf]  ;;  %v5923_v52 = vld [vmem:[#allocation7 + $0x2cc] sm:$0xf] }
 0x173   :  { %2227 = vmatpush.bf16.msrb.mxu1 %v4676_v37  ;;  %2236 = vmatpush.bf16.msrb.mxu2 %v4868_v39  ;;  %v4901_v37 = vld [vmem:[#allocation7 + $0x2f8] sm:$0xf0]  ;;  %v5028_v41 = vor.u32 %v5961_v32, %v5027_v29  ;;  %v5933_v29 = vld [vmem:[#allocation7 + $0x314] sm:$0xf0]  ;;  %v5959_v32 = vld [vmem:[#allocation7 + $0x3ec] sm:$0xf] }
 0x174   :  { %v1284_v45 = vpop.f32.mrf.mxu1  ;;  %v4904_v46 = vor.u32 %v5927_v36, %v4901_v37  ;;  %v5955_v37 = vld [vmem:[#allocation7 + $0x3cc] sm:$0xf] }
 0x175   :  { %v1285_v28 = vadd.f32 %v1284_v45, %v1272_v1  ;;  %v4712_v45 = vor.u32 %v5879_v34, %v4709_v35  ;;  %v5029_v34 = vld [vmem:[#allocation7 + $0x3f8] sm:$0xf0] }
 0x176   :  { %2263 = vmatpush.bf16.msra.mxu0 %v4600_v40  ;;  %v4788_v40 = vor.u32 %v5901_v26, %v4787_v25  ;;  %v4915_v26 = vld [vmem:[#allocation7 + $0x308] sm:$0xf]  ;;  %v5032_v36 = vor.u32 %v5959_v32, %v5029_v34  ;;  %v5997_v32 = vld [vmem:[#allocation8 + $0x11c] sm:$0xf]  ;;  %v5177_v34 = vld [vmem:[#allocation8 + $0x12c] sm:$0xf0] }
 0x177   :  { %2228 = vmatpush.bf16.msrb.mxu1 %v4660_v53  ;;  %2237 = vmatpush.bf16.msrb.mxu2 %v4852_v54  ;;  %v4885_v53 = vld [vmem:[#allocation7 + $0x2d8] sm:$0xf0]  ;;  %v5012_v54 = vor.u32 %v5957_v49, %v5011_v47  ;;  %v4916_v35 = vor.u32 %v5933_v29, %v4915_v26  ;;  %v5943_v49 = vld [vmem:[#allocation7 + $0x36c] sm:$0xf]  ;;  %v5275_v26 = vld [vmem:[#allocation8 + $0x1e0] sm:$0xf] }
 0x178   :  { %v4888_v57 = vor.u32 %v5923_v52, %v4885_v53  ;;  %v5939_v52 = vld [vmem:[#allocation7 + $0x34c] sm:$0xf]  ;;  %v4949_v53 = vld [vmem:[#allocation7 + $0x358] sm:$0xf0]  ;;  %v6024_v29 = vld [vmem:[#allocation8 + $0x1f0] sm:$0xf0] }
 0x179   :  { %v1273_v2 = vpop.f32.mrf.mxu0 }
 0x17a   :  { %2264 = vmatpush.bf16.msra.mxu0 %v4584_v55  ;;  %2229 = vmatmul.bf16.vlgmr.msrb.gmra.mxu1 %v6399_v27  ;;  %v4696_v55 = vor.u32 %v5875_v50, %v4693_v51  ;;  %v4872_v2 = vor.u32 %v5919_v63, %v4869_v0  ;;  %v4965_v50 = vld [vmem:[#allocation7 + $0x378] sm:$0xf0]  ;;  %v5931_v0 = vld [vmem:[#allocation7 + $0x30c] sm:$0xf] }
 0x17b   :  { %2273 = vmatpush.bf16.msra.mxu1 %v4776_v58  ;;  %2190 = vmatmul.bf16.vlgmr.msra.gmra.mxu2 %v6403_v22  ;;  %v4995_v58 = vld [vmem:[#allocation7 + $0x3a8] sm:$0xf]  ;;  %v4968_v51 = vor.u32 %v5943_v49, %v4965_v50  ;;  %v5235_v49 = vld [vmem:[#allocation8 + $0x190] sm:$0xf]  ;;  %v6014_v50 = vld [vmem:[#allocation8 + $0x1a0] sm:$0xf0] }
 0x17c   :  { %v1286_v5 = vpop.f32.mrf.mxu1  ;;  %2238 = vmatpush.bf16.msrb.mxu2 %v4836_v3  ;;  %v4996_v1 = vor.u32 %v5953_v59, %v4995_v58  ;;  %v4979_v3 = vld [vmem:[#allocation7 + $0x388] sm:$0xf]  ;;  %v5175_v58 = vld [vmem:[#allocation8 + $0x118] sm:$0xf]  ;;  %v5999_v59 = vld [vmem:[#allocation8 + $0x128] sm:$0xf0] }
 0x17d   :  { %v4661_v5 = vld [vmem:[#allocation7 + $0x118] sm:$0xf0] }
 0x17e   :  { %v1297_v12 = vpop.f32.mrf.mxu2  ;;  %2265 = vmatpush.bf16.msra.mxu0 %v4568_v48  ;;  %v5949_v48 = vld [vmem:[#allocation7 + $0x394] sm:$0xf0]  ;;  %v4664_v9 = vor.u32 %v5867_v4, %v4661_v5  ;;  %v5115_v4 = vld [vmem:[#allocation8 + $0xa0] sm:$0xf] }
 0x17f   :  { %v1298_v15 = vadd.f32 %v1297_v12, %v1285_v28  ;;  %v1310_v16 = vpop.f32.mrf.mxu3  ;;  %2274 = vmatpush.bf16.msra.mxu1 %v4760_v6  ;;  %v5915_v6 = vld [vmem:[#allocation7 + $0x28c] sm:$0xf]  ;;  %v4980_v8 = vor.u32 %v5949_v48, %v4979_v3  ;;  %v5945_v28 = vld [vmem:[#allocation7 + $0x374] sm:$0xf0]  ;;  %v5135_v3 = vld [vmem:[#allocation8 + $0xc8] sm:$0xf] }
 0x180   :  { %2239 = vmatpush.bf16.msrb.mxu2 %v4820_v13  ;;  %v4856_v10 = vor.u32 %v5915_v6, %v4853_v7  ;;  %v5911_v12 = vld [vmem:[#allocation7 + $0x26c] sm:$0xf]  ;;  %v4837_v13 = vld [vmem:[#allocation7 + $0x278] sm:$0xf0]  ;;  %v5984_v6 = vld [vmem:[#allocation8 + $0xb0] sm:$0xf0] }
 0x181   :  { %v1311_v62 = vadd.f32 %v1310_v16, %v1298_v15  ;;  %v4840_v14 = vor.u32 %v5911_v12, %v4837_v13  ;;  %v4947_v15 = vld [vmem:[#allocation7 + $0x348] sm:$0xf]  ;;  %v5941_v16 = vld [vmem:[#allocation7 + $0x354] sm:$0xf0]  ;;  %v5989_v48 = vld [vmem:[#allocation8 + $0xd8] sm:$0xf0]  ;;  %v5116_v7 = vor.u32 %v5984_v6, %v5115_v4 }
 0x182   :  { %2266 = vmatpush.bf16.msra.mxu0 %v4552_v33  ;;  %v4964_v33 = vor.u32 %v5945_v28, %v4963_v11  ;;  %v4948_v19 = vor.u32 %v5941_v16, %v4947_v15  ;;  %v5136_v5 = vor.u32 %v5989_v48, %v5135_v3  ;;  %v5335_v11 = vld [vmem:[#allocation8 + $0x258] sm:$0xf]  ;;  %v6039_v12 = vld [vmem:[#allocation8 + $0x268] sm:$0xf0]  ;;  %v5075_v13 = vld [vmem:[#allocation8 + $0x50] sm:$0xf] }
 0x183   :  { %v1317_v30 = vmul.f32 0.2, %v1311_v62  ;;  %2275 = vmatpush.bf16.msra.mxu1 %v4744_v17  ;;  %v5907_v17 = vld [vmem:[#allocation7 + $0x24c] sm:$0xf]  ;;  %v5315_v15 = vld [vmem:[#allocation8 + $0x230] sm:$0xf] }
 0x184   :  { %2240 = vmatpush.bf16.msrb.mxu2 %v4804_v23  ;;  %v4824_v20 = vor.u32 %v5907_v17, %v4821_v18  ;;  %v4805_v23 = vld [vmem:[#allocation7 + $0x238] sm:$0xf0]  ;;  %v6034_v16 = vld [vmem:[#allocation8 + $0x240] sm:$0xf0]  ;;  %v5195_v4 = vld [vmem:[#allocation8 + $0x140] sm:$0xf] }
 0x185   :  { %v1321_v38 = vmax.f32 %v1311_v62, %v1317_v30  ;;  %v5903_v62 = vld [vmem:[#allocation7 + $0x22c] sm:$0xf]  ;;  %v5316_v18 = vor.u32 %v6034_v16, %v5315_v15  ;;  %v5435_v6 = vld [vmem:[#allocation8 + $0x320] sm:$0xf]  ;;  %v5415_v15 = vld [vmem:[#allocation8 + $0x2f8] sm:$0xf] }
 0x186   :  { %v1299_v39 = vpop.f32.mrf.mxu2  ;;  %2267 = vmatpush.bf16.msra.mxu0 %v4536_v24  ;;  %v4932_v24 = vor.u32 %v5937_v56, %v4931_v21  ;;  %v4808_v25 = vor.u32 %v5903_v62, %v4805_v23  ;;  %v5899_v30 = vld [vmem:[#allocation7 + $0x20c] sm:$0xf]  ;;  %v5295_v21 = vld [vmem:[#allocation8 + $0x208] sm:$0xf]  ;;  %v6029_v62 = vld [vmem:[#allocation8 + $0x218] sm:$0xf0] }
 0x187   :  { %v6411_v42 = vpack.c.bf16 %v1321_v38, %v1321_v38  ;;  %v1312_v43 = vpop.f32.mrf.mxu3  ;;  %2276 = vmatpush.bf16.msra.mxu1 %v4728_v31  ;;  %v4789_v31 = vld [vmem:[#allocation7 + $0x218] sm:$0xf0]  ;;  %v5035_v23 = vld [vmem:[#allocation8] sm:$0xf]  ;;  %v6059_v16 = vld [vmem:[#allocation8 + $0x308] sm:$0xf0] }
 0x188   :  { %2241 = vmatpush.bf16.msrb.mxu2 %v4788_v40  ;;  %v5013_v38 = vld [vmem:[#allocation7 + $0x3d8] sm:$0xf0]  ;;  %v5951_v40 = vld [vmem:[#allocation7 + $0x3ac] sm:$0xf] }
 0x189   :  { %2151 = vmatmul.bf16.vlgmr.msrb.gmra.mxu3 %v6411_v42  ;;  %2268 = vmatmul.bf16.vlgmr.msra.gmra.mxu0 %v6395_v44  ;;  %v4680_v44 = vor.u32 %v5871_v60, %v4677_v61  ;;  %v5016_v39 = vor.u32 %v5955_v37, %v5013_v38  ;;  %v5176_v60 = vor.u32 %v5999_v59, %v5175_v58  ;;  %v5994_v61 = vld [vmem:[#allocation8 + $0x100] sm:$0xf0]  ;;  %v5255_v37 = vld [vmem:[#allocation8 + $0x1b8] sm:$0xf]  ;;  %v6019_v38 = vld [vmem:[#allocation8 + $0x1c8] sm:$0xf0] }
 0x18a   :  { %2247 = vmatpush.bf16.msrb.mxu3 %v5028_v41  ;;  %v4997_v41 = vld [vmem:[#allocation7 + $0x3b8] sm:$0xf0] }
 0x18b   :  { %2277 = vmatpush.bf16.msra.mxu1 %v4712_v45  ;;  %2242 = vmatmul.bf16.vlgmr.msrb.gmra.mxu2 %v6403_v22  ;;  %v5000_v43 = vor.u32 %v5951_v40, %v4997_v41  ;;  %v5947_v45 = vld [vmem:[#allocation7 + $0x38c] sm:$0xf]  ;;  %v5256_v40 = vor.u32 %v6019_v38, %v5255_v37 }
 0x18c   :  { %2286 = vmatpush.bf16.msra.mxu2 %v4904_v46  ;;  %v4981_v46 = vld [vmem:[#allocation7 + $0x398] sm:$0xf0]  ;;  %3360 = vmatpush.bf16.msrb.mxu0 %v5176_v60  ;;  %v6079_v41 = vld [vmem:[#allocation8 + $0x3a8] sm:$0xf0] }
 0x18d   :  { %v4984_v47 = vor.u32 %v5947_v45, %v4981_v46  ;;  %v5157_v45 = vld [vmem:[#allocation8 + $0x104] sm:$0xf0] }
 0x18e   :  { %2248 = vmatpush.bf16.msrb.mxu3 %v5012_v54  ;;  %v4952_v54 = vor.u32 %v5939_v52, %v4949_v53  ;;  %v6074_v52 = vld [vmem:[#allocation8 + $0x380] sm:$0xf0]  ;;  %v5236_v53 = vor.u32 %v6014_v50, %v5235_v49  ;;  %v5277_v50 = vld [vmem:[#allocation8 + $0x1f4] sm:$0xf0] }
 0x18f   :  { %2278 = vmatpush.bf16.msra.mxu1 %v4696_v55  ;;  %v5935_v55 = vld [vmem:[#allocation7 + $0x32c] sm:$0xf] }
 0x190   :  { %2287 = vmatpush.bf16.msra.mxu2 %v4888_v57  ;;  %v4933_v57 = vld [vmem:[#allocation7 + $0x338] sm:$0xf0] }
 0x191   :  { %v4936_v63 = vor.u32 %v5935_v55, %v4933_v57  ;;  %v5987_v55 = vld [vmem:[#allocation8 + $0xcc] sm:$0xf]  ;;  %v5137_v57 = vld [vmem:[#allocation8 + $0xdc] sm:$0xf0] }
 0x192   :  { %2249 = vmatpush.bf16.msrb.mxu3 %v4996_v1  ;;  %v4917_v1 = vld [vmem:[#allocation7 + $0x318] sm:$0xf0]  ;;  %v5140_v58 = vor.u32 %v5987_v55, %v5137_v57  ;;  %v6119_v57 = vld [vmem:[#allocation8 + $0x4e8] sm:$0xf0] }
 0x193   :  { %2279 = vmatpush.bf16.msra.mxu1 %v4680_v44 }
 0x194   :  { %2288 = vmatpush.bf16.msra.mxu2 %v4872_v2  ;;  %v4920_v2 = vor.u32 %v5931_v0, %v4917_v1  ;;  %v6069_v1 = vld [vmem:[#allocation8 + $0x358] sm:$0xf0] }
 0x196   :  { %2250 = vmatpush.bf16.msrb.mxu3 %v4980_v8 }
 0x197   :  { %2280 = vmatpush.bf16.msra.mxu1 %v4664_v9  ;;  %v5095_v9 = vld [vmem:[#allocation8 + $0x78] sm:$0xf] }
 0x198   :  { %2289 = vmatpush.bf16.msra.mxu2 %v4856_v10  ;;  %v5979_v10 = vld [vmem:[#allocation8 + $0x88] sm:$0xf0] }
 0x199   :  { %2203 = vmatmul.bf16.vlgmr.msra.gmra.mxu3 %v6411_v42  ;;  %v5096_v28 = vor.u32 %v5979_v10, %v5095_v9  ;;  %v6064_v9 = vld [vmem:[#allocation8 + $0x330] sm:$0xf0]  ;;  %v5977_v10 = vld [vmem:[#allocation8 + $0x7c] sm:$0xf] }
 0x19a   :  { %2251 = vmatpush.bf16.msrb.mxu3 %v4964_v33  ;;  %2281 = vmatmul.bf16.vlgmr.msra.gmra.mxu1 %v6399_v27  ;;  %v4792_v27 = vor.u32 %v5899_v30, %v4789_v31  ;;  %v5336_v33 = vor.u32 %v6039_v12, %v5335_v11  ;;  %v5276_v31 = vor.u32 %v6024_v29, %v5275_v26  ;;  %v5097_v11 = vld [vmem:[#allocation8 + $0x8c] sm:$0xf0]  ;;  %v5967_v29 = vld [vmem:[#allocation8 + $0x2c] sm:$0xf] }
 0x19b   :  { %v5100_v12 = vor.u32 %v5977_v10, %v5097_v11  ;;  %v5615_v11 = vld [vmem:[#allocation8 + $0x488] sm:$0xf] }
 0x19c   :  { %2290 = vmatpush.bf16.msra.mxu2 %v4840_v14  ;;  %v5974_v14 = vld [vmem:[#allocation8 + $0x60] sm:$0xf0]  ;;  %3373 = vmatpush.bf16.msrb.mxu1 %v5336_v33  ;;  %v5337_v33 = vld [vmem:[#allocation8 + $0x26c] sm:$0xf0] }
 0x19d   :  { %v5076_v17 = vor.u32 %v5974_v14, %v5075_v13  ;;  %v6037_v13 = vld [vmem:[#allocation8 + $0x25c] sm:$0xf] }
 0x19e   :  { %2252 = vmatpush.bf16.msrb.mxu3 %v4948_v19  ;;  %v5340_v14 = vor.u32 %v6037_v13, %v5337_v33  ;;  %v6007_v13 = vld [vmem:[#allocation8 + $0x16c] sm:$0xf]  ;;  %v5217_v33 = vld [vmem:[#allocation8 + $0x17c] sm:$0xf0] }
 0x1a0   :  { %2291 = vmatpush.bf16.msra.mxu2 %v4824_v20  ;;  %3374 = vmatpush.bf16.msrb.mxu1 %v5316_v18  ;;  %v5969_v20 = vld [vmem:[#allocation8 + $0x38] sm:$0xf0] }
 0x1a2   :  { %2253 = vmatpush.bf16.msrb.mxu3 %v4932_v24  ;;  %v5964_v24 = vld [vmem:[#allocation8 + $0x10] sm:$0xf0] }
 0x1a3   :  { %v5036_v30 = vor.u32 %v5964_v24, %v5035_v23  ;;  %v5395_v24 = vld [vmem:[#allocation8 + $0x2d0] sm:$0xf] }
 0x1a4   :  { %2292 = vmatpush.bf16.msra.mxu2 %v4808_v25  ;;  %v5296_v25 = vor.u32 %v6029_v62, %v5295_v21  ;;  %v6032_v21 = vld [vmem:[#allocation8 + $0x234] sm:$0xf]  ;;  %v5317_v62 = vld [vmem:[#allocation8 + $0x244] sm:$0xf0] }
 0x1a5   :  { %v5320_v23 = vor.u32 %v6032_v21, %v5317_v62  ;;  %v6104_v62 = vld [vmem:[#allocation8 + $0x470] sm:$0xf0] }
 0x1a6   :  { %2254 = vmatpush.bf16.msrb.mxu3 %v4916_v35  ;;  %3375 = vmatpush.bf16.msrb.mxu1 %v5296_v25  ;;  %v5180_v35 = vor.u32 %v5997_v32, %v5177_v34  ;;  %v6054_v25 = vld [vmem:[#allocation8 + $0x2e0] sm:$0xf0]  ;;  %v5297_v34 = vld [vmem:[#allocation8 + $0x21c] sm:$0xf0] }
 0x1a7   :  { %v5396_v26 = vor.u32 %v6054_v25, %v5395_v24  ;;  %v6002_v24 = vld [vmem:[#allocation8 + $0x144] sm:$0xf]  ;;  %v5197_v25 = vld [vmem:[#allocation8 + $0x154] sm:$0xf0] }
 0x1a8   :  { %2293 = vmatpush.bf16.msra.mxu2 %v4792_v27 }
 0x1a9   :  { %2255 = vmatmul.bf16.vlgmr.msrb.gmra.mxu3 %v6411_v42 }
 0x1aa   :  { %2299 = vmatpush.bf16.msra.mxu3 %v5032_v36  ;;  %3376 = vmatpush.bf16.msrb.mxu1 %v5276_v31  ;;  %v6027_v31 = vld [vmem:[#allocation8 + $0x20c] sm:$0xf] }
 0x1ab   :  { %2294 = vmatmul.bf16.vlgmr.msra.gmra.mxu2 %v6403_v22  ;;  %v5155_v22 = vld [vmem:[#allocation8 + $0xf0] sm:$0xf]  ;;  %v5300_v37 = vor.u32 %v6027_v31, %v5297_v34  ;;  %v5437_v31 = vld [vmem:[#allocation8 + $0x334] sm:$0xf0] }
 0x1ac   :  { %v5156_v44 = vor.u32 %v5994_v61, %v5155_v22  ;;  %v5215_v22 = vld [vmem:[#allocation8 + $0x168] sm:$0xf]  ;;  %v6009_v61 = vld [vmem:[#allocation8 + $0x178] sm:$0xf0]  ;;  %v5575_v34 = vld [vmem:[#allocation8 + $0x438] sm:$0xf] }
 0x1ad   :  { %v5216_v0 = vor.u32 %v6009_v61, %v5215_v22  ;;  %v6077_v61 = vld [vmem:[#allocation8 + $0x39c] sm:$0xf] }
 0x1ae   :  { %2300 = vmatpush.bf16.msra.mxu3 %v5016_v39  ;;  %3361 = vmatpush.bf16.msrb.mxu0 %v5156_v44  ;;  %v5495_v39 = vld [vmem:[#allocation8 + $0x398] sm:$0xf]  ;;  %v5982_v44 = vld [vmem:[#allocation8 + $0xa4] sm:$0xf] }
 0x1af   :  { %v5496_v46 = vor.u32 %v6079_v41, %v5495_v39  ;;  %3377 = vmatpush.bf16.msrb.mxu1 %v5256_v40  ;;  %v5375_v40 = vld [vmem:[#allocation8 + $0x2a8] sm:$0xf]  ;;  %v6049_v41 = vld [vmem:[#allocation8 + $0x2b8] sm:$0xf0] }
 0x1b1   :  { %3386 = vmatpush.bf16.msrb.mxu2 %v5496_v46  ;;  %v5037_v46 = vld [vmem:[#allocation8 + $0x14] sm:$0xf0] }
 0x1b2   :  { %2301 = vmatpush.bf16.msra.mxu3 %v5000_v43  ;;  %3362 = vmatpush.bf16.msrb.mxu0 %v5136_v5  ;;  %v5992_v43 = vld [vmem:[#allocation8 + $0xf4] sm:$0xf] }
 0x1b3   :  { %3378 = vmatpush.bf16.msrb.mxu1 %v5236_v53  ;;  %v6004_v5 = vld [vmem:[#allocation8 + $0x150] sm:$0xf0] }
 0x1b4   :  { %v6044_v53 = vld [vmem:[#allocation8 + $0x290] sm:$0xf0] }
 0x1b6   :  { %2302 = vmatpush.bf16.msra.mxu3 %v4984_v47  ;;  %3363 = vmatpush.bf16.msrb.mxu0 %v5116_v7  ;;  %v5160_v47 = vor.u32 %v5992_v43, %v5157_v45  ;;  %v5196_v7 = vor.u32 %v6004_v5, %v5195_v4  ;;  %v5376_v43 = vor.u32 %v6049_v41, %v5375_v40  ;;  %v5962_v45 = vld [vmem:[#allocation8 + $0x4] sm:$0xf]  ;;  %v6012_v4 = vld [vmem:[#allocation8 + $0x194] sm:$0xf]  ;;  %v5237_v5 = vld [vmem:[#allocation8 + $0x1a4] sm:$0xf0] }
 0x1b7   :  { %3379 = vmatpush.bf16.msrb.mxu1 %v5216_v0  ;;  %v5040_v49 = vor.u32 %v5962_v45, %v5037_v46  ;;  %v6057_v40 = vld [vmem:[#allocation8 + $0x2fc] sm:$0xf]  ;;  %v5417_v41 = vld [vmem:[#allocation8 + $0x30c] sm:$0xf0] }
 0x1b8   :  { %v5420_v45 = vor.u32 %v6057_v40, %v5417_v41  ;;  %v5617_v40 = vld [vmem:[#allocation8 + $0x49c] sm:$0xf0] }
 0x1ba   :  { %2303 = vmatpush.bf16.msra.mxu3 %v4968_v51  ;;  %3364 = vmatpush.bf16.msrb.mxu0 %v5096_v28  ;;  %v5475_v51 = vld [vmem:[#allocation8 + $0x370] sm:$0xf]  ;;  %v5436_v28 = vor.u32 %v6064_v9, %v5435_v6  ;;  %v6072_v6 = vld [vmem:[#allocation8 + $0x374] sm:$0xf]  ;;  %v5477_v9 = vld [vmem:[#allocation8 + $0x384] sm:$0xf0] }
 0x1bb   :  { %3380 = vmatpush.bf16.msrb.mxu1 %v5196_v7  ;;  %v5240_v7 = vor.u32 %v6012_v4, %v5237_v5  ;;  %v5480_v10 = vor.u32 %v6072_v6, %v5477_v9  ;;  %v5515_v4 = vld [vmem:[#allocation8 + $0x3c0] sm:$0xf]  ;;  %v6084_v5 = vld [vmem:[#allocation8 + $0x3d0] sm:$0xf0]  ;;  %v6042_v9 = vld [vmem:[#allocation8 + $0x284] sm:$0xf] }
 0x1be   :  { %2304 = vmatpush.bf16.msra.mxu3 %v4952_v54  ;;  %3365 = vmatpush.bf16.msrb.mxu0 %v5076_v17  ;;  %v5476_v54 = vor.u32 %v6074_v52, %v5475_v51  ;;  %v5355_v52 = vld [vmem:[#allocation8 + $0x280] sm:$0xf] }
 0x1bf   :  { %3425 = vmatpush.bf16.msra.mxu1 %v5340_v14  ;;  %v5356_v55 = vor.u32 %v6044_v53, %v5355_v52  ;;  %v6067_v14 = vld [vmem:[#allocation8 + $0x34c] sm:$0xf]  ;;  %v6052_v52 = vld [vmem:[#allocation8 + $0x2d4] sm:$0xf]  ;;  %v5397_v53 = vld [vmem:[#allocation8 + $0x2e4] sm:$0xf0] }
 0x1c0   :  { %3387 = vmatpush.bf16.msrb.mxu2 %v5476_v54  ;;  %v5655_v54 = vld [vmem:[#allocation8 + $0x4d8] sm:$0xf] }
 0x1c2   :  { %2305 = vmatpush.bf16.msra.mxu3 %v4936_v63  ;;  %v5455_v63 = vld [vmem:[#allocation8 + $0x348] sm:$0xf] }
 0x1c3   :  { %v5456_v3 = vor.u32 %v6069_v1, %v5455_v63  ;;  %3426 = vmatpush.bf16.msra.mxu1 %v5320_v23  ;;  %v5497_v63 = vld [vmem:[#allocation8 + $0x3ac] sm:$0xf0] }
 0x1c4   :  { %v5500_v1 = vor.u32 %v6077_v61, %v5497_v63  ;;  %v6047_v61 = vld [vmem:[#allocation8 + $0x2ac] sm:$0xf] }
 0x1c5   :  { %3388 = vmatpush.bf16.msrb.mxu2 %v5456_v3  ;;  %v6114_v3 = vld [vmem:[#allocation8 + $0x4c0] sm:$0xf0] }
 0x1c6   :  { %2306 = vmatpush.bf16.msra.mxu3 %v4920_v2  ;;  %v6421_v8 = vpop.f32.mrf.mxu0  ;;  %v5117_v2 = vld [vmem:[#allocation8 + $0xb4] sm:$0xf0] }
 0x1c7   :  { %v5120_v48 = vor.u32 %v5982_v44, %v5117_v2  ;;  %3427 = vmatpush.bf16.msra.mxu1 %v5300_v37  ;;  %v5635_v2 = vld [vmem:[#allocation8 + $0x4b0] sm:$0xf]  ;;  %v6099_v37 = vld [vmem:[#allocation8 + $0x448] sm:$0xf0] }
 0x1c9   :  { %2307 = vmatmul.bf16.vlgmr.msra.gmra.mxu3 %v6411_v42  ;;  %v5055_v42 = vld [vmem:[#allocation8 + $0x28] sm:$0xf]  ;;  %3389 = vmatpush.bf16.msrb.mxu2 %v5436_v28  ;;  %v6109_v28 = vld [vmem:[#allocation8 + $0x498] sm:$0xf0] }
 0x1ca   :  { %v5056_v56 = vor.u32 %v5969_v20, %v5055_v42  ;;  %v5972_v42 = vld [vmem:[#allocation8 + $0x54] sm:$0xf]  ;;  %v5077_v20 = vld [vmem:[#allocation8 + $0x64] sm:$0xf0] }
 0x1cc   :  { %3366 = vmatpush.bf16.msrb.mxu0 %v5056_v56  ;;  %v5080_v56 = vor.u32 %v5972_v42, %v5077_v20 }
 0x1ce   :  { %v2115_v19 = vpop.f32.mrf.mxu0 }
 0x1cf   :  { %v5416_v19 = vor.u32 %v6059_v16, %v5415_v15  ;;  %v5220_v15 = vor.u32 %v6007_v13, %v5217_v33  ;;  %v5457_v16 = vld [vmem:[#allocation8 + $0x35c] sm:$0xf0]  ;;  %v5995_v13 = vld [vmem:[#allocation8 + $0x108] sm:$0xf0] }
 0x1d0   :  { %3367 = vmatpush.bf16.msrb.mxu0 %v5036_v30  ;;  %v5057_v30 = vld [vmem:[#allocation8 + $0x3c] sm:$0xf0]  ;;  %v5460_v20 = vor.u32 %v6067_v14, %v5457_v16  ;;  %v5657_v14 = vld [vmem:[#allocation8 + $0x4ec] sm:$0xf0] }
 0x1d1   :  { %3390 = vmatpush.bf16.msrb.mxu2 %v5416_v19  ;;  %v5060_v32 = vor.u32 %v5967_v29, %v5057_v30  ;;  %v6438_v19 = vld [vmem:[%s6598_s8] sm:$0xf]  ;;  %v5200_v30 = vor.u32 %v6002_v24, %v5197_v25  ;;  %v6112_v24 = vld [vmem:[#allocation8 + $0x4b4] sm:$0xf]  ;;  %v5637_v25 = vld [vmem:[#allocation8 + $0x4c4] sm:$0xf0] }
 0x1d2   :  { %v1456_v29 = vperm.slane %v6438_v19, 0 }
 0x1d4   :  { %3412 = vmatpush.bf16.msra.mxu0 %v5180_v35 }
 0x1d5   :  { %3391 = vmatpush.bf16.msrb.mxu2 %v5396_v26  ;;  %v6062_v26 = vld [vmem:[#allocation8 + $0x324] sm:$0xf] }
 0x1d6   :  { %v6423_v27 = vpop.f32.mrf.mxu1  ;;  %v6425_v36 = vpop.f32.mrf.mxu0 }
 0x1d8   :  { %3413 = vmatpush.bf16.msra.mxu0 %v5160_v47  ;;  %v6022_v47 = vld [vmem:[#allocation8 + $0x1e4] sm:$0xf] }
 0x1d9   :  { %v5280_v51 = vor.u32 %v6022_v47, %v5277_v50  ;;  %3392 = vmatpush.bf16.msrb.mxu2 %v5376_v43  ;;  %v2114_v43 = vadd.f32 %v6421_v8, %v1456_v29  ;;  %v6094_v50 = vld [vmem:[#allocation8 + $0x420] sm:$0xf0]  ;;  %v5640_v29 = vor.u32 %v6112_v24, %v5637_v25  ;;  %v5185_v25 = vld [vmem:[#allocation8 + $0x134] sm:$0xf0] }
 0x1da   :  { %v5998_v24 = vld [vmem:[#allocation8 + $0x124] sm:$0xf] }
 0x1db   :  { %3428 = vmatpush.bf16.msra.mxu1 %v5280_v51  ;;  %v2127_v47 = vadd.f32 %v6423_v27, %v2114_v43  ;;  %v5377_v27 = vld [vmem:[#allocation8 + $0x2bc] sm:$0xf0] }
 0x1dc   :  { %3414 = vmatpush.bf16.msra.mxu0 %v5140_v58  ;;  %v6017_v58 = vld [vmem:[#allocation8 + $0x1bc] sm:$0xf] }
 0x1dd   :  { %3393 = vmatpush.bf16.msrb.mxu2 %v5356_v55  ;;  %v5400_v55 = vor.u32 %v6052_v52, %v5397_v53  ;;  %v6102_v52 = vld [vmem:[#allocation8 + $0x464] sm:$0xf]  ;;  %v5597_v53 = vld [vmem:[#allocation8 + $0x474] sm:$0xf0] }
 0x1de   :  { %v2128_v59 = vpop.f32.mrf.mxu1  ;;  %v2167_v60 = vpop.f32.mrf.mxu0 }
 0x1df   :  { %v5257_v59 = vld [vmem:[#allocation8 + $0x1cc] sm:$0xf0]  ;;  %v5656_v60 = vor.u32 %v6119_v57, %v5655_v54 }
 0x1e0   :  { %3415 = vmatpush.bf16.msra.mxu0 %v5120_v48  ;;  %v5260_v22 = vor.u32 %v6017_v58, %v5257_v59  ;;  %v5636_v48 = vor.u32 %v6114_v3, %v5635_v2  ;;  %v5535_v59 = vld [vmem:[#allocation8 + $0x3e8] sm:$0xf]  ;;  %v5380_v2 = vor.u32 %v6047_v61, %v5377_v27  ;;  %v6035_v61 = vld [vmem:[#allocation8 + $0x248] sm:$0xf0]  ;;  %v6097_v27 = vld [vmem:[#allocation8 + $0x43c] sm:$0xf] }
 0x1e1   :  { %3399 = vmatpush.bf16.msrb.mxu3 %v5656_v60  ;;  %3438 = vmatpush.bf16.msra.mxu2 %v5500_v1  ;;  %v6089_v60 = vld [vmem:[#allocation8 + $0x3f8] sm:$0xf0]  ;;  %v6000_v1 = vld [vmem:[#allocation8 + $0x130] sm:$0xf0] }
 0x1e2   :  { %3429 = vmatpush.bf16.msra.mxu1 %v5260_v22  ;;  %v5536_v22 = vor.u32 %v6089_v60, %v5535_v59  ;;  %v5083_v59 = vld [vmem:[#allocation8 + $0x58] sm:$0xf]  ;;  %v5975_v60 = vld [vmem:[#allocation8 + $0x68] sm:$0xf0] }
 0x1e4   :  { %3416 = vmatpush.bf16.msra.mxu0 %v5100_v12  ;;  %v5616_v12 = vor.u32 %v6109_v28, %v5615_v11  ;;  %v6117_v11 = vld [vmem:[#allocation8 + $0x4dc] sm:$0xf] }
 0x1e5   :  { %3400 = vmatpush.bf16.msrb.mxu3 %v5636_v48  ;;  %3439 = vmatpush.bf16.msra.mxu2 %v5480_v10  ;;  %v1457_v48 = vperm.slane %v6438_v19, 1  ;;  %v5357_v10 = vld [vmem:[#allocation8 + $0x294] sm:$0xf0]  ;;  %v5660_v16 = vor.u32 %v6117_v11, %v5657_v14  ;;  %v5043_v14 = vld [vmem:[#allocation8 + $0x8] sm:$0xf] }
 0x1e6   :  { %v6427_v17 = vpop.f32.mrf.mxu1  ;;  %v6429_v18 = vpop.f32.mrf.mxu0  ;;  %3430 = vmatpush.bf16.msra.mxu1 %v5240_v7  ;;  %v5516_v7 = vor.u32 %v6084_v5, %v5515_v4  ;;  %v5360_v33 = vor.u32 %v6042_v9, %v5357_v10  ;;  %v5970_v4 = vld [vmem:[#allocation8 + $0x40] sm:$0xf0]  ;;  %v5303_v5 = vld [vmem:[#allocation8 + $0x210] sm:$0xf]  ;;  %v6092_v9 = vld [vmem:[#allocation8 + $0x414] sm:$0xf] }
 0x1e7   :  { %v5557_v10 = vld [vmem:[#allocation8 + $0x424] sm:$0xf0] }
 0x1e8   :  { %3417 = vmatpush.bf16.msra.mxu0 %v5080_v56  ;;  %v5595_v56 = vld [vmem:[#allocation8 + $0x460] sm:$0xf]  ;;  %v5560_v11 = vor.u32 %v6092_v9, %v5557_v10  ;;  %v5443_v9 = vld [vmem:[#allocation8 + $0x328] sm:$0xf]  ;;  %v6065_v10 = vld [vmem:[#allocation8 + $0x338] sm:$0xf0] }
 0x1e9   :  { %3401 = vmatpush.bf16.msrb.mxu3 %v5616_v12  ;;  %3440 = vmatpush.bf16.msra.mxu2 %v5460_v20  ;;  %v5596_v23 = vor.u32 %v6104_v62, %v5595_v56  ;;  %v5163_v12 = vld [vmem:[#allocation8 + $0xf8] sm:$0xf]  ;;  %v2166_v56 = vadd.f32 %v6425_v36, %v1457_v48 }
 0x1ea   :  { %3431 = vmatpush.bf16.msra.mxu1 %v5220_v15  ;;  %v5164_v20 = vor.u32 %v5995_v13, %v5163_v12 }
 0x1ec   :  { %3418 = vmatpush.bf16.msra.mxu0 %v5060_v32  ;;  %v5440_v32 = vor.u32 %v6062_v26, %v5437_v31 }
 0x1ed   :  { %v6431_v35 = vpop.f32.mrf.mxu2  ;;  %3402 = vmatpush.bf16.msrb.mxu3 %v5596_v23  ;;  %v5990_v23 = vld [vmem:[#allocation8 + $0xe0] sm:$0xf0] }
 0x1ee   :  { %v2180_v38 = vpop.f32.mrf.mxu1  ;;  %v2219_v39 = vpop.f32.mrf.mxu0  ;;  %3432 = vmatpush.bf16.msra.mxu1 %v5200_v30  ;;  %3441 = vmatpush.bf16.msra.mxu2 %v5440_v32  ;;  %v2140_v54 = vadd.f32 %v6431_v35, %v2127_v47  ;;  %v2179_v30 = vadd.f32 %v6427_v17, %v2166_v56  ;;  %v5123_v32 = vld [vmem:[#allocation8 + $0xa8] sm:$0xf]  ;;  %v5980_v47 = vld [vmem:[#allocation8 + $0x90] sm:$0xf0]  ;;  %v6087_v56 = vld [vmem:[#allocation8 + $0x3ec] sm:$0xf] }
 0x1ef   :  { %v5576_v39 = vor.u32 %v6099_v37, %v5575_v34  ;;  %v5985_v37 = vld [vmem:[#allocation8 + $0xb8] sm:$0xf0] }
 0x1f0   :  { %3419 = vmatpush.bf16.msra.mxu0 %v5040_v49  ;;  %v5555_v49 = vld [vmem:[#allocation8 + $0x410] sm:$0xf] }
 0x1f1   :  { %3403 = vmatpush.bf16.msrb.mxu3 %v5576_v39  ;;  %v5556_v51 = vor.u32 %v6094_v50, %v5555_v49  ;;  %v6107_v39 = vld [vmem:[#allocation8 + $0x48c] sm:$0xf]  ;;  %v5343_v49 = vld [vmem:[#allocation8 + $0x260] sm:$0xf]  ;;  %v6040_v50 = vld [vmem:[#allocation8 + $0x270] sm:$0xf0] }
 0x1f2   :  { %3442 = vmatpush.bf16.msra.mxu2 %v5420_v45  ;;  %v5620_v41 = vor.u32 %v6107_v39, %v5617_v40  ;;  %v5103_v45 = vld [vmem:[#allocation8 + $0x80] sm:$0xf]  ;;  %v6082_v40 = vld [vmem:[#allocation8 + $0x3c4] sm:$0xf] }
 0x1f5   :  { %v2141_v0 = vpop.f32.mrf.mxu2  ;;  %3404 = vmatpush.bf16.msrb.mxu3 %v5556_v51 }
 0x1f6   :  { %3443 = vmatpush.bf16.msra.mxu2 %v5400_v55  ;;  %v5183_v0 = vld [vmem:[#allocation8 + $0x120] sm:$0xf] }
 0x1f7   :  { %v6433_v44 = vpop.f32.mrf.mxu1  ;;  %v5184_v6 = vor.u32 %v6000_v1, %v5183_v0 }
 0x1f9   :  { %3405 = vmatpush.bf16.msrb.mxu3 %v5536_v22 }
 0x1fa   :  { %3444 = vmatpush.bf16.msra.mxu2 %v5380_v2  ;;  %v5084_v2 = vor.u32 %v5975_v60, %v5083_v59 }
 0x1fd   :  { %3406 = vmatpush.bf16.msrb.mxu3 %v5516_v7  ;;  %v6030_v7 = vld [vmem:[#allocation8 + $0x220] sm:$0xf0] }
 0x1fe   :  { %v6440_v42 = vpop.f32.mrf.mxu2  ;;  %3445 = vmatpush.bf16.msra.mxu2 %v5360_v33  ;;  %v5304_v33 = vor.u32 %v6030_v7, %v5303_v5  ;;  %v6005_v7 = vld [vmem:[#allocation8 + $0x158] sm:$0xf0] }
 0x1ff   :  { %v2232_v21 = vpop.f32.mrf.mxu1  ;;  %v2192_v34 = vadd.f32 %v6440_v42, %v2179_v30  ;;  %v1458_v42 = vperm.slane %v6438_v19, 2 }
 0x200   :  { %v5143_v21 = vld [vmem:[#allocation8 + $0xd0] sm:$0xf] }
 0x201   :  { %3451 = vmatpush.bf16.msra.mxu3 %v5660_v16  ;;  %v5144_v31 = vor.u32 %v5990_v23, %v5143_v21  ;;  %v5283_v16 = vld [vmem:[#allocation8 + $0x1e8] sm:$0xf]  ;;  %v6025_v21 = vld [vmem:[#allocation8 + $0x1f8] sm:$0xf0] }
 0x205   :  { %3452 = vmatpush.bf16.msra.mxu3 %v5640_v29 }
 0x206   :  { %v6443_v38 = vpop.f32.mrf.mxu0  ;;  %v2193_v46 = vpop.f32.mrf.mxu2 }
 0x207   :  { %v5124_v46 = vor.u32 %v5985_v37, %v5123_v32  ;;  %v5263_v32 = vld [vmem:[#allocation8 + $0x1c0] sm:$0xf] }
 0x208   :  { %v5503_v37 = vld [vmem:[#allocation8 + $0x3a0] sm:$0xf] }
 0x209   :  { %3453 = vmatpush.bf16.msra.mxu3 %v5620_v41  ;;  %v6080_v41 = vld [vmem:[#allocation8 + $0x3b0] sm:$0xf0] }
 0x20c   :  { %v2152_v57 = vpop.f32.mrf.mxu3 }
 0x20d   :  { %v2153_v58 = vadd.f32 %v2152_v57, %v2140_v54  ;;  %v5600_v54 = vor.u32 %v6102_v52, %v5597_v53  ;;  %v5104_v57 = vor.u32 %v5980_v47, %v5103_v45  ;;  %v5165_v45 = vld [vmem:[#allocation8 + $0x10c] sm:$0xf0]  ;;  %v5243_v52 = vld [vmem:[#allocation8 + $0x198] sm:$0xf]  ;;  %v6015_v53 = vld [vmem:[#allocation8 + $0x1a8] sm:$0xf0] }
 0x20e   :  { %v2271_v8 = vpop.f32.mrf.mxu0  ;;  %v6448_v3 = vpop.f32.mrf.mxu2  ;;  %v5244_v60 = vor.u32 %v6015_v53, %v5243_v52  ;;  %v5285_v53 = vld [vmem:[#allocation8 + $0x1fc] sm:$0xf0] }
 0x20f   :  { %v2312_v63 = vmul.f32 0.2, %v2153_v58  ;;  %v5323_v8 = vld [vmem:[#allocation8 + $0x238] sm:$0xf]  ;;  %3454 = vmatpush.bf16.msra.mxu3 %v5600_v54 }
 0x210   :  { %v5324_v48 = vor.u32 %v6035_v61, %v5323_v8  ;;  %v5483_v54 = vld [vmem:[#allocation8 + $0x378] sm:$0xf] }
 0x211   :  { %v2316_v35 = vmax.f32 %v2153_v58, %v2312_v63  ;;  %v5344_v58 = vor.u32 %v6040_v50, %v5343_v49  ;;  %v5577_v63 = vld [vmem:[#allocation8 + $0x44c] sm:$0xf0] }
 0x212   :  { %v5580_v1 = vor.u32 %v6097_v27, %v5577_v63  ;;  %v5223_v27 = vld [vmem:[#allocation8 + $0x170] sm:$0xf]  ;;  %v6010_v63 = vld [vmem:[#allocation8 + $0x180] sm:$0xf0] }
 0x213   :  { %v6451_v28 = vpack.c.bf16 %v2316_v35, %v2316_v35  ;;  %v5063_v35 = vld [vmem:[#allocation8 + $0x30] sm:$0xf] }
 0x214   :  { %v2154_v15 = vpop.f32.mrf.mxu3  ;;  %3455 = vmatpush.bf16.msra.mxu3 %v5580_v1  ;;  %v5064_v13 = vor.u32 %v5970_v4, %v5063_v35  ;;  %v6070_v1 = vld [vmem:[#allocation8 + $0x360] sm:$0xf0]  ;;  %v5224_v35 = vor.u32 %v6010_v63, %v5223_v27  ;;  %v6120_v27 = vld [vmem:[#allocation8 + $0x4f0] sm:$0xf0] }
 0x215   :  { %3368 = vmatmul.bf16.vlgmr.msrb.gmra.mxu0 %v6451_v28  ;;  %v5965_v15 = vld [vmem:[#allocation8 + $0x18] sm:$0xf0]  ;;  %v6018_v63 = vld [vmem:[#allocation8 + $0x1c4] sm:$0xf] }
 0x216   :  { %3464 = vmatpush.bf16.msrb.mxu0 %v5184_v6  ;;  %v2245_v26 = vpop.f32.mrf.mxu2  ;;  %v2218_v6 = vadd.f32 %v6429_v18, %v1458_v42  ;;  %v5537_v18 = vld [vmem:[#allocation8 + $0x3fc] sm:$0xf0] }
 0x217   :  { %v6455_v62 = vpop.f32.mrf.mxu1  ;;  %v5540_v26 = vor.u32 %v6087_v56, %v5537_v18  ;;  %v6060_v18 = vld [vmem:[#allocation8 + $0x310] sm:$0xf0] }
 0x218   :  { %v2231_v12 = vadd.f32 %v6433_v44, %v2218_v6  ;;  %3456 = vmatpush.bf16.msra.mxu3 %v5560_v11  ;;  %v5044_v44 = vor.u32 %v5965_v15, %v5043_v14  ;;  %v5203_v6 = vld [vmem:[#allocation8 + $0x148] sm:$0xf]  ;;  %v5978_v11 = vld [vmem:[#allocation8 + $0x84] sm:$0xf]  ;;  %v1459_v15 = vperm.slane %v6438_v19, 3 }
 0x219   :  { %v5204_v14 = vor.u32 %v6005_v7, %v5203_v6 }
 0x21a   :  { %3465 = vmatpush.bf16.msrb.mxu0 %v5164_v20  ;;  %v2244_v20 = vadd.f32 %v6448_v3, %v2231_v12  ;;  %v5188_v3 = vor.u32 %v5998_v24, %v5185_v25  ;;  %v5105_v12 = vld [vmem:[#allocation8 + $0x94] sm:$0xf0]  ;;  %v5085_v24 = vld [vmem:[#allocation8 + $0x6c] sm:$0xf0]  ;;  %v6033_v25 = vld [vmem:[#allocation8 + $0x23c] sm:$0xf] }
 0x21c   :  { %v2204_v36 = vpop.f32.mrf.mxu3  ;;  %3457 = vmatpush.bf16.msra.mxu3 %v5540_v26  ;;  %v5325_v26 = vld [vmem:[#allocation8 + $0x24c] sm:$0xf0] }
 0x21d   :  { %v2205_v43 = vadd.f32 %v2204_v36, %v2192_v34  ;;  %v6020_v34 = vld [vmem:[#allocation8 + $0x1d0] sm:$0xf0]  ;;  %v5517_v36 = vld [vmem:[#allocation8 + $0x3d4] sm:$0xf0]  ;;  %v5328_v19 = vor.u32 %v6033_v25, %v5325_v26  ;;  %v5623_v25 = vld [vmem:[#allocation8 + $0x490] sm:$0xf] }
 0x21e   :  { %3466 = vmatpush.bf16.msrb.mxu0 %v5144_v31  ;;  %v5284_v31 = vor.u32 %v6025_v21, %v5283_v16  ;;  %v5264_v49 = vor.u32 %v6020_v34, %v5263_v32  ;;  %v5444_v16 = vor.u32 %v6065_v10, %v5443_v9  ;;  %v5423_v21 = vld [vmem:[#allocation8 + $0x300] sm:$0xf]  ;;  %v2270_v32 = vadd.f32 %v6443_v38, %v1459_v15  ;;  %v6055_v34 = vld [vmem:[#allocation8 + $0x2e8] sm:$0xf0]  ;;  %v5245_v15 = vld [vmem:[#allocation8 + $0x1ac] sm:$0xf0] }
 0x21f   :  { %v2313_v51 = vmul.f32 0.2, %v2205_v43  ;;  %v2284_v17 = vpop.f32.mrf.mxu1  ;;  %v6110_v26 = vld [vmem:[#allocation8 + $0x4a0] sm:$0xf0] }
 0x221   :  { %v2317_v55 = vmax.f32 %v2205_v43, %v2313_v51  ;;  %v5993_v43 = vld [vmem:[#allocation8 + $0xfc] sm:$0xf]  ;;  %v5504_v51 = vor.u32 %v6080_v41, %v5503_v37  ;;  %v5968_v37 = vld [vmem:[#allocation8 + $0x34] sm:$0xf] }
 0x222   :  { %3467 = vmatpush.bf16.msrb.mxu0 %v5124_v46  ;;  %v5520_v46 = vor.u32 %v6082_v40, %v5517_v36  ;;  %v5168_v17 = vor.u32 %v5993_v43, %v5165_v45  ;;  %v5305_v40 = vld [vmem:[#allocation8 + $0x224] sm:$0xf0]  ;;  %v2283_v36 = vadd.f32 %v6455_v62, %v2270_v32  ;;  %v5383_v45 = vld [vmem:[#allocation8 + $0x2b0] sm:$0xf]  ;;  %v6068_v32 = vld [vmem:[#allocation8 + $0x354] sm:$0xf] }
 0x223   :  { %v6460_v22 = vpack.c.bf16 %v2317_v55, %v2317_v55  ;;  %v6075_v55 = vld [vmem:[#allocation8 + $0x388] sm:$0xf0] }
 0x224   :  { %v2206_v0 = vpop.f32.mrf.mxu3  ;;  %3458 = vmatpush.bf16.msra.mxu3 %v5520_v46  ;;  %v5484_v8 = vor.u32 %v6075_v55, %v5483_v54  ;;  %v6050_v46 = vld [vmem:[#allocation8 + $0x2c0] sm:$0xf0]  ;;  %v5191_v54 = vld [vmem:[#allocation8 + $0x128] sm:$0xf] }
 0x225   :  { %3381 = vmatmul.bf16.vlgmr.msrb.gmra.mxu1 %v6460_v22  ;;  %3420 = vmatmul.bf16.vlgmr.msra.gmra.mxu0 %v6451_v28  ;;  %v5463_v0 = vld [vmem:[#allocation8 + $0x350] sm:$0xf]  ;;  %v5384_v62 = vor.u32 %v6050_v46, %v5383_v45  ;;  %v5205_v45 = vld [vmem:[#allocation8 + $0x15c] sm:$0xf0] }
 0x226   :  { %3468 = vmatpush.bf16.msrb.mxu0 %v5104_v57  ;;  %3477 = vmatpush.bf16.msrb.mxu1 %v5344_v58  ;;  %v5988_v57 = vld [vmem:[#allocation8 + $0xd4] sm:$0xf]  ;;  %v5145_v58 = vld [vmem:[#allocation8 + $0xe4] sm:$0xf0]  ;;  %v5464_v4 = vor.u32 %v6070_v1, %v5463_v0  ;;  %v5265_v0 = vld [vmem:[#allocation8 + $0x1d4] sm:$0xf0] }
 0x227   :  { %v5148_v61 = vor.u32 %v5988_v57, %v5145_v58  ;;  %v5363_v58 = vld [vmem:[#allocation8 + $0x288] sm:$0xf]  ;;  %v6078_v1 = vld [vmem:[#allocation8 + $0x3a4] sm:$0xf]  ;;  %v5268_v9 = vor.u32 %v6018_v63, %v5265_v0 }
 0x22a   :  { %3469 = vmatpush.bf16.msrb.mxu0 %v5084_v2  ;;  %3478 = vmatpush.bf16.msrb.mxu1 %v5324_v48  ;;  %v5983_v2 = vld [vmem:[#allocation8 + $0xac] sm:$0xf]  ;;  %v5125_v48 = vld [vmem:[#allocation8 + $0xbc] sm:$0xf0] }
 0x22b   :  { %v5128_v5 = vor.u32 %v5983_v2, %v5125_v48  ;;  %v5505_v2 = vld [vmem:[#allocation8 + $0x3b4] sm:$0xf0] }
 0x22c   :  { %v2256_v23 = vpop.f32.mrf.mxu3  ;;  %v5508_v10 = vor.u32 %v6078_v1, %v5505_v2  ;;  %v5563_v1 = vld [vmem:[#allocation8 + $0x418] sm:$0xf]  ;;  %v6095_v2 = vld [vmem:[#allocation8 + $0x428] sm:$0xf0] }
 0x22d   :  { %v2257_v29 = vadd.f32 %v2256_v23, %v2244_v20  ;;  %v5108_v20 = vor.u32 %v5978_v11, %v5105_v12  ;;  %v5973_v23 = vld [vmem:[#allocation8 + $0x5c] sm:$0xf]  ;;  %v5643_v11 = vld [vmem:[#allocation8 + $0x4b8] sm:$0xf]  ;;  %v6115_v12 = vld [vmem:[#allocation8 + $0x4c8] sm:$0xf0] }
 0x22e   :  { %v6467_v30 = vpop.f32.mrf.mxu2  ;;  %3470 = vmatpush.bf16.msrb.mxu0 %v5064_v13  ;;  %3479 = vmatpush.bf16.msrb.mxu1 %v5304_v33  ;;  %v6038_v13 = vld [vmem:[#allocation8 + $0x264] sm:$0xf]  ;;  %v5345_v33 = vld [vmem:[#allocation8 + $0x274] sm:$0xf0] }
 0x22f   :  { %v2314_v39 = vmul.f32 0.2, %v2257_v29  ;;  %v5348_v56 = vor.u32 %v6038_v13, %v5345_v33  ;;  %v2296_v38 = vadd.f32 %v6467_v30, %v2283_v36  ;;  %v6013_v13 = vld [vmem:[#allocation8 + $0x19c] sm:$0xf] }
 0x231   :  { %v2318_v47 = vmax.f32 %v2257_v29, %v2314_v39  ;;  %v5424_v29 = vor.u32 %v6060_v18, %v5423_v21  ;;  %v5065_v39 = vld [vmem:[#allocation8 + $0x44] sm:$0xf0]  ;;  %v5151_v21 = vld [vmem:[#allocation8 + $0xd8] sm:$0xf]  ;;  %v5644_v18 = vor.u32 %v6115_v12, %v5643_v11  ;;  %v6031_v11 = vld [vmem:[#allocation8 + $0x228] sm:$0xf0]  ;;  %v5564_v12 = vor.u32 %v6095_v2, %v5563_v1 }
 0x232   :  { %3471 = vmatpush.bf16.msrb.mxu0 %v5044_v44  ;;  %3480 = vmatpush.bf16.msrb.mxu1 %v5284_v31  ;;  %v5088_v44 = vor.u32 %v5973_v23, %v5085_v24  ;;  %v5403_v31 = vld [vmem:[#allocation8 + $0x2d8] sm:$0xf]  ;;  %v5068_v43 = vor.u32 %v5968_v37, %v5065_v39  ;;  %v5248_v23 = vor.u32 %v6013_v13, %v5245_v15  ;;  %v5986_v37 = vld [vmem:[#allocation8 + $0xc0] sm:$0xf0]  ;;  %v5211_v1 = vld [vmem:[#allocation8 + $0x150] sm:$0xf] }
 0x233   :  { %v6469_v50 = vpack.c.bf16 %v2318_v47, %v2318_v47  ;;  %v5404_v41 = vor.u32 %v6055_v34, %v5403_v31  ;;  %v5225_v31 = vld [vmem:[#allocation8 + $0x184] sm:$0xf0]  ;;  %v5131_v34 = vld [vmem:[#allocation8 + $0xb0] sm:$0xf]  ;;  %v5624_v39 = vor.u32 %v6110_v26, %v5623_v25  ;;  %v6006_v2 = vld [vmem:[#allocation8 + $0x160] sm:$0xf0] }
 0x234   :  { %v2258_v42 = vpop.f32.mrf.mxu3  ;;  %v5132_v46 = vor.u32 %v5986_v37, %v5131_v34  ;;  %v5365_v34 = vld [vmem:[#allocation8 + $0x29c] sm:$0xf0]  ;;  %v6118_v37 = vld [vmem:[#allocation8 + $0x4e4] sm:$0xf] }
 0x235   :  { %3394 = vmatmul.bf16.vlgmr.msrb.gmra.mxu2 %v6469_v50  ;;  %3433 = vmatmul.bf16.vlgmr.msra.gmra.mxu1 %v6460_v22  ;;  %v6001_v42 = vld [vmem:[#allocation8 + $0x138] sm:$0xf0] }
 0x236   :  { %3516 = vmatpush.bf16.msra.mxu0 %v5188_v3  ;;  %v2297_v59 = vpop.f32.mrf.mxu2  ;;  %3481 = vmatpush.bf16.msrb.mxu1 %v5264_v49  ;;  %v6028_v3 = vld [vmem:[#allocation8 + $0x214] sm:$0xf]  ;;  %v5963_v49 = vld [vmem:[#allocation8 + $0xc] sm:$0xf] }
 0x237   :  { %3472 = vmatmul.bf16.vlgmr.msrb.gmra.mxu0 %v6451_v28  ;;  %3490 = vmatpush.bf16.msrb.mxu2 %v5504_v51  ;;  %v5308_v47 = vor.u32 %v6028_v3, %v5305_v40  ;;  %v5045_v51 = vld [vmem:[#allocation8 + $0x1c] sm:$0xf0]  ;;  %v6045_v59 = vld [vmem:[#allocation8 + $0x298] sm:$0xf0]  ;;  %v5603_v3 = vld [vmem:[#allocation8 + $0x468] sm:$0xf] }
 0x238   :  { %v5048_v57 = vor.u32 %v5963_v49, %v5045_v51  ;;  %v5111_v49 = vld [vmem:[#allocation8 + $0x88] sm:$0xf]  ;;  %v5981_v51 = vld [vmem:[#allocation8 + $0x98] sm:$0xf0] }
 0x23a   :  { %3517 = vmatpush.bf16.msra.mxu0 %v5168_v17  ;;  %3482 = vmatpush.bf16.msrb.mxu1 %v5244_v60  ;;  %v6023_v17 = vld [vmem:[#allocation8 + $0x1ec] sm:$0xf]  ;;  %v5663_v60 = vld [vmem:[#allocation8 + $0x4e0] sm:$0xf] }
 0x23b   :  { %3491 = vmatpush.bf16.msrb.mxu2 %v5484_v8  ;;  %v5288_v30 = vor.u32 %v6023_v17, %v5285_v53  ;;  %v5664_v6 = vor.u32 %v6120_v27, %v5663_v60  ;;  %v5351_v17 = vld [vmem:[#allocation8 + $0x268] sm:$0xf]  ;;  %v5425_v60 = vld [vmem:[#allocation8 + $0x314] sm:$0xf0]  ;;  %v6036_v27 = vld [vmem:[#allocation8 + $0x250] sm:$0xf0] }
 0x23e   :  { %3518 = vmatpush.bf16.msra.mxu0 %v5148_v61  ;;  %3483 = vmatpush.bf16.msrb.mxu1 %v5224_v35  ;;  %v5192_v61 = vor.u32 %v6001_v42, %v5191_v54  ;;  %v5171_v35 = vld [vmem:[#allocation8 + $0x100] sm:$0xf] }
 0x23f   :  { %3492 = vmatpush.bf16.msrb.mxu2 %v5464_v4  ;;  %v5996_v4 = vld [vmem:[#allocation8 + $0x110] sm:$0xf0] }
 0x242   :  { %3519 = vmatpush.bf16.msra.mxu0 %v5128_v5  ;;  %3484 = vmatpush.bf16.msrb.mxu1 %v5204_v14  ;;  %v5364_v5 = vor.u32 %v6045_v59, %v5363_v58  ;;  %v5172_v14 = vor.u32 %v5996_v4, %v5171_v35  ;;  %v6058_v59 = vld [vmem:[#allocation8 + $0x304] sm:$0xf]  ;;  %v6053_v4 = vld [vmem:[#allocation8 + $0x2dc] sm:$0xf] }
 0x243   :  { %3493 = vmatpush.bf16.msrb.mxu2 %v5444_v16  ;;  %v6073_v16 = vld [vmem:[#allocation8 + $0x37c] sm:$0xf]  ;;  %v5428_v0 = vor.u32 %v6058_v59, %v5425_v60  ;;  %v5231_v59 = vld [vmem:[#allocation8 + $0x178] sm:$0xf]  ;;  %v6011_v60 = vld [vmem:[#allocation8 + $0x188] sm:$0xf0] }
 0x245   :  { %3446 = vmatmul.bf16.vlgmr.msra.gmra.mxu2 %v6469_v50  ;;  %3485 = vmatmul.bf16.vlgmr.msrb.gmra.mxu1 %v6460_v22 }
 0x246   :  { %3520 = vmatpush.bf16.msra.mxu0 %v5108_v20  ;;  %3529 = vmatpush.bf16.msra.mxu1 %v5348_v56  ;;  %v5485_v20 = vld [vmem:[#allocation8 + $0x38c] sm:$0xf0]  ;;  %v5991_v56 = vld [vmem:[#allocation8 + $0xe8] sm:$0xf0] }
 0x247   :  { %3494 = vmatpush.bf16.msrb.mxu2 %v5424_v29  ;;  %v5488_v24 = vor.u32 %v6073_v16, %v5485_v20  ;;  %v6008_v29 = vld [vmem:[#allocation8 + $0x174] sm:$0xf] }
 0x248   :  { %v5228_v40 = vor.u32 %v6008_v29, %v5225_v31  ;;  %v6048_v20 = vld [vmem:[#allocation8 + $0x2b4] sm:$0xf]  ;;  %v5523_v29 = vld [vmem:[#allocation8 + $0x3c8] sm:$0xf]  ;;  %v6043_v31 = vld [vmem:[#allocation8 + $0x28c] sm:$0xf] }
 0x24a   :  { %3521 = vmatpush.bf16.msra.mxu0 %v5088_v44  ;;  %3530 = vmatpush.bf16.msra.mxu1 %v5328_v19  ;;  %v5152_v44 = vor.u32 %v5991_v56, %v5151_v21  ;;  %v5465_v19 = vld [vmem:[#allocation8 + $0x364] sm:$0xf0]  ;;  %v5051_v56 = vld [vmem:[#allocation8 + $0x10] sm:$0xf] }
 0x24b   :  { %3495 = vmatpush.bf16.msrb.mxu2 %v5404_v41  ;;  %v5468_v36 = vor.u32 %v6068_v32, %v5465_v19  ;;  %v6105_v41 = vld [vmem:[#allocation8 + $0x478] sm:$0xf0]  ;;  %v5385_v21 = vld [vmem:[#allocation8 + $0x2c4] sm:$0xf0] }
 0x24c   :  { %v2308_v52 = vpop.f32.mrf.mxu3  ;;  %v5604_v53 = vor.u32 %v6105_v41, %v5603_v3  ;;  %v5388_v26 = vor.u32 %v6048_v20, %v5385_v21  ;;  %v5271_v3 = vld [vmem:[#allocation8 + $0x1c8] sm:$0xf]  ;;  %v6056_v20 = vld [vmem:[#allocation8 + $0x2f0] sm:$0xf0] }
 0x24d   :  { %v2309_v55 = vadd.f32 %v2308_v52, %v2296_v38  ;;  %v6063_v38 = vld [vmem:[#allocation8 + $0x32c] sm:$0xf]  ;;  %v6041_v52 = vld [vmem:[#allocation8 + $0x278] sm:$0xf0]  ;;  %v5511_v41 = vld [vmem:[#allocation8 + $0x3a8] sm:$0xf] }
 0x24e   :  { %3522 = vmatpush.bf16.msra.mxu0 %v5068_v43  ;;  %3531 = vmatpush.bf16.msra.mxu1 %v5308_v47  ;;  %v6003_v43 = vld [vmem:[#allocation8 + $0x14c] sm:$0xf]  ;;  %v5445_v47 = vld [vmem:[#allocation8 + $0x33c] sm:$0xf0]  ;;  %v5352_v58 = vor.u32 %v6041_v52, %v5351_v17  ;;  %v6016_v52 = vld [vmem:[#allocation8 + $0x1b0] sm:$0xf0] }
 0x24f   :  { %v2315_v8 = vmul.f32 0.2, %v2309_v55  ;;  %3496 = vmatpush.bf16.msrb.mxu2 %v5384_v62  ;;  %v5208_v54 = vor.u32 %v6003_v43, %v5205_v45  ;;  %v5448_v42 = vor.u32 %v6063_v38, %v5445_v47  ;;  %v6100_v62 = vld [vmem:[#allocation8 + $0x450] sm:$0xf0]  ;;  %v6081_v43 = vld [vmem:[#allocation8 + $0x3b8] sm:$0xf0]  ;;  %v5368_v45 = vor.u32 %v6043_v31, %v5365_v34 }
 0x250   :  { %v6113_v47 = vld [vmem:[#allocation8 + $0x4bc] sm:$0xf]  ;;  %v5251_v17 = vld [vmem:[#allocation8 + $0x1a0] sm:$0xf]  ;;  %v5371_v34 = vld [vmem:[#allocation8 + $0x290] sm:$0xf] }
 0x251   :  { %v2319_v48 = vmax.f32 %v2309_v55, %v2315_v8  ;;  %v5583_v55 = vld [vmem:[#allocation8 + $0x440] sm:$0xf] }
 0x252   :  { %3523 = vmatpush.bf16.msra.mxu0 %v5048_v57  ;;  %3532 = vmatpush.bf16.msra.mxu1 %v5288_v30  ;;  %v5112_v57 = vor.u32 %v5981_v51, %v5111_v49  ;;  %v5091_v8 = vld [vmem:[#allocation8 + $0x60] sm:$0xf]  ;;  %v5976_v30 = vld [vmem:[#allocation8 + $0x70] sm:$0xf0]  ;;  %v5584_v63 = vor.u32 %v6100_v62, %v5583_v55  ;;  %v5645_v49 = vld [vmem:[#allocation8 + $0x4cc] sm:$0xf0]  ;;  %v5512_v51 = vor.u32 %v6081_v43, %v5511_v41 }
 0x253   :  { %v6480_v7 = vpack.c.bf16 %v2319_v48, %v2319_v48  ;;  %3497 = vmatpush.bf16.msrb.mxu2 %v5364_v5  ;;  %v5092_v48 = vor.u32 %v5976_v30, %v5091_v8  ;;  %v5405_v5 = vld [vmem:[#allocation8 + $0x2ec] sm:$0xf0]  ;;  %v5252_v55 = vor.u32 %v6016_v52, %v5251_v17  ;;  %v6108_v62 = vld [vmem:[#allocation8 + $0x494] sm:$0xf]  ;;  %v5471_v8 = vld [vmem:[#allocation8 + $0x358] sm:$0xf] }
 0x254   :  { %v2310_v33 = vpop.f32.mrf.mxu3  ;;  %v5408_v13 = vor.u32 %v6053_v4, %v5405_v5  ;;  %v6071_v30 = vld [vmem:[#allocation8 + $0x368] sm:$0xf0]  ;;  %v5212_v5 = vor.u32 %v6006_v2, %v5211_v1  ;;  %v5631_v43 = vld [vmem:[#allocation8 + $0x498] sm:$0xf]  ;;  %v5591_v17 = vld [vmem:[#allocation8 + $0x448] sm:$0xf] }
 0x255   :  { %3407 = vmatmul.bf16.vlgmr.msrb.gmra.mxu3 %v6480_v7  ;;  %3524 = vmatmul.bf16.vlgmr.msra.gmra.mxu0 %v6451_v28  ;;  %v5543_v33 = vld [vmem:[#allocation8 + $0x3f0] sm:$0xf]  ;;  %v6101_v52 = vld [vmem:[#allocation8 + $0x458] sm:$0xf0] }
 0x256   :  { %3568 = vmatpush.bf16.msrb.mxu0 %v5192_v61  ;;  %3503 = vmatpush.bf16.msrb.mxu3 %v5664_v6  ;;  %v5331_v61 = vld [vmem:[#allocation8 + $0x240] sm:$0xf]  ;;  %v5071_v6 = vld [vmem:[#allocation8 + $0x38] sm:$0xf] }
 0x257   :  { %3533 = vmatpush.bf16.msra.mxu1 %v5268_v9  ;;  %3542 = vmatpush.bf16.msra.mxu2 %v5508_v10  ;;  %v5332_v35 = vor.u32 %v6036_v27, %v5331_v61  ;;  %v5971_v9 = vld [vmem:[#allocation8 + $0x48] sm:$0xf0]  ;;  %v5311_v10 = vld [vmem:[#allocation8 + $0x218] sm:$0xf]  ;;  %v5232_v27 = vor.u32 %v6011_v60, %v5231_v59 }
 0x258   :  { %3498 = vmatmul.bf16.vlgmr.msrb.gmra.mxu2 %v6469_v50  ;;  %v5072_v15 = vor.u32 %v5971_v9, %v5071_v6  ;;  %v5312_v16 = vor.u32 %v6031_v11, %v5311_v10  ;;  %v6098_v6 = vld [vmem:[#allocation8 + $0x444] sm:$0xf]  ;;  %v5585_v9 = vld [vmem:[#allocation8 + $0x454] sm:$0xf0]  ;;  %v5431_v11 = vld [vmem:[#allocation8 + $0x308] sm:$0xf] }
 0x25a   :  { %3569 = vmatpush.bf16.msrb.mxu0 %v5172_v14  ;;  %3504 = vmatpush.bf16.msrb.mxu3 %v5644_v18  ;;  %v6090_v14 = vld [vmem:[#allocation8 + $0x400] sm:$0xf0] }
 0x25b   :  { %3534 = vmatpush.bf16.msra.mxu1 %v5248_v23  ;;  %3543 = vmatpush.bf16.msra.mxu2 %v5488_v24  ;;  %v5966_v18 = vld [vmem:[#allocation8 + $0x20] sm:$0xf0]  ;;  %v5291_v23 = vld [vmem:[#allocation8 + $0x1f0] sm:$0xf]  ;;  %v5544_v25 = vor.u32 %v6090_v14, %v5543_v33  ;;  %v6093_v33 = vld [vmem:[#allocation8 + $0x41c] sm:$0xf] }
 0x25c   :  { %v6026_v24 = vld [vmem:[#allocation8 + $0x200] sm:$0xf0]  ;;  %v5052_v32 = vor.u32 %v5966_v18, %v5051_v56  ;;  %v5565_v14 = vld [vmem:[#allocation8 + $0x42c] sm:$0xf0]  ;;  %v6088_v56 = vld [vmem:[#allocation8 + $0x3f4] sm:$0xf] }
 0x25d   :  { %v5292_v19 = vor.u32 %v6026_v24, %v5291_v23  ;;  %v5568_v21 = vor.u32 %v6093_v33, %v5565_v14  ;;  %v5545_v18 = vld [vmem:[#allocation8 + $0x404] sm:$0xf0]  ;;  %v5391_v24 = vld [vmem:[#allocation8 + $0x2b8] sm:$0xf] }
 0x25e   :  { %3570 = vmatpush.bf16.msrb.mxu0 %v5152_v44  ;;  %3505 = vmatpush.bf16.msrb.mxu3 %v5624_v39  ;;  %v6085_v44 = vld [vmem:[#allocation8 + $0x3d8] sm:$0xf0]  ;;  %v5665_v39 = vld [vmem:[#allocation8 + $0x4f4] sm:$0xf0] }
 0x25f   :  { %3535 = vmatpush.bf16.msra.mxu1 %v5228_v40  ;;  %3544 = vmatpush.bf16.msra.mxu2 %v5468_v36  ;;  %v6021_v40 = vld [vmem:[#allocation8 + $0x1d8] sm:$0xf0]  ;;  %v5524_v36 = vor.u32 %v6085_v44, %v5523_v29  ;;  %v6083_v29 = vld [vmem:[#allocation8 + $0x3cc] sm:$0xf]  ;;  %v5525_v44 = vld [vmem:[#allocation8 + $0x3dc] sm:$0xf0] }
 0x260   :  { %v5272_v38 = vor.u32 %v6021_v40, %v5271_v3  ;;  %v5651_v40 = vld [vmem:[#allocation8 + $0x4c0] sm:$0xf] }
 0x262   :  { %3571 = vmatpush.bf16.msrb.mxu0 %v5132_v46  ;;  %3506 = vmatpush.bf16.msrb.mxu3 %v5604_v53  ;;  %v5668_v46 = vor.u32 %v6118_v37, %v5665_v39  ;;  %v5491_v53 = vld [vmem:[#allocation8 + $0x380] sm:$0xf]  ;;  %v6046_v37 = vld [vmem:[#allocation8 + $0x2a0] sm:$0xf0]  ;;  %v5528_v39 = vor.u32 %v6083_v29, %v5525_v44 }
 0x263   :  { %3536 = vmatpush.bf16.msra.mxu1 %v5208_v54  ;;  %3545 = vmatpush.bf16.msra.mxu2 %v5448_v42  ;;  %v6076_v54 = vld [vmem:[#allocation8 + $0x390] sm:$0xf0]  ;;  %v5648_v42 = vor.u32 %v6113_v47, %v5645_v49  ;;  %v5372_v3 = vor.u32 %v6046_v37, %v5371_v34  ;;  %v5611_v47 = vld [vmem:[#allocation8 + $0x470] sm:$0xf]  ;;  %v6106_v49 = vld [vmem:[#allocation8 + $0x480] sm:$0xf0] }
 0x265   :  { %3459 = vmatmul.bf16.vlgmr.msra.gmra.mxu3 %v6480_v7 }
 0x266   :  { %3572 = vmatpush.bf16.msrb.mxu0 %v5112_v57  ;;  %3507 = vmatpush.bf16.msrb.mxu3 %v5584_v63  ;;  %v5625_v57 = vld [vmem:[#allocation8 + $0x4a4] sm:$0xf0]  ;;  %v6103_v63 = vld [vmem:[#allocation8 + $0x46c] sm:$0xf] }
 0x267   :  { %3581 = vmatpush.bf16.msrb.mxu1 %v5352_v58  ;;  %3546 = vmatpush.bf16.msra.mxu2 %v5428_v0  ;;  %v5492_v58 = vor.u32 %v6076_v54, %v5491_v53  ;;  %v5628_v61 = vor.u32 %v6108_v62, %v5625_v57  ;;  %v5472_v0 = vor.u32 %v6071_v30, %v5471_v8  ;;  %v5551_v57 = vld [vmem:[#allocation8 + $0x3f8] sm:$0xf]  ;;  %v5531_v8 = vld [vmem:[#allocation8 + $0x3d0] sm:$0xf]  ;;  %v6086_v30 = vld [vmem:[#allocation8 + $0x3e0] sm:$0xf0] }
 0x268   :  { %3537 = vmatmul.bf16.vlgmr.msra.gmra.mxu1 %v6460_v22  ;;  %v5592_v53 = vor.u32 %v6101_v52, %v5591_v17 }
 0x26a   :  { %3573 = vmatpush.bf16.msrb.mxu0 %v5092_v48  ;;  %3508 = vmatpush.bf16.msrb.mxu3 %v5564_v12  ;;  %v5451_v48 = vld [vmem:[#allocation8 + $0x330] sm:$0xf]  ;;  %v6061_v12 = vld [vmem:[#allocation8 + $0x318] sm:$0xf0] }
 0x26b   :  { %3582 = vmatpush.bf16.msrb.mxu1 %v5332_v35  ;;  %3547 = vmatpush.bf16.msra.mxu2 %v5408_v13  ;;  %v6066_v35 = vld [vmem:[#allocation8 + $0x340] sm:$0xf0]  ;;  %v5588_v13 = vor.u32 %v6098_v6, %v5585_v9  ;;  %v3678_v9 = vld [vmem:[%s6592_s2 + $0x8] sm:$0xff] }
 0x26c   :  { %v5452_v10 = vor.u32 %v6066_v35, %v5451_v48 }
 0x26e   :  { %3574 = vmatpush.bf16.msrb.mxu0 %v5072_v15  ;;  %3509 = vmatpush.bf16.msrb.mxu3 %v5544_v25  ;;  %v5432_v15 = vor.u32 %v6061_v12, %v5431_v11  ;;  %v6051_v25 = vld [vmem:[#allocation8 + $0x2c8] sm:$0xf0] }
 0x26f   :  { %3583 = vmatpush.bf16.msrb.mxu1 %v5312_v16  ;;  %3548 = vmatpush.bf16.msra.mxu2 %v5388_v26  ;;  %v5411_v16 = vld [vmem:[#allocation8 + $0x2e0] sm:$0xf]  ;;  %v5548_v26 = vor.u32 %v6088_v56, %v5545_v18  ;;  %v5392_v31 = vor.u32 %v6051_v25, %v5391_v24 }
 0x270   :  { %v5412_v23 = vor.u32 %v6056_v20, %v5411_v16 }
 0x272   :  { %3575 = vmatpush.bf16.msrb.mxu0 %v5052_v32  ;;  %3510 = vmatpush.bf16.msrb.mxu3 %v5524_v36  ;;  %v5671_v32 = vld [vmem:[#allocation8 + $0x4e8] sm:$0xf]  ;;  %v6116_v36 = vld [vmem:[#allocation8 + $0x4d0] sm:$0xf0] }
 0x273   :  { %3584 = vmatpush.bf16.msrb.mxu1 %v5292_v19  ;;  %3549 = vmatpush.bf16.msra.mxu2 %v5368_v45  ;;  %v6121_v19 = vld [vmem:[#allocation8 + $0x4f8] sm:$0xf0]  ;;  %v5652_v41 = vor.u32 %v6116_v36, %v5651_v40  ;;  %v6111_v45 = vld [vmem:[#allocation8 + $0x4a8] sm:$0xf0] }
 0x275   :  { %3576 = vmatmul.bf16.vlgmr.msrb.gmra.mxu0 %v6451_v28  ;;  %3511 = vmatmul.bf16.vlgmr.msrb.gmra.mxu3 %v6480_v7  ;;  %v5605_v28 = vld [vmem:[#allocation8 + $0x47c] sm:$0xf0] }
 0x276   :  { %3555 = vmatpush.bf16.msra.mxu3 %v5668_v46  ;;  %3550 = vmatmul.bf16.vlgmr.msra.gmra.mxu2 %v6469_v50  ;;  %v5608_v4 = vor.u32 %v6103_v63, %v5605_v28  ;;  %v5632_v46 = vor.u32 %v6111_v45, %v5631_v43  ;;  %v3620_v28 = vld [vmem:[%s6592_s2] sm:$0xff] }
 0x277   :  { %3585 = vmatpush.bf16.msrb.mxu1 %v5272_v38  ;;  %3594 = vmatpush.bf16.msrb.mxu2 %v5512_v51  ;;  %v5612_v51 = vor.u32 %v6106_v49, %v5611_v47 }
 0x27a   :  { %3556 = vmatpush.bf16.msra.mxu3 %v5648_v42  ;;  %v5571_v42 = vld [vmem:[#allocation8 + $0x420] sm:$0xf] }
 0x27b   :  { %3586 = vmatpush.bf16.msrb.mxu1 %v5252_v55  ;;  %3595 = vmatpush.bf16.msrb.mxu2 %v5492_v58  ;;  %v6096_v55 = vld [vmem:[#allocation8 + $0x430] sm:$0xf0]  ;;  %v6091_v58 = vld [vmem:[#allocation8 + $0x408] sm:$0xf0] }
 0x27c   :  { %v5572_v62 = vor.u32 %v6096_v55, %v5571_v42 }
 0x27e   :  { %3557 = vmatpush.bf16.msra.mxu3 %v5628_v61  ;;  %v5532_v61 = vor.u32 %v6086_v30, %v5531_v8  ;;  %v3790_v8 = vld [vmem:[%s6592_s2 + $0x18] sm:$0xff] }
 0x27f   :  { %3587 = vmatpush.bf16.msrb.mxu1 %v5232_v27  ;;  %3596 = vmatpush.bf16.msrb.mxu2 %v5472_v0  ;;  %v3621_v0 = vadd.f32 1e-20, %v3620_v28 }
 0x281   :  { %6131 = vlog2.f32 %v3621_v0 }
 0x282   :  { %3558 = vmatpush.bf16.msra.mxu3 %v5608_v4 }
 0x283   :  { %3588 = vmatpush.bf16.msrb.mxu1 %v5212_v5  ;;  %3597 = vmatpush.bf16.msrb.mxu2 %v5452_v10  ;;  %v3679_v10 = vadd.f32 1e-20, %v3678_v9 }
 0x285   :  { %6133 = vlog2.f32 %v3679_v10 }
 0x286   :  { %3559 = vmatpush.bf16.msra.mxu3 %v5588_v13  ;;  %3589 = vmatmul.bf16.vlgmr.msrb.gmra.mxu1 %v6460_v22  ;;  %v5672_v22 = vor.u32 %v6121_v19, %v5671_v32 }
 0x287   :  { %3598 = vmatpush.bf16.msrb.mxu2 %v5432_v15  ;;  %v6132_v48 = vpop.eup %6131  ;;  %v6505_v15 = vld [vmem:[%s6600_s10] sm:$0x1f] }
 0x288   :  { %v3623_v6 = vmul.f32 0.6931472, %v6132_v48  ;;  %v2518_v56 = vperm.slane %v6505_v15, 0 }
 0x28a   :  { %3560 = vmatpush.bf16.msra.mxu3 %v5568_v21  ;;  %v3624_v11 = vsub.f32 0.0, %v3623_v6  ;;  %v3734_v21 = vld [vmem:[%s6592_s2 + $0x10] sm:$0xff] }
 0x28b   :  { %3599 = vmatpush.bf16.msrb.mxu2 %v5412_v23  ;;  %v6134_v33 = vpop.eup %6133  ;;  %v3735_v23 = vadd.f32 1e-20, %v3734_v21 }
 0x28c   :  { %v3681_v20 = vmul.f32 0.6931472, %v6134_v33 }
 0x28e   :  { %3561 = vmatpush.bf16.msra.mxu3 %v5548_v26  ;;  %v3682_v25 = vsub.f32 0.0, %v3681_v20 }
 0x28f   :  { %3600 = vmatpush.bf16.msrb.mxu2 %v5392_v31 }
 0x290   :  { %v3683_v32 = vadd.f32 1e-20, %v3682_v25 }
 0x292   :  { %3562 = vmatpush.bf16.msra.mxu3 %v5528_v39  ;;  %v3369_v38 = vpop.f32.mrf.mxu0 }
 0x293   :  { %3601 = vmatpush.bf16.msrb.mxu2 %v5372_v3  ;;  %v3370_v26 = vadd.f32 %v3369_v38, %v2518_v56  ;;  %v6516_v3 = vstv %s6590_s0 }
 0x295   :  { %3563 = vmatmul.bf16.vlgmr.msra.gmra.mxu3 %v6480_v7 }
 0x296   :  { %3607 = vmatpush.bf16.msrb.mxu3 %v5672_v22  ;;  %3602 = vmatmul.bf16.vlgmr.msrb.gmra.mxu2 %v6469_v50  ;;  %v5552_v50 = vor.u32 %v6091_v58, %v5551_v57 }
 0x29a   :  { %3608 = vmatpush.bf16.msrb.mxu3 %v5652_v41  ;;  %v3371_v54 = vpop.f32.mrf.mxu0 }
 0x29e   :  { %3609 = vmatpush.bf16.msrb.mxu3 %v5632_v46  ;;  %v2519_v46 = vperm.slane %v6505_v15, 1 }
 0x2a2   :  { %3610 = vmatpush.bf16.msrb.mxu3 %v5612_v51  ;;  %v3382_v59 = vpop.f32.mrf.mxu1  ;;  %v3421_v60 = vpop.f32.mrf.mxu0 }
 0x2a3   :  { %v3383_v31 = vadd.f32 %v3382_v59, %v3370_v26  ;;  %v3422_v51 = vadd.f32 %v3421_v60, %v2519_v46  ;;  %v3791_v60 = vadd.f32 1e-20, %v3790_v8 }
 0x2a6   :  { %3611 = vmatpush.bf16.msrb.mxu3 %v5592_v53 }
 0x2aa   :  { %3612 = vmatpush.bf16.msrb.mxu3 %v5572_v62  ;;  %v3384_v27 = vpop.f32.mrf.mxu1  ;;  %v3423_v63 = vpop.f32.mrf.mxu0 }
 0x2ae   :  { %3613 = vmatpush.bf16.msrb.mxu3 %v5552_v50 }
 0x2b2   :  { %3614 = vmatpush.bf16.msrb.mxu3 %v5532_v61  ;;  %v3434_v1 = vpop.f32.mrf.mxu1  ;;  %v2520_v61 = vperm.slane %v6505_v15, 2 }
 0x2b3   :  { %v3435_v54 = vadd.f32 %v3434_v1, %v3422_v51 }
 0x2b4   :  { %v6497_v2 = vpop.f32.mrf.mxu0 }
 0x2b5   :  { %3615 = vmatmul.bf16.vlgmr.msrb.gmra.mxu3 %v6480_v7  ;;  %v3625_v7 = vadd.f32 1e-20, %v3624_v11  ;;  %v3474_v0 = vadd.f32 %v6497_v2, %v2520_v61 }
 0x2b7   :  { %6135 = vlog2.f32 %v3625_v7 }
 0x2b8   :  { %v3395_v35 = vpop.f32.mrf.mxu2  ;;  %6137 = vlog2.f32 %v3735_v23  ;;  %v2521_v23 = vperm.slane %v6505_v15, 3 }
 0x2b9   :  { %v3396_v19 = vadd.f32 %v3395_v35, %v3383_v31  ;;  %6139 = vlog2.f32 %v3683_v32 }
 0x2ba   :  { %v3436_v4 = vpop.f32.mrf.mxu1 }
 0x2bc   :  { %v3475_v5 = vpop.f32.mrf.mxu0 }
 0x2bd   :  { %v6136_v18 = vpop.eup %6135 }
 0x2be   :  { %v3627_v44 = vmul.f32 0.6931472, %v6136_v18  ;;  %v6138_v40 = vpop.eup %6137 }
 0x2bf   :  { %v3737_v45 = vmul.f32 0.6931472, %v6138_v40  ;;  %v6140_v38 = vpop.eup %6139 }
 0x2c0   :  { %v3397_v12 = vpop.f32.mrf.mxu2  ;;  %v3628_v34 = vsub.f32 0.0, %v3627_v44  ;;  %v3685_v52 = vmul.f32 0.6931472, %v6140_v38 }
 0x2c1   :  { %v3738_v49 = vsub.f32 0.0, %v3737_v45 }
 0x2c2   :  { %v3486_v13 = vpop.f32.mrf.mxu1  ;;  %v3686_v62 = vsub.f32 0.0, %v3685_v52 }
 0x2c3   :  { %v3739_v42 = vadd.f32 1e-20, %v3738_v49  ;;  %v3487_v48 = vadd.f32 %v3486_v13, %v3474_v0  ;;  %v3846_v13 = vld [vmem:[%s6592_s2 + $0x20] sm:$0xff] }
 0x2c4   :  { %v3847_v18 = vadd.f32 1e-20, %v3846_v13 }
 0x2c5   :  { %6141 = vlog2.f32 %v3739_v42 }
 0x2c6   :  { %6143 = vlog2.f32 %v3791_v60 }
 0x2c8   :  { %v3447_v14 = vpop.f32.mrf.mxu2 }
 0x2c9   :  { %v3448_v55 = vadd.f32 %v3447_v14, %v3435_v54 }
 0x2ca   :  { %v3488_v16 = vpop.f32.mrf.mxu1 }
 0x2cb   :  { %v6142_v27 = vpop.eup %6141 }
 0x2cc   :  { %v3741_v1 = vmul.f32 0.6931472, %v6142_v27  ;;  %v6144_v5 = vpop.eup %6143 }
 0x2cd   :  { %v3793_v7 = vmul.f32 0.6931472, %v6144_v5 }
 0x2ce   :  { %v3742_v4 = vsub.f32 0.0, %v3741_v1 }
 0x2cf   :  { %v3794_v14 = vsub.f32 0.0, %v3793_v7 }
 0x2d0   :  { %v3449_v29 = vpop.f32.mrf.mxu2 }
 0x2d1   :  { %v3795_v56 = vadd.f32 1e-20, %v3794_v14 }
 0x2d2   :  { %v6511_v24 = vpop.f32.mrf.mxu0 }
 0x2d3   :  { %6145 = vlog2.f32 %v3795_v56  ;;  %v3526_v26 = vadd.f32 %v6511_v24, %v2521_v23  ;;  %v2522_v24 = vperm.slane %v6505_v15, 4 }
 0x2d4   :  { %6147 = vlog2.f32 %v3847_v18 }
 0x2d8   :  { %v3408_v37 = vpop.f32.mrf.mxu3 }
 0x2d9   :  { %v3409_v39 = vadd.f32 %v3408_v37, %v3396_v19  ;;  %v6146_v25 = vpop.eup %6145 }
 0x2da   :  { %v3527_v22 = vpop.f32.mrf.mxu0  ;;  %v3797_v29 = vmul.f32 0.6931472, %v6146_v25  ;;  %v6148_v19 = vpop.eup %6147 }
 0x2db   :  { %v3629_v36 = vadd.f32 %v3628_v34, %v3409_v39  ;;  %v3499_v41 = vpop.f32.mrf.mxu2  ;;  %v3849_v40 = vmul.f32 0.6931472, %v6148_v19 }
 0x2dc   :  { %v3500_v35 = vadd.f32 %v3499_v41, %v3487_v48  ;;  %v3798_v32 = vsub.f32 0.0, %v3797_v29 }
 0x2dd   :  { %v6519_v43 = vmul.f32 %v6516_v3, %v3629_v36  ;;  %v3850_v41 = vsub.f32 0.0, %v3849_v40 }
 0x2df   :  { %3632 = vmax.xlane.f32.xlu0 %v6519_v43  ;;  %v3851_v38 = vadd.f32 1e-20, %v3850_v41 }
 0x2e0   :  { %v3410_v47 = vpop.f32.mrf.mxu3 }
 0x2e1   :  { %6149 = vlog2.f32 %v3851_v38 }
 0x2e3   :  { %v3501_v53 = vpop.f32.mrf.mxu2 }
 0x2e5   :  { %v3538_v17 = vpop.f32.mrf.mxu1 }
 0x2e6   :  { %v3539_v44 = vadd.f32 %v3538_v17, %v3526_v26 }
 0x2e7   :  { %v6150_v47 = vpop.eup %6149 }
 0x2e8   :  { %v3460_v57 = vpop.f32.mrf.mxu3  ;;  %v3853_v51 = vmul.f32 0.6931472, %v6150_v47 }
 0x2e9   :  { %v3461_v58 = vadd.f32 %v3460_v57, %v3448_v55 }
 0x2ea   :  { %v3854_v53 = vsub.f32 0.0, %v3853_v51 }
 0x2eb   :  { %v3687_v50 = vadd.f32 %v3686_v62, %v3461_v58 }
 0x2ed   :  { %v3540_v59 = vpop.f32.mrf.mxu1  ;;  %v6527_v30 = vmul.f32 %v3687_v50, %v6516_v3 }
 0x2ef   :  { %3689 = vmax.xlane.f32.xlu0 %v6527_v30 }
 0x2f0   :  { %v3462_v63 = vpop.f32.mrf.mxu3 }
 0x2f2   :  { %v3577_v28 = vpop.f32.mrf.mxu0 }
 0x2f3   :  { %v3578_v49 = vadd.f32 %v3577_v28, %v2522_v24 }
 0x2f8   :  { %v3512_v6 = vpop.f32.mrf.mxu3 }
 0x2f9   :  { %v3513_v10 = vadd.f32 %v3512_v6, %v3500_v35  ;;  %v3551_v11 = vpop.f32.mrf.mxu2 }
 0x2fa   :  { %v3579_v9 = vpop.f32.mrf.mxu0  ;;  %v3552_v31 = vadd.f32 %v3551_v11, %v3539_v44 }
 0x2fb   :  { %v3743_v12 = vadd.f32 %v3742_v4, %v3513_v10 }
 0x2fd   :  { %v3744_v33 = vmul.f32 %v3743_v12, %v6516_v3 }
 0x2ff   :  { %3745 = vmax.xlane.f32.xlu1 %v3744_v33 }
 0x300   :  { %v3514_v20 = vpop.f32.mrf.mxu3 }
 0x301   :  { %v3553_v21 = vpop.f32.mrf.mxu2 }
 0x303   :  { %v3590_v16 = vpop.f32.mrf.mxu1 }
 0x304   :  { %v3591_v17 = vadd.f32 %v3590_v16, %v3578_v49 }
 0x30b   :  { %v3592_v2 = vpop.f32.mrf.mxu1 }
 0x318   :  { %v3564_v34 = vpop.f32.mrf.mxu3 }
 0x319   :  { %v3565_v37 = vadd.f32 %v3564_v34, %v3552_v31  ;;  %v3603_v39 = vpop.f32.mrf.mxu2 }
 0x31a   :  { %v3604_v52 = vadd.f32 %v3603_v39, %v3591_v17 }
 0x31b   :  { %v3799_v22 = vadd.f32 %v3798_v32, %v3565_v37 }
 0x31d   :  { %v3800_v36 = vmul.f32 %v3799_v22, %v6516_v3 }
 0x31f   :  { %3801 = vmax.xlane.f32.xlu1 %v3800_v36 }
 0x320   :  { %v3566_v45 = vpop.f32.mrf.mxu3 }
 0x321   :  { %v3605_v46 = vpop.f32.mrf.mxu2 }
 0x338   :  { %v3616_v54 = vpop.f32.mrf.mxu3 }
 0x339   :  { %v3617_v42 = vadd.f32 %v3616_v54, %v3604_v52 }
 0x33b   :  { %v3855_v55 = vadd.f32 %v3854_v53, %v3617_v42 }
 0x33d   :  { %v3856_v62 = vmul.f32 %v3855_v55, %v6516_v3 }
 0x33f   :  { %3857 = vmax.xlane.f32.xlu2 %v3856_v62 }
 0x340   :  { %v3618_v57 = vpop.f32.mrf.mxu3 }
 0x352   :  { %v3633_v58 = vpop.xlane.xlu0 %3632 }
 0x353   :  { %v3634_v50 = vsub.f32 %v6519_v43, %v3633_v58 }
 0x355   :  { %v3635_v59 = vmul.f32 1.442695, %v3634_v50 }
 0x357   :  { %6151 = vpow2.f32 %v3635_v59 }
 0x35d   :  { %v6152_v8 = vpop.eup %6151 }
 0x35e   :  { %3637 = vadd.xlane.f32.xlu2 %v6152_v8 }
 0x362   :  { %v3690_v15 = vpop.xlane.xlu0 %3689 }
 0x363   :  { %v3691_v60 = vsub.f32 %v6527_v30, %v3690_v15 }
 0x365   :  { %v3692_v61 = vmul.f32 1.442695, %v3691_v60 }
 0x367   :  { %6153 = vpow2.f32 %v3692_v61 }
 0x36d   :  { %v6154_v27 = vpop.eup %6153 }
 0x36e   :  { %3694 = vadd.xlane.f32.xlu0 %v6154_v27 }
 0x372   :  { %v3746_v63 = vpop.xlane.xlu1 %3745 }
 0x373   :  { %v3747_v28 = vsub.f32 %v3744_v33, %v3746_v63 }
 0x375   :  { %v3748_v0 = vmul.f32 1.442695, %v3747_v28 }
 0x377   :  { %6155 = vpow2.f32 %v3748_v0 }
 0x37d   :  { %v6543_v3 = vpop.eup %6155 }
 0x37e   :  { %3750 = vadd.xlane.f32.xlu1 %v6543_v3 }
 0x392   :  { %v3802_v43 = vpop.xlane.xlu1 %3801 }
 0x393   :  { %v3803_v1 = vsub.f32 %v3800_v36, %v3802_v43 }
 0x395   :  { %v3804_v48 = vmul.f32 1.442695, %v3803_v1 }
 0x397   :  { %6157 = vpow2.f32 %v3804_v48 }
 0x39d   :  { %v6546_v35 = vpop.eup %6157 }
 0x39e   :  { %3806 = vadd.xlane.f32.xlu2 %v6546_v35 }
 0x3b2   :  { %v3858_v30 = vpop.xlane.xlu2 %3857 }
 0x3b3   :  { %v3859_v4 = vsub.f32 %v3856_v62, %v3858_v30 }
 0x3b5   :  { %v3860_v5 = vmul.f32 1.442695, %v3859_v4 }
 0x3b7   :  { %6159 = vpow2.f32 %v3860_v5 }
 0x3bd   :  { %v6549_v6 = vpop.eup %6159 }
 0x3be   :  { %3862 = vadd.xlane.f32.xlu0 %v6549_v6 }
 0x3d1   :  { %v3638_v9 = vpop.xlane.xlu2 %3637 }
 0x3d2   :  { %6161 = vrcp.f32 %v3638_v9  ;;  %v3650_v7 = vand.u32 2147483648, %v3638_v9  ;;  %v3648_v14 = vand.u32 2147483647, %v3638_v9  ;;  %vm3644_vm2 = vweird.f32 %v3638_v9 }
 0x3d4   :  { %v3651_v20 = vor.u32 1.1754944e-38, %v3650_v7  ;;  %vm3649_vm4 = vcmp.eq.f32.partialorder %v3648_v14, 8.507059e+37 }
 0x3d8   :  { %v6162_v10 = vpop.eup %6161 }
 0x3d9   :  { %v3640_v11 = vmul.f32 %v6162_v10, %v3638_v9  ;;  %vm3645_vm1 = vweird.f32 %v6162_v10 }
 0x3da   :  { %vm3646_vm3 = vmor %vm3644_vm2, %vm3645_vm1 }
 0x3db   :  { %v3641_v12 = vsub.f32 1.0, %v3640_v11 }
 0x3dd   :  { %v3642_v33 = vmul.f32 %v6162_v10, %v3641_v12 }
 0x3df   :  { %v3643_v16 = vadd.f32 %v6162_v10, %v3642_v33 }
 0x3e1   :  { %v3695_v21 = vpop.xlane.xlu0 %3694  ;;  %v3647_v56 = vsel %vm3646_vm3, %v6162_v10, %v3643_v16 }
 0x3e2   :  { %6163 = vrcp.f32 %v3695_v21  ;;  %v3652_v2 = vsel %vm3649_vm4, %v3651_v20, %v3647_v56  ;;  %v3707_v26 = vand.u32 2147483648, %v3695_v21  ;;  %v3705_v44 = vand.u32 2147483647, %v3695_v21 }
 0x3e3   :  { %v6552_v13 = vmul.f32 %v6152_v8, %v3652_v2  ;;  %vm3701_vm6 = vweird.f32 %v3695_v21 }
 0x3e4   :  { %v3708_v32 = vor.u32 1.1754944e-38, %v3707_v26  ;;  %vm3706_vm8 = vcmp.eq.f32.partialorder %v3705_v44, 8.507059e+37 }
 0x3e5   :  { %3656 = vmax.xlane.f32.xlu1 %v6552_v13 }
 0x3e8   :  { %v6164_v18 = vpop.eup %6163 }
 0x3e9   :  { %v3697_v23 = vmul.f32 %v6164_v18, %v3695_v21  ;;  %vm3702_vm5 = vweird.f32 %v6164_v18 }
 0x3ea   :  { %vm3703_vm7 = vmor %vm3701_vm6, %vm3702_vm5 }
 0x3eb   :  { %v3698_v25 = vsub.f32 1.0, %v3697_v23 }
 0x3ed   :  { %v3699_v29 = vmul.f32 %v6164_v18, %v3698_v25 }
 0x3ef   :  { %v3700_v31 = vadd.f32 %v6164_v18, %v3699_v29 }
 0x3f1   :  { %v3751_v19 = vpop.xlane.xlu1 %3750  ;;  %v3704_v34 = vsel %vm3703_vm7, %v6164_v18, %v3700_v31 }
 0x3f2   :  { %6165 = vrcp.f32 %v3751_v19  ;;  %v3709_v37 = vsel %vm3706_vm8, %v3708_v32, %v3704_v34  ;;  %v3763_v41 = vand.u32 2147483648, %v3751_v19  ;;  %v3761_v46 = vand.u32 2147483647, %v3751_v19 }
 0x3f3   :  { %v6555_v39 = vmul.f32 %v6154_v27, %v3709_v37  ;;  %vm3757_vm10 = vweird.f32 %v3751_v19 }
 0x3f4   :  { %v3764_v24 = vor.u32 1.1754944e-38, %v3763_v41  ;;  %vm3762_vm12 = vcmp.eq.f32.partialorder %v3761_v46, 8.507059e+37 }
 0x3f5   :  { %3711 = vmax.xlane.f32.xlu2 %v6555_v39 }
 0x3f8   :  { %v6166_v22 = vpop.eup %6165 }
 0x3f9   :  { %v3753_v40 = vmul.f32 %v6166_v22, %v3751_v19  ;;  %vm3758_vm9 = vweird.f32 %v6166_v22 }
 0x3fa   :  { %vm3759_vm11 = vmor %vm3757_vm10, %vm3758_vm9 }
 0x3fb   :  { %v3754_v36 = vsub.f32 1.0, %v3753_v40 }
 0x3fd   :  { %v3755_v45 = vmul.f32 %v6166_v22, %v3754_v36 }
 0x3ff   :  { %v3756_v38 = vadd.f32 %v6166_v22, %v3755_v45 }
 0x401   :  { %v3760_v47 = vsel %vm3759_vm11, %v6166_v22, %v3756_v38 }
 0x402   :  { %v3765_v49 = vsel %vm3762_vm12, %v3764_v24, %v3760_v47 }
 0x403   :  { %v3766_v51 = vmul.f32 %v6543_v3, %v3765_v49 }
 0x405   :  { %3767 = vmax.xlane.f32.xlu0 %v3766_v51 }
 0x411   :  { %v3807_v17 = vpop.xlane.xlu2 %3806 }
 0x412   :  { %6167 = vrcp.f32 %v3807_v17  ;;  %v3819_v42 = vand.u32 2147483648, %v3807_v17  ;;  %v3817_v62 = vand.u32 2147483647, %v3807_v17  ;;  %vm3813_vm14 = vweird.f32 %v3807_v17 }
 0x414   :  { %v3820_v58 = vor.u32 1.1754944e-38, %v3819_v42  ;;  %vm3818_vm0 = vcmp.eq.f32.partialorder %v3817_v62, 8.507059e+37 }
 0x418   :  { %v6168_v52 = vpop.eup %6167 }
 0x419   :  { %v3809_v53 = vmul.f32 %v6168_v52, %v3807_v17  ;;  %vm3814_vm13 = vweird.f32 %v6168_v52 }
 0x41a   :  { %vm3815_vm15 = vmor %vm3813_vm14, %vm3814_vm13 }
 0x41b   :  { %v3810_v54 = vsub.f32 1.0, %v3809_v53 }
 0x41d   :  { %v3811_v55 = vmul.f32 %v6168_v52, %v3810_v54 }
 0x41f   :  { %v3812_v57 = vadd.f32 %v6168_v52, %v3811_v55 }
 0x421   :  { %v3816_v50 = vsel %vm3815_vm15, %v6168_v52, %v3812_v57  ;;  %v6281_v57 = vmov 0.0  }
 0x422   :  { %v3821_v59 = vsel %vm3818_vm0, %v3820_v58, %v3816_v50 }
 0x423   :  { %v3822_v8 = vmul.f32 %v6546_v35, %v3821_v59  ;;  %v3654_v35 = vlaneseq }
 0x425   :  { %3823 = vmax.xlane.f32.xlu1 %v3822_v8  ;;  %v6561_v4 = vand.u32 127, %v3654_v35 }
 0x431   :  { %v3863_v15 = vpop.xlane.xlu0 %3862 }
 0x432   :  { %6169 = vrcp.f32 %v3863_v15  ;;  %v3875_v63 = vand.u32 2147483648, %v3863_v15  ;;  %v3873_v0 = vand.u32 2147483647, %v3863_v15  ;;  %vm3869_vm2 = vweird.f32 %v3863_v15 }
 0x434   :  { %v3876_v43 = vor.u32 1.1754944e-38, %v3875_v63  ;;  %vm3874_vm4 = vcmp.eq.f32.partialorder %v3873_v0, 8.507059e+37 }
 0x438   :  { %v6170_v60 = vpop.eup %6169 }
 0x439   :  { %v3865_v61 = vmul.f32 %v6170_v60, %v3863_v15  ;;  %vm3870_vm1 = vweird.f32 %v6170_v60 }
 0x43a   :  { %vm3871_vm3 = vmor %vm3869_vm2, %vm3870_vm1 }
 0x43b   :  { %v3866_v27 = vsub.f32 1.0, %v3865_v61 }
 0x43d   :  { %v3867_v28 = vmul.f32 %v6170_v60, %v3866_v27 }
 0x43f   :  { %v3868_v3 = vadd.f32 %v6170_v60, %v3867_v28 }
 0x441   :  { %v3872_v1 = vsel %vm3871_vm3, %v6170_v60, %v3868_v3 }
 0x442   :  { %v3877_v48 = vsel %vm3874_vm4, %v3876_v43, %v3872_v1 }
 0x443   :  { %v3878_v30 = vmul.f32 %v6549_v6, %v3877_v48 }
 0x445   :  { %3879 = vmax.xlane.f32.xlu2 %v3878_v30 }
 0x458   :  { %v3657_v5 = vpop.xlane.xlu1 %3656 }
 0x459   :  { %vm3658_vm5 = vcmp.eq.f32.partialorder %v6552_v13, %v3657_v5 }
 0x45a   :  { %v3659_v9 = vsel %vm3658_vm5, %v6561_v4, 128 }
 0x45b   :  { %v3661_v10 = vshra.s32 %v3659_v9, 16  ;;  %v3660_v44 = vand.u32 65535, %v3659_v9 }
 0x45d   :  { %v3663_v11 = vcvt.s32.f32 %v3661_v10  ;;  %v3662_v32 = vcvt.s32.f32 %v3660_v44 }
 0x45f   :  { %3664 = vmin.xlane.f32.xlu0 %v3663_v11 }
 0x468   :  { %v3712_v12 = vpop.xlane.xlu2 %3711 }
 0x469   :  { %vm3713_vm6 = vcmp.eq.f32.partialorder %v6555_v39, %v3712_v12 }
 0x46a   :  { %v3714_v7 = vsel %vm3713_vm6, %v6561_v4, 128 }
 0x46b   :  { %v3716_v33 = vshra.s32 %v3714_v7, 16  ;;  %v3715_v34 = vand.u32 65535, %v3714_v7 }
 0x46d   :  { %v3718_v14 = vcvt.s32.f32 %v3716_v33  ;;  %v3717_v39 = vcvt.s32.f32 %v3715_v34 }
 0x46f   :  { %3719 = vmin.xlane.f32.xlu1 %v3718_v14 }
 0x478   :  { %v3768_v6 = vpop.xlane.xlu0 %3767 }
 0x479   :  { %vm3769_vm7 = vcmp.eq.f32.partialorder %v3766_v51, %v3768_v6 }
 0x47a   :  { %v3770_v16 = vsel %vm3769_vm7, %v6561_v4, 128 }
 0x47b   :  { %v3772_v20 = vshra.s32 %v3770_v16, 16  ;;  %v3771_v40 = vand.u32 65535, %v3770_v16 }
 0x47d   :  { %v3774_v21 = vcvt.s32.f32 %v3772_v20  ;;  %v3773_v41 = vcvt.s32.f32 %v3771_v40 }
 0x47f   :  { %3775 = vmin.xlane.f32.xlu2 %v3774_v21 }
 0x498   :  { %v3824_v56 = vpop.xlane.xlu1 %3823 }
 0x499   :  { %vm3825_vm8 = vcmp.eq.f32.partialorder %v3822_v8, %v3824_v56 }
 0x49a   :  { %v3826_v2 = vsel %vm3825_vm8, %v6561_v4, 128 }
 0x49b   :  { %v3828_v13 = vshra.s32 %v3826_v2, 16  ;;  %v3827_v46 = vand.u32 65535, %v3826_v2 }
 0x49d   :  { %v3830_v18 = vcvt.s32.f32 %v3828_v13  ;;  %v3829_v24 = vcvt.s32.f32 %v3827_v46 }
 0x49f   :  { %3831 = vmin.xlane.f32.xlu0 %v3830_v18 }
 0x4b8   :  { %v3880_v23 = vpop.xlane.xlu2 %3879 }
 0x4b9   :  { %vm3881_vm9 = vcmp.eq.f32.partialorder %v3878_v30, %v3880_v23 }
 0x4ba   :  { %v3882_v25 = vsel %vm3881_vm9, %v6561_v4, 128 }
 0x4bb   :  { %v3884_v26 = vshra.s32 %v3882_v25, 16  ;;  %v3883_v49 = vand.u32 65535, %v3882_v25 }
 0x4bd   :  { %v3886_v29 = vcvt.s32.f32 %v3884_v26  ;;  %v3885_v17 = vcvt.s32.f32 %v3883_v49 }
 0x4bf   :  { %3887 = vmin.xlane.f32.xlu1 %v3886_v29 }
 0x4d2   :  { %v3665_v31 = vpop.xlane.xlu0 %3664 }
 0x4d3   :  { %vm3666_vm10 = vcmp.eq.f32.partialorder %v3663_v11, %v3665_v31  ;;  %v3671_v53 = vcvt.f32.s32 %v3665_v31 }
 0x4d4   :  { %v3667_v19 = vsel %vm3666_vm10, %v3662_v32, inf }
 0x4d5   :  { %3668 = vmin.xlane.f32.xlu2 %v3667_v19  ;;  %v3672_v42 = vshll.u32 %v3671_v53, 16 }
 0x4e2   :  { %v3720_v37 = vpop.xlane.xlu1 %3719 }
 0x4e3   :  { %vm3721_vm11 = vcmp.eq.f32.partialorder %v3718_v14, %v3720_v37  ;;  %v3726_v50 = vcvt.f32.s32 %v3720_v37 }
 0x4e4   :  { %v3722_v22 = vsel %vm3721_vm11, %v3717_v39, inf }
 0x4e5   :  { %3723 = vmin.xlane.f32.xlu0 %v3722_v22  ;;  %v3727_v8 = vshll.u32 %v3726_v50, 16 }
 0x4f2   :  { %v3776_v36 = vpop.xlane.xlu2 %3775 }
 0x4f3   :  { %vm3777_vm12 = vcmp.eq.f32.partialorder %v3774_v21, %v3776_v36  ;;  %v3782_v27 = vcvt.f32.s32 %v3776_v36 }
 0x4f4   :  { %v3778_v45 = vsel %vm3777_vm12, %v3773_v41, inf }
 0x4f5   :  { %3779 = vmin.xlane.f32.xlu1 %v3778_v45  ;;  %v3783_v28 = vshll.u32 %v3782_v27, 16 }
 0x512   :  { %v3832_v38 = vpop.xlane.xlu0 %3831 }
 0x513   :  { %vm3833_vm13 = vcmp.eq.f32.partialorder %v3830_v18, %v3832_v38  ;;  %v3838_v1 = vcvt.f32.s32 %v3832_v38 }
 0x514   :  { %v3834_v47 = vsel %vm3833_vm13, %v3829_v24, inf }
 0x515   :  { %3835 = vmin.xlane.f32.xlu2 %v3834_v47  ;;  %v3839_v30 = vshll.u32 %v3838_v1, 16 }
 0x532   :  { %v3888_v51 = vpop.xlane.xlu1 %3887 }
 0x533   :  { %vm3889_vm14 = vcmp.eq.f32.partialorder %v3886_v29, %v3888_v51  ;;  %v3894_v10 = vcvt.f32.s32 %v3888_v51 }
 0x534   :  { %v3890_v52 = vsel %vm3889_vm14, %v3885_v17, inf }
 0x535   :  { %3891 = vmin.xlane.f32.xlu0 %v3890_v52  ;;  %v3895_v12 = vshll.u32 %v3894_v10, 16 }
 0x548   :  { %v3669_v54 = vpop.xlane.xlu2 %3668 }
 0x549   :  { %v3670_v55 = vcvt.f32.s32 %v3669_v54 }
 0x54b   :  { %v3673_v62 = vadd.s32 %v3672_v42, %v3670_v55 }
 0x54d   :  { %vm3674_vm15 = vcmp.eq.s32.totalorder %v6561_v4, %v3673_v62 }
 0x54e   :  { %v5673_v58 = vsel %vm3674_vm15, 1.0, %v6281_v57 }
 0x54f   :  { %3677 = vst [vmem:[%s6601_s11] sm:$0xff] %v5673_v58 }
 0x558   :  { %v3724_v59 = vpop.xlane.xlu0 %3723 }
 0x559   :  { %v3725_v15 = vcvt.f32.s32 %v3724_v59 }
 0x55b   :  { %v3728_v60 = vadd.s32 %v3727_v8, %v3725_v15 }
 0x55d   :  { %vm3729_vm0 = vcmp.eq.s32.totalorder %v6561_v4, %v3728_v60 }
 0x55e   :  { %v5674_v61 = vsel %vm3729_vm0, 1.0, %v6281_v57 }
 0x55f   :  { %5675 = vst [vmem:[%s6601_s11 + $0x8] sm:$0xff] %v5674_v61 }
 0x568   :  { %v3780_v63 = vpop.xlane.xlu1 %3779 }
 0x569   :  { %v3781_v0 = vcvt.f32.s32 %v3780_v63 }
 0x56b   :  { %v3784_v3 = vadd.s32 %v3783_v28, %v3781_v0 }
 0x56d   :  { %vm3785_vm1 = vcmp.eq.s32.totalorder %v6561_v4, %v3784_v3 }
 0x56e   :  { %v5676_v43 = vsel %vm3785_vm1, 1.0, %v6281_v57 }
 0x56f   :  { %5677 = vst [vmem:[%s6601_s11 + $0x10] sm:$0xff] %v5676_v43 }
 0x588   :  { %v3836_v48 = vpop.xlane.xlu2 %3835 }
 0x589   :  { %v3837_v35 = vcvt.f32.s32 %v3836_v48 }
 0x58b   :  { %v3840_v5 = vadd.s32 %v3839_v30, %v3837_v35 }
 0x58d   :  { %vm3841_vm2 = vcmp.eq.s32.totalorder %v6561_v4, %v3840_v5 }
 0x58e   :  { %v5678_v9 = vsel %vm3841_vm2, 1.0, %v6281_v57 }
 0x58f   :  { %5679 = vst [vmem:[%s6601_s11 + $0x18] sm:$0xff] %v5678_v9 }
 0x5a8   :  { %v3892_v11 = vpop.xlane.xlu0 %3891 }
 0x5a9   :  { %v3893_v7 = vcvt.f32.s32 %v3892_v11 }
 0x5ab   :  { %v3896_v33 = vadd.s32 %v3895_v12, %v3893_v7 }
 0x5ad   :  { %vm3897_vm3 = vcmp.eq.s32.totalorder %v6561_v4, %v3896_v33 }
 0x5ae   :  { %v5680_v14 = vsel %vm3897_vm3, 1.0, %v6281_v57 }
 0x5af   :  { %5681 = vst [vmem:[%s6601_s11 + $0x20] sm:$0xff] %v5680_v14 }
 0x5b0   :  { %3906 = vsyncpa [#allocation4], 1 }
 0x5b1   :  { %3907 = vsyncpa [#allocation6], 1 }
 0x5b2   :  { %3908 = vsyncpa [#allocation9], 1 }

</bundles_post_ra>
